<compile_context>
chip_gen: v6e
topology: v6e:2x2x1
jax: 0.10.0
libtpu: 0.0.40
codegen_flags: <defaults>
</compile_context>

<pallas_src>
import math

import jax
import jax.numpy as jnp
from jax.experimental import pallas as pl
from jax.experimental.pallas import tpu as pltpu


# ---------------------------------------------------------------------------
# Shape helpers
# ---------------------------------------------------------------------------
def calc_out_length(l_in, kernel_lengths, stride, dilation, padding=0):
    l_out = l_in
    for kernel in kernel_lengths:
        l_out = math.floor((l_out + 2 * padding - dilation * (kernel - 1) - 1)
                           / stride + 1)
    return l_out


def _conv_out_len(l_in, k, stride, dilation):
    return (l_in - dilation * (k - 1) - 1) // stride + 1


_VMEM_LIMIT_BYTES = 48 * 1024 * 1024   # > every default scoped limit, < v7x phys


# ---------------------------------------------------------------------------
# Fused forward: one pallas_call for the whole network
# ---------------------------------------------------------------------------
def ecg_forward(params, x1, x2, *, short_stride=1, short_dilation=1,
                long_stride=1, long_dilation=1, batch_tile=8):
    """x1: (B, 12, L1), x2: (B, 1, L2) -> (B, n_out) f32 logits."""
    if short_stride != 1 or long_stride != 1:
        # TODO(synk): stride > 1 (lane-strided patch slice) not supported.
        raise NotImplementedError("only stride == 1 is supported")

    B, C1, L1 = x1.shape
    _, C2, L2 = x2.shape
    short_params = params["short"]   # [(w (C_out, C_in, K), b (C_out,)), ...]
    long_params = params["long"]
    fc_params = params["fc"]         # [(W (d_in, d_out), b (d_out,)), ...]

    # ---- batch tile: multiple of 8 dividing B, else whole batch ------------
    TB = min(batch_tile, B)
    if (B % TB != 0) or (TB != B and TB % 8 != 0):
        TB = B
    assert B % TB == 0
    n_blocks = B // TB

    # ---- host-side (one-time) parameter layout prep -------------------------
    # Conv taps folded into the contraction dim: (C_out, C_in, K) ->
    # (C_out, K*C_in) in bf16; biases -> (C_out, 1) f32 for lane broadcast.
    def prep_conv(layer_params):
        prepped, meta = [], []
        for (w, b) in layer_params:
            c_out, c_in, k = w.shape
            w_flat = jnp.transpose(w, (0, 2, 1)).reshape(c_out, k * c_in)
            prepped.append((w_flat.astype(jnp.bfloat16),
                            b.reshape(c_out, 1).astype(jnp.float32)))
            meta.append((k, c_out, c_in))
        return prepped, meta

    short_prepped, short_meta = prep_conv(short_params)
    long_prepped, long_meta = prep_conv(long_params)

    def stack_out_len(l_in, meta, stride, dilation):
        l = l_in
        for (k, _, _) in meta:
            l = _conv_out_len(l, k, stride, dilation)
        return l

    Ls = stack_out_len(L1, short_meta, short_stride, short_dilation)
    Ll = stack_out_len(L2, long_meta, long_stride, long_dilation)
    Cs = short_meta[-1][1]
    Cl = long_meta[-1][1]
    short_dim, long_dim = Cs * Ls, Cl * Ll

    # Fold concat + first Linear: split its weight along the input dim and
    # reshape to (C, L, F) so it contracts directly with the (C, L) conv
    # outputs (PyTorch flatten order is c*L + l).
    w_fc1, b_fc1 = fc_params[0]
    assert w_fc1.shape[0] == short_dim + long_dim
    F1 = w_fc1.shape[1]
    w1_short = w_fc1[:short_dim].reshape(Cs, Ls, F1).astype(jnp.bfloat16)
    w1_long = w_fc1[short_dim:].reshape(Cl, Ll, F1).astype(jnp.bfloat16)
    b1 = b_fc1.reshape(1, F1).astype(jnp.float32)
    fc_rest = [(w.astype(jnp.bfloat16),
                b.reshape(1, w.shape[1]).astype(jnp.float32))
               for (w, b) in fc_params[1:]]
    n_fc_rest = len(fc_rest)
    n_out = fc_params[-1][0].shape[1]

    n_short, n_long = len(short_prepped), len(long_prepped)

    # ---- flat argument list + BlockSpecs ------------------------------------
    args, in_specs = [], []

    # Inputs: blocked over batch (pipelined DMA of the next tile).
    args.append(x1.astype(jnp.bfloat16))
    in_specs.append(pl.BlockSpec((TB, C1, L1), lambda i: (i, 0, 0)))
    args.append(x2.astype(jnp.bfloat16))
    in_specs.append(pl.BlockSpec((TB, C2, L2), lambda i: (i, 0, 0)))

    # Weights/biases: whole-array blocks with constant index_map (resident).
    def add_full(a):
        args.append(a)
        in_specs.append(pl.BlockSpec(a.shape, lambda i, _nd=a.ndim: (0,) * _nd))

    for (wk, bb) in short_prepped:
        add_full(wk); add_full(bb)
    for (wk, bb) in long_prepped:
        add_full(wk); add_full(bb)
    add_full(w1_short); add_full(w1_long); add_full(b1)
    for (w, bb) in fc_rest:
        add_full(w); add_full(bb)

    # ---- the fused kernel ----------------------------------------------------
    def kernel(*refs):
        x1_ref, x2_ref = refs[0], refs[1]
        p = 2
        short_refs = [(refs[p + 2 * i], refs[p + 2 * i + 1])
                      for i in range(n_short)]
        p += 2 * n_short
        long_refs = [(refs[p + 2 * i], refs[p + 2 * i + 1])
                     for i in range(n_long)]
        p += 2 * n_long
        w1s_ref, w1l_ref, b1_ref = refs[p], refs[p + 1], refs[p + 2]
        p += 3
        fc_rest_refs = [(refs[p + 2 * i], refs[p + 2 * i + 1])
                        for i in range(n_fc_rest)]
        o_ref = refs[p + 2 * n_fc_rest]

        def conv_stack(x, layer_refs, meta, dilation):
            # x: (C_in, L_in) bf16 value.  One GEMM per layer (taps folded
            # into the contraction dim), bias + ReLU fused, f32 accumulation.
            for (w_ref, b_ref), (k_len, c_out, c_in) in zip(layer_refs, meta):
                l_in = x.shape[1]
                l_out = l_in - dilation * (k_len - 1)          # stride == 1
                patches = jnp.concatenate(
                    [x[:, k * dilation:k * dilation + l_out]
                     for k in range(k_len)], axis=0)           # (K*C_in, L_out)
                acc = jnp.dot(w_ref[...], patches,
                              preferred_element_type=jnp.float32)
                x = jnp.maximum(acc + b_ref[...], 0.0).astype(jnp.bfloat16)
            return x                                           # (C_out, L_out)

        # Per-sample conv stacks (batch tile small; everything stays in VMEM).
        a_s = [conv_stack(x1_ref[s], short_refs, short_meta, short_dilation)
               for s in range(TB)]
        a_l = [conv_stack(x2_ref[s], long_refs, long_meta, long_dilation)
               for s in range(TB)]

        # Fused concat + FC1 over the whole batch tile: stack conv outputs to
        # (C, TB, L) and contract with the (C, L, F1) weight in one batched
        # einsum; the sum over C is a cheap outer-axis reduction.
        as_stacked = jnp.stack(a_s, axis=1)                    # (Cs, TB, Ls)
        al_stacked = jnp.stack(a_l, axis=1)                    # (Cl, TB, Ll)
        hs = jnp.einsum('ctl,clf->ctf', as_stacked, w1s_ref[...],
                        preferred_element_type=jnp.float32).sum(axis=0)
        hl = jnp.einsum('ctl,clf->ctf', al_stacked, w1l_ref[...],
                        preferred_element_type=jnp.float32).sum(axis=0)
        h = hs + hl + b1_ref[...]                              # (TB, F1) f32
        if n_fc_rest > 0:            # first FC is a hidden layer -> ReLU
            h = jnp.maximum(h, 0.0)

        for i, (w_ref, bb_ref) in enumerate(fc_rest_refs):
            h = jnp.dot(h.astype(jnp.bfloat16), w_ref[...],
                        preferred_element_type=jnp.float32) + bb_ref[...]
            if i < n_fc_rest - 1:
                h = jnp.maximum(h, 0.0)

        o_ref[...] = h.astype(o_ref.dtype)     # single (TB, n_out) block store

    # ---- advisory cost estimate ----------------------------------------------
    flops = 0
    l = L1
    for (k, c_out, c_in) in short_meta:
        l = _conv_out_len(l, k, short_stride, short_dilation)
        flops += 2 * B * c_out * c_in * k * l
    l = L2
    for (k, c_out, c_in) in long_meta:
        l = _conv_out_len(l, k, long_stride, long_dilation)
        flops += 2 * B * c_out * c_in * k * l
    d_in = short_dim + long_dim
    for (w, _) in fc_params:
        flops += 2 * B * d_in * w.shape[1]
        d_in = w.shape[1]
    bytes_accessed = sum(int(a.size) * a.dtype.itemsize for a in args)
    bytes_accessed += B * n_out * 4

    return pl.pallas_call(
        kernel,
        out_shape=jax.ShapeDtypeStruct((B, n_out), jnp.float32),
        grid=(n_blocks,),
        in_specs=in_specs,
        out_specs=pl.BlockSpec((TB, n_out), lambda i: (i, 0)),
        compiler_params=pltpu.CompilerParams(
            dimension_semantics=("parallel",),       # v7x dual-TC sharding
            vmem_limit_bytes=_VMEM_LIMIT_BYTES),
        cost_estimate=pl.CostEstimate(flops=flops, transcendentals=0,
                                      bytes_accessed=bytes_accessed),
    )(*args)


# ---------------------------------------------------------------------------
# Parameter init (deterministic, PyTorch-style uniform fan-in bounds)
# ---------------------------------------------------------------------------
def init_convnet_params(key, in_channels, hidden_channels, kernel_lengths):
    params = []
    c_in = in_channels
    for c_out, k in zip(hidden_channels, kernel_lengths):
        key, kw, kb = jax.random.split(key, 3)
        bound = 1.0 / math.sqrt(c_in * k)
        w = jax.random.uniform(kw, (c_out, c_in, k), jnp.float32, -bound, bound)
        b = jax.random.uniform(kb, (c_out,), jnp.float32, -bound, bound)
        params.append((w, b))
        c_in = c_out
    return params, key


def init_fc_params(key, in_dim, fc_hidden_dims, num_of_classes):
    dims = list(fc_hidden_dims) + [1 if num_of_classes == 2 else num_of_classes]
    params = []
    d_in = in_dim
    for d_out in dims:
        key, kw, kb = jax.random.split(key, 3)
        bound = 1.0 / math.sqrt(d_in)
        w = jax.random.uniform(kw, (d_in, d_out), jnp.float32, -bound, bound)
        b = jax.random.uniform(kb, (d_out,), jnp.float32, -bound, bound)
        params.append((w, b))
        d_in = d_out
    return params, key


# ---------------------------------------------------------------------------
# Pure-JAX reference with matched bf16 operand rounding (f32 accumulation),
# so the comparison validates the kernel wiring at tight tolerance.
# ---------------------------------------------------------------------------
def _r(x):  # round operand through bf16 (what the kernel feeds the MXU)
    return x.astype(jnp.bfloat16).astype(jnp.float32)


def _conv1d_ref(x, w, b, stride, dilation):
    _, _, l_in = x.shape
    _, _, k = w.shape
    l_out = _conv_out_len(l_in, k, stride, dilation)
    idx = (jnp.arange(l_out)[:, None] * stride
           + jnp.arange(k)[None, :] * dilation)             # (L_out, K)
    patches = x[:, :, idx]                                   # (B, C_in, L_out, K)
    return jnp.einsum('bclk,ock->bol', patches, w) + b[None, :, None]


def ecg_forward_ref(params, x1, x2, *, short_stride, short_dilation,
                    long_stride, long_dilation):
    h = _r(x1)
    for (w, b) in params["short"]:
        h = _r(jnp.maximum(
            _conv1d_ref(h, _r(w), b, short_stride, short_dilation), 0.0))
    out1 = h.reshape(x1.shape[0], -1)
    h = _r(x2)
    for (w, b) in params["long"]:
        h = _r(jnp.maximum(
            _conv1d_ref(h, _r(w), b, long_stride, long_dilation), 0.0))
    out2 = h.reshape(x2.shape[0], -1)
    out = jnp.concatenate([out1, out2], axis=1)
    fc = params["fc"]
    for i, (w, b) in enumerate(fc):
        out = _r(out) @ _r(w) + b
        if i < len(fc) - 1:
            out = jnp.maximum(out, 0.0)
    return out


if __name__ == "__main__":
    # Small config consistent with the module (12-lead short input, 1-lead long).
    B = 16
    short_hidden_channels = [8, 16]
    short_kernel_lengths = [5, 3]
    long_hidden_channels = [4, 8]
    long_kernel_lengths = [7, 5]
    fc_hidden_dims = [32]
    short_stride = long_stride = 1
    short_dilation = long_dilation = 1
    short_input_length = 64
    long_input_length = 128
    num_of_classes = 2

    key = jax.random.PRNGKey(0)
    short_params, key = init_convnet_params(
        key, 12, short_hidden_channels, short_kernel_lengths)
    long_params, key = init_convnet_params(
        key, 1, long_hidden_channels, long_kernel_lengths)

    short_out_dim = short_hidden_channels[-1] * calc_out_length(
        short_input_length, short_kernel_lengths, short_stride, short_dilation)
    long_out_dim = long_hidden_channels[-1] * calc_out_length(
        long_input_length, long_kernel_lengths, long_stride, long_dilation)
    fc_params, key = init_fc_params(
        key, short_out_dim + long_out_dim, fc_hidden_dims, num_of_classes)

    params = {"short": short_params, "long": long_params, "fc": fc_params}

    key, k1, k2 = jax.random.split(key, 3)
    x1 = jax.random.normal(k1, (B, 12, short_input_length), jnp.float32)
    x2 = jax.random.normal(k2, (B, 1, long_input_length), jnp.float32)

    @jax.jit
    def fwd(p, a, b):
        return ecg_forward(p, a, b,
                           short_stride=short_stride,
                           short_dilation=short_dilation,
                           long_stride=long_stride,
                           long_dilation=long_dilation,
                           batch_tile=8)

    out = jax.block_until_ready(fwd(params, x1, x2))
    assert out.shape == (B, 1), out.shape

    ref = jax.block_until_ready(ecg_forward_ref(
        params, x1, x2,
        short_stride=short_stride, short_dilation=short_dilation,
        long_stride=long_stride, long_dilation=long_dilation))
    assert jnp.allclose(out, ref, atol=2e-3, rtol=2e-3), (out, ref)

    print("KERNEL_OK")
</pallas_src>

<mosaic_0001>
module attributes {stable_mosaic.version = 11 : i64} {
  func.func @kernel(%arg0: i32, %arg1: memref<8x12x64xbf16, #tpu.memory_space<vmem>>, %arg2: memref<8x1x128xbf16, #tpu.memory_space<vmem>>, %arg3: memref<8x60xbf16, #tpu.memory_space<vmem>>, %arg4: memref<8x1xf32, #tpu.memory_space<vmem>>, %arg5: memref<16x24xbf16, #tpu.memory_space<vmem>>, %arg6: memref<16x1xf32, #tpu.memory_space<vmem>>, %arg7: memref<4x7xbf16, #tpu.memory_space<vmem>>, %arg8: memref<4x1xf32, #tpu.memory_space<vmem>>, %arg9: memref<8x20xbf16, #tpu.memory_space<vmem>>, %arg10: memref<8x1xf32, #tpu.memory_space<vmem>>, %arg11: memref<16x58x32xbf16, #tpu.memory_space<vmem>>, %arg12: memref<8x118x32xbf16, #tpu.memory_space<vmem>>, %arg13: memref<1x32xf32, #tpu.memory_space<vmem>>, %arg14: memref<32x1xbf16, #tpu.memory_space<vmem>>, %arg15: memref<1x1xf32, #tpu.memory_space<vmem>>, %arg16: memref<8x1xf32, #tpu.memory_space<vmem>>) attributes {dimension_semantics = [#tpu.dimension_semantics<parallel>], iteration_bounds = array<i64: 2>, scalar_prefetch = 0 : i64, scratch_operands = 0 : i64, tpu.core_type = #tpu.core_type<tc>, window_params = [{transform_indices = @transform_0, window_bounds = array<i64: 8, 12, 64>}, {transform_indices = @transform_1, window_bounds = array<i64: 8, 1, 128>}, {pipeline_mode = #tpu.pipeline_mode<synchronous>, transform_indices = @transform_2, window_bounds = array<i64: 8, 60>}, {pipeline_mode = #tpu.pipeline_mode<synchronous>, transform_indices = @transform_3, window_bounds = array<i64: 8, 1>}, {pipeline_mode = #tpu.pipeline_mode<synchronous>, transform_indices = @transform_4, window_bounds = array<i64: 16, 24>}, {pipeline_mode = #tpu.pipeline_mode<synchronous>, transform_indices = @transform_5, window_bounds = array<i64: 16, 1>}, {pipeline_mode = #tpu.pipeline_mode<synchronous>, transform_indices = @transform_6, window_bounds = array<i64: 4, 7>}, {pipeline_mode = #tpu.pipeline_mode<synchronous>, transform_indices = @transform_7, window_bounds = array<i64: 4, 1>}, {pipeline_mode = #tpu.pipeline_mode<synchronous>, transform_indices = @transform_8, window_bounds = array<i64: 8, 20>}, {pipeline_mode = #tpu.pipeline_mode<synchronous>, transform_indices = @transform_9, window_bounds = array<i64: 8, 1>}, {pipeline_mode = #tpu.pipeline_mode<synchronous>, transform_indices = @transform_10, window_bounds = array<i64: 16, 58, 32>}, {pipeline_mode = #tpu.pipeline_mode<synchronous>, transform_indices = @transform_11, window_bounds = array<i64: 8, 118, 32>}, {pipeline_mode = #tpu.pipeline_mode<synchronous>, transform_indices = @transform_12, window_bounds = array<i64: 1, 32>}, {pipeline_mode = #tpu.pipeline_mode<synchronous>, transform_indices = @transform_13, window_bounds = array<i64: 32, 1>}, {pipeline_mode = #tpu.pipeline_mode<synchronous>, transform_indices = @transform_14, window_bounds = array<i64: 1, 1>}, {transform_indices = @transform_15, window_bounds = array<i64: 8, 1>}]} {
    %c0 = arith.constant 0 : index
    %c0_0 = arith.constant 0 : index
    %c0_1 = arith.constant 0 : index
    %0 = vector.load %arg1[%c0, %c0_0, %c0_1] : memref<8x12x64xbf16, #tpu.memory_space<vmem>>, vector<1x12x64xbf16>
    %1 = vector.shape_cast %0 : vector<1x12x64xbf16> to vector<12x64xbf16>
    %2 = vector.extract_strided_slice %1 {offsets = [0, 0], sizes = [12, 60], strides = [1, 1]} : vector<12x64xbf16> to vector<12x60xbf16>
    %3 = vector.extract_strided_slice %1 {offsets = [0, 1], sizes = [12, 60], strides = [1, 1]} : vector<12x64xbf16> to vector<12x60xbf16>
    %4 = vector.extract_strided_slice %1 {offsets = [0, 2], sizes = [12, 60], strides = [1, 1]} : vector<12x64xbf16> to vector<12x60xbf16>
    %5 = vector.extract_strided_slice %1 {offsets = [0, 3], sizes = [12, 60], strides = [1, 1]} : vector<12x64xbf16> to vector<12x60xbf16>
    %6 = vector.extract_strided_slice %1 {offsets = [0, 4], sizes = [12, 60], strides = [1, 1]} : vector<12x64xbf16> to vector<12x60xbf16>
    %7 = tpu.concatenate %2, %3, %4, %5, %6 in 0 : vector<12x60xbf16>, vector<12x60xbf16>, vector<12x60xbf16>, vector<12x60xbf16>, vector<12x60xbf16> -> vector<60x60xbf16>
    %c0_2 = arith.constant 0 : index
    %c0_3 = arith.constant 0 : index
    %8 = vector.load %arg3[%c0_2, %c0_3] : memref<8x60xbf16, #tpu.memory_space<vmem>>, vector<8x60xbf16>
    %cst = arith.constant dense<0.000000e+00> : vector<8x60xf32>
    %9 = tpu.matmul %8, %7, %cst {dimension_numbers = #tpu.dot_dimension_numbers<[1], [0], [0], [1], [0, 0, 1, 1], [], []>} : vector<8x60xbf16>, vector<60x60xbf16>, vector<8x60xf32> -> vector<8x60xf32>
    %c0_4 = arith.constant 0 : index
    %c0_5 = arith.constant 0 : index
    %10 = vector.load %arg4[%c0_4, %c0_5] : memref<8x1xf32, #tpu.memory_space<vmem>>, vector<8x1xf32>
    %11 = vector.broadcast %10 : vector<8x1xf32> to vector<8x60xf32>
    %12 = arith.addf %9, %11 : vector<8x60xf32>
    %cst_6 = arith.constant 0.000000e+00 : f32
    %13 = vector.broadcast %cst_6 : f32 to vector<8x60xf32>
    %14 = arith.maximumf %12, %13 : vector<8x60xf32>
    %15 = arith.truncf %14 : vector<8x60xf32> to vector<8x60xbf16>
    %16 = vector.extract_strided_slice %15 {offsets = [0, 0], sizes = [8, 58], strides = [1, 1]} : vector<8x60xbf16> to vector<8x58xbf16>
    %17 = vector.extract_strided_slice %15 {offsets = [0, 1], sizes = [8, 58], strides = [1, 1]} : vector<8x60xbf16> to vector<8x58xbf16>
    %18 = vector.extract_strided_slice %15 {offsets = [0, 2], sizes = [8, 58], strides = [1, 1]} : vector<8x60xbf16> to vector<8x58xbf16>
    %19 = tpu.concatenate %16, %17, %18 in 0 : vector<8x58xbf16>, vector<8x58xbf16>, vector<8x58xbf16> -> vector<24x58xbf16>
    %c0_7 = arith.constant 0 : index
    %c0_8 = arith.constant 0 : index
    %20 = vector.load %arg5[%c0_7, %c0_8] : memref<16x24xbf16, #tpu.memory_space<vmem>>, vector<16x24xbf16>
    %cst_9 = arith.constant dense<0.000000e+00> : vector<16x58xf32>
    %21 = tpu.matmul %20, %19, %cst_9 {dimension_numbers = #tpu.dot_dimension_numbers<[1], [0], [0], [1], [0, 0, 1, 1], [], []>} : vector<16x24xbf16>, vector<24x58xbf16>, vector<16x58xf32> -> vector<16x58xf32>
    %c0_10 = arith.constant 0 : index
    %c0_11 = arith.constant 0 : index
    %22 = vector.load %arg6[%c0_10, %c0_11] : memref<16x1xf32, #tpu.memory_space<vmem>>, vector<16x1xf32>
    %23 = vector.broadcast %22 : vector<16x1xf32> to vector<16x58xf32>
    %24 = arith.addf %21, %23 : vector<16x58xf32>
    %cst_12 = arith.constant 0.000000e+00 : f32
    %25 = vector.broadcast %cst_12 : f32 to vector<16x58xf32>
    %26 = arith.maximumf %24, %25 : vector<16x58xf32>
    %27 = arith.truncf %26 : vector<16x58xf32> to vector<16x58xbf16>
    %c1 = arith.constant 1 : index
    %c0_13 = arith.constant 0 : index
    %c0_14 = arith.constant 0 : index
    %28 = vector.load %arg1[%c1, %c0_13, %c0_14] : memref<8x12x64xbf16, #tpu.memory_space<vmem>>, vector<1x12x64xbf16>
    %29 = vector.shape_cast %28 : vector<1x12x64xbf16> to vector<12x64xbf16>
    %30 = vector.extract_strided_slice %29 {offsets = [0, 0], sizes = [12, 60], strides = [1, 1]} : vector<12x64xbf16> to vector<12x60xbf16>
    %31 = vector.extract_strided_slice %29 {offsets = [0, 1], sizes = [12, 60], strides = [1, 1]} : vector<12x64xbf16> to vector<12x60xbf16>
    %32 = vector.extract_strided_slice %29 {offsets = [0, 2], sizes = [12, 60], strides = [1, 1]} : vector<12x64xbf16> to vector<12x60xbf16>
    %33 = vector.extract_strided_slice %29 {offsets = [0, 3], sizes = [12, 60], strides = [1, 1]} : vector<12x64xbf16> to vector<12x60xbf16>
    %34 = vector.extract_strided_slice %29 {offsets = [0, 4], sizes = [12, 60], strides = [1, 1]} : vector<12x64xbf16> to vector<12x60xbf16>
    %35 = tpu.concatenate %30, %31, %32, %33, %34 in 0 : vector<12x60xbf16>, vector<12x60xbf16>, vector<12x60xbf16>, vector<12x60xbf16>, vector<12x60xbf16> -> vector<60x60xbf16>
    %c0_15 = arith.constant 0 : index
    %c0_16 = arith.constant 0 : index
    %36 = vector.load %arg3[%c0_15, %c0_16] : memref<8x60xbf16, #tpu.memory_space<vmem>>, vector<8x60xbf16>
    %cst_17 = arith.constant dense<0.000000e+00> : vector<8x60xf32>
    %37 = tpu.matmul %36, %35, %cst_17 {dimension_numbers = #tpu.dot_dimension_numbers<[1], [0], [0], [1], [0, 0, 1, 1], [], []>} : vector<8x60xbf16>, vector<60x60xbf16>, vector<8x60xf32> -> vector<8x60xf32>
    %c0_18 = arith.constant 0 : index
    %c0_19 = arith.constant 0 : index
    %38 = vector.load %arg4[%c0_18, %c0_19] : memref<8x1xf32, #tpu.memory_space<vmem>>, vector<8x1xf32>
    %39 = vector.broadcast %38 : vector<8x1xf32> to vector<8x60xf32>
    %40 = arith.addf %37, %39 : vector<8x60xf32>
    %cst_20 = arith.constant 0.000000e+00 : f32
    %41 = vector.broadcast %cst_20 : f32 to vector<8x60xf32>
    %42 = arith.maximumf %40, %41 : vector<8x60xf32>
    %43 = arith.truncf %42 : vector<8x60xf32> to vector<8x60xbf16>
    %44 = vector.extract_strided_slice %43 {offsets = [0, 0], sizes = [8, 58], strides = [1, 1]} : vector<8x60xbf16> to vector<8x58xbf16>
    %45 = vector.extract_strided_slice %43 {offsets = [0, 1], sizes = [8, 58], strides = [1, 1]} : vector<8x60xbf16> to vector<8x58xbf16>
    %46 = vector.extract_strided_slice %43 {offsets = [0, 2], sizes = [8, 58], strides = [1, 1]} : vector<8x60xbf16> to vector<8x58xbf16>
    %47 = tpu.concatenate %44, %45, %46 in 0 : vector<8x58xbf16>, vector<8x58xbf16>, vector<8x58xbf16> -> vector<24x58xbf16>
    %c0_21 = arith.constant 0 : index
    %c0_22 = arith.constant 0 : index
    %48 = vector.load %arg5[%c0_21, %c0_22] : memref<16x24xbf16, #tpu.memory_space<vmem>>, vector<16x24xbf16>
    %cst_23 = arith.constant dense<0.000000e+00> : vector<16x58xf32>
    %49 = tpu.matmul %48, %47, %cst_23 {dimension_numbers = #tpu.dot_dimension_numbers<[1], [0], [0], [1], [0, 0, 1, 1], [], []>} : vector<16x24xbf16>, vector<24x58xbf16>, vector<16x58xf32> -> vector<16x58xf32>
    %c0_24 = arith.constant 0 : index
    %c0_25 = arith.constant 0 : index
    %50 = vector.load %arg6[%c0_24, %c0_25] : memref<16x1xf32, #tpu.memory_space<vmem>>, vector<16x1xf32>
    %51 = vector.broadcast %50 : vector<16x1xf32> to vector<16x58xf32>
    %52 = arith.addf %49, %51 : vector<16x58xf32>
    %cst_26 = arith.constant 0.000000e+00 : f32
    %53 = vector.broadcast %cst_26 : f32 to vector<16x58xf32>
    %54 = arith.maximumf %52, %53 : vector<16x58xf32>
    %55 = arith.truncf %54 : vector<16x58xf32> to vector<16x58xbf16>
    %c2 = arith.constant 2 : index
    %c0_27 = arith.constant 0 : index
    %c0_28 = arith.constant 0 : index
    %56 = vector.load %arg1[%c2, %c0_27, %c0_28] : memref<8x12x64xbf16, #tpu.memory_space<vmem>>, vector<1x12x64xbf16>
    %57 = vector.shape_cast %56 : vector<1x12x64xbf16> to vector<12x64xbf16>
    %58 = vector.extract_strided_slice %57 {offsets = [0, 0], sizes = [12, 60], strides = [1, 1]} : vector<12x64xbf16> to vector<12x60xbf16>
    %59 = vector.extract_strided_slice %57 {offsets = [0, 1], sizes = [12, 60], strides = [1, 1]} : vector<12x64xbf16> to vector<12x60xbf16>
    %60 = vector.extract_strided_slice %57 {offsets = [0, 2], sizes = [12, 60], strides = [1, 1]} : vector<12x64xbf16> to vector<12x60xbf16>
    %61 = vector.extract_strided_slice %57 {offsets = [0, 3], sizes = [12, 60], strides = [1, 1]} : vector<12x64xbf16> to vector<12x60xbf16>
    %62 = vector.extract_strided_slice %57 {offsets = [0, 4], sizes = [12, 60], strides = [1, 1]} : vector<12x64xbf16> to vector<12x60xbf16>
    %63 = tpu.concatenate %58, %59, %60, %61, %62 in 0 : vector<12x60xbf16>, vector<12x60xbf16>, vector<12x60xbf16>, vector<12x60xbf16>, vector<12x60xbf16> -> vector<60x60xbf16>
    %c0_29 = arith.constant 0 : index
    %c0_30 = arith.constant 0 : index
    %64 = vector.load %arg3[%c0_29, %c0_30] : memref<8x60xbf16, #tpu.memory_space<vmem>>, vector<8x60xbf16>
    %cst_31 = arith.constant dense<0.000000e+00> : vector<8x60xf32>
    %65 = tpu.matmul %64, %63, %cst_31 {dimension_numbers = #tpu.dot_dimension_numbers<[1], [0], [0], [1], [0, 0, 1, 1], [], []>} : vector<8x60xbf16>, vector<60x60xbf16>, vector<8x60xf32> -> vector<8x60xf32>
    %c0_32 = arith.constant 0 : index
    %c0_33 = arith.constant 0 : index
    %66 = vector.load %arg4[%c0_32, %c0_33] : memref<8x1xf32, #tpu.memory_space<vmem>>, vector<8x1xf32>
    %67 = vector.broadcast %66 : vector<8x1xf32> to vector<8x60xf32>
    %68 = arith.addf %65, %67 : vector<8x60xf32>
    %cst_34 = arith.constant 0.000000e+00 : f32
    %69 = vector.broadcast %cst_34 : f32 to vector<8x60xf32>
    %70 = arith.maximumf %68, %69 : vector<8x60xf32>
    %71 = arith.truncf %70 : vector<8x60xf32> to vector<8x60xbf16>
    %72 = vector.extract_strided_slice %71 {offsets = [0, 0], sizes = [8, 58], strides = [1, 1]} : vector<8x60xbf16> to vector<8x58xbf16>
    %73 = vector.extract_strided_slice %71 {offsets = [0, 1], sizes = [8, 58], strides = [1, 1]} : vector<8x60xbf16> to vector<8x58xbf16>
    %74 = vector.extract_strided_slice %71 {offsets = [0, 2], sizes = [8, 58], strides = [1, 1]} : vector<8x60xbf16> to vector<8x58xbf16>
    %75 = tpu.concatenate %72, %73, %74 in 0 : vector<8x58xbf16>, vector<8x58xbf16>, vector<8x58xbf16> -> vector<24x58xbf16>
    %c0_35 = arith.constant 0 : index
    %c0_36 = arith.constant 0 : index
    %76 = vector.load %arg5[%c0_35, %c0_36] : memref<16x24xbf16, #tpu.memory_space<vmem>>, vector<16x24xbf16>
    %cst_37 = arith.constant dense<0.000000e+00> : vector<16x58xf32>
    %77 = tpu.matmul %76, %75, %cst_37 {dimension_numbers = #tpu.dot_dimension_numbers<[1], [0], [0], [1], [0, 0, 1, 1], [], []>} : vector<16x24xbf16>, vector<24x58xbf16>, vector<16x58xf32> -> vector<16x58xf32>
    %c0_38 = arith.constant 0 : index
    %c0_39 = arith.constant 0 : index
    %78 = vector.load %arg6[%c0_38, %c0_39] : memref<16x1xf32, #tpu.memory_space<vmem>>, vector<16x1xf32>
    %79 = vector.broadcast %78 : vector<16x1xf32> to vector<16x58xf32>
    %80 = arith.addf %77, %79 : vector<16x58xf32>
    %cst_40 = arith.constant 0.000000e+00 : f32
    %81 = vector.broadcast %cst_40 : f32 to vector<16x58xf32>
    %82 = arith.maximumf %80, %81 : vector<16x58xf32>
    %83 = arith.truncf %82 : vector<16x58xf32> to vector<16x58xbf16>
    %c3 = arith.constant 3 : index
    %c0_41 = arith.constant 0 : index
    %c0_42 = arith.constant 0 : index
    %84 = vector.load %arg1[%c3, %c0_41, %c0_42] : memref<8x12x64xbf16, #tpu.memory_space<vmem>>, vector<1x12x64xbf16>
    %85 = vector.shape_cast %84 : vector<1x12x64xbf16> to vector<12x64xbf16>
    %86 = vector.extract_strided_slice %85 {offsets = [0, 0], sizes = [12, 60], strides = [1, 1]} : vector<12x64xbf16> to vector<12x60xbf16>
    %87 = vector.extract_strided_slice %85 {offsets = [0, 1], sizes = [12, 60], strides = [1, 1]} : vector<12x64xbf16> to vector<12x60xbf16>
    %88 = vector.extract_strided_slice %85 {offsets = [0, 2], sizes = [12, 60], strides = [1, 1]} : vector<12x64xbf16> to vector<12x60xbf16>
    %89 = vector.extract_strided_slice %85 {offsets = [0, 3], sizes = [12, 60], strides = [1, 1]} : vector<12x64xbf16> to vector<12x60xbf16>
    %90 = vector.extract_strided_slice %85 {offsets = [0, 4], sizes = [12, 60], strides = [1, 1]} : vector<12x64xbf16> to vector<12x60xbf16>
    %91 = tpu.concatenate %86, %87, %88, %89, %90 in 0 : vector<12x60xbf16>, vector<12x60xbf16>, vector<12x60xbf16>, vector<12x60xbf16>, vector<12x60xbf16> -> vector<60x60xbf16>
    %c0_43 = arith.constant 0 : index
    %c0_44 = arith.constant 0 : index
    %92 = vector.load %arg3[%c0_43, %c0_44] : memref<8x60xbf16, #tpu.memory_space<vmem>>, vector<8x60xbf16>
    %cst_45 = arith.constant dense<0.000000e+00> : vector<8x60xf32>
    %93 = tpu.matmul %92, %91, %cst_45 {dimension_numbers = #tpu.dot_dimension_numbers<[1], [0], [0], [1], [0, 0, 1, 1], [], []>} : vector<8x60xbf16>, vector<60x60xbf16>, vector<8x60xf32> -> vector<8x60xf32>
    %c0_46 = arith.constant 0 : index
    %c0_47 = arith.constant 0 : index
    %94 = vector.load %arg4[%c0_46, %c0_47] : memref<8x1xf32, #tpu.memory_space<vmem>>, vector<8x1xf32>
    %95 = vector.broadcast %94 : vector<8x1xf32> to vector<8x60xf32>
    %96 = arith.addf %93, %95 : vector<8x60xf32>
    %cst_48 = arith.constant 0.000000e+00 : f32
    %97 = vector.broadcast %cst_48 : f32 to vector<8x60xf32>
    %98 = arith.maximumf %96, %97 : vector<8x60xf32>
    %99 = arith.truncf %98 : vector<8x60xf32> to vector<8x60xbf16>
    %100 = vector.extract_strided_slice %99 {offsets = [0, 0], sizes = [8, 58], strides = [1, 1]} : vector<8x60xbf16> to vector<8x58xbf16>
    %101 = vector.extract_strided_slice %99 {offsets = [0, 1], sizes = [8, 58], strides = [1, 1]} : vector<8x60xbf16> to vector<8x58xbf16>
    %102 = vector.extract_strided_slice %99 {offsets = [0, 2], sizes = [8, 58], strides = [1, 1]} : vector<8x60xbf16> to vector<8x58xbf16>
    %103 = tpu.concatenate %100, %101, %102 in 0 : vector<8x58xbf16>, vector<8x58xbf16>, vector<8x58xbf16> -> vector<24x58xbf16>
    %c0_49 = arith.constant 0 : index
    %c0_50 = arith.constant 0 : index
    %104 = vector.load %arg5[%c0_49, %c0_50] : memref<16x24xbf16, #tpu.memory_space<vmem>>, vector<16x24xbf16>
    %cst_51 = arith.constant dense<0.000000e+00> : vector<16x58xf32>
    %105 = tpu.matmul %104, %103, %cst_51 {dimension_numbers = #tpu.dot_dimension_numbers<[1], [0], [0], [1], [0, 0, 1, 1], [], []>} : vector<16x24xbf16>, vector<24x58xbf16>, vector<16x58xf32> -> vector<16x58xf32>
    %c0_52 = arith.constant 0 : index
    %c0_53 = arith.constant 0 : index
    %106 = vector.load %arg6[%c0_52, %c0_53] : memref<16x1xf32, #tpu.memory_space<vmem>>, vector<16x1xf32>
    %107 = vector.broadcast %106 : vector<16x1xf32> to vector<16x58xf32>
    %108 = arith.addf %105, %107 : vector<16x58xf32>
    %cst_54 = arith.constant 0.000000e+00 : f32
    %109 = vector.broadcast %cst_54 : f32 to vector<16x58xf32>
    %110 = arith.maximumf %108, %109 : vector<16x58xf32>
    %111 = arith.truncf %110 : vector<16x58xf32> to vector<16x58xbf16>
    %c4 = arith.constant 4 : index
    %c0_55 = arith.constant 0 : index
    %c0_56 = arith.constant 0 : index
    %112 = vector.load %arg1[%c4, %c0_55, %c0_56] : memref<8x12x64xbf16, #tpu.memory_space<vmem>>, vector<1x12x64xbf16>
    %113 = vector.shape_cast %112 : vector<1x12x64xbf16> to vector<12x64xbf16>
    %114 = vector.extract_strided_slice %113 {offsets = [0, 0], sizes = [12, 60], strides = [1, 1]} : vector<12x64xbf16> to vector<12x60xbf16>
    %115 = vector.extract_strided_slice %113 {offsets = [0, 1], sizes = [12, 60], strides = [1, 1]} : vector<12x64xbf16> to vector<12x60xbf16>
    %116 = vector.extract_strided_slice %113 {offsets = [0, 2], sizes = [12, 60], strides = [1, 1]} : vector<12x64xbf16> to vector<12x60xbf16>
    %117 = vector.extract_strided_slice %113 {offsets = [0, 3], sizes = [12, 60], strides = [1, 1]} : vector<12x64xbf16> to vector<12x60xbf16>
    %118 = vector.extract_strided_slice %113 {offsets = [0, 4], sizes = [12, 60], strides = [1, 1]} : vector<12x64xbf16> to vector<12x60xbf16>
    %119 = tpu.concatenate %114, %115, %116, %117, %118 in 0 : vector<12x60xbf16>, vector<12x60xbf16>, vector<12x60xbf16>, vector<12x60xbf16>, vector<12x60xbf16> -> vector<60x60xbf16>
    %c0_57 = arith.constant 0 : index
    %c0_58 = arith.constant 0 : index
    %120 = vector.load %arg3[%c0_57, %c0_58] : memref<8x60xbf16, #tpu.memory_space<vmem>>, vector<8x60xbf16>
    %cst_59 = arith.constant dense<0.000000e+00> : vector<8x60xf32>
    %121 = tpu.matmul %120, %119, %cst_59 {dimension_numbers = #tpu.dot_dimension_numbers<[1], [0], [0], [1], [0, 0, 1, 1], [], []>} : vector<8x60xbf16>, vector<60x60xbf16>, vector<8x60xf32> -> vector<8x60xf32>
    %c0_60 = arith.constant 0 : index
    %c0_61 = arith.constant 0 : index
    %122 = vector.load %arg4[%c0_60, %c0_61] : memref<8x1xf32, #tpu.memory_space<vmem>>, vector<8x1xf32>
    %123 = vector.broadcast %122 : vector<8x1xf32> to vector<8x60xf32>
    %124 = arith.addf %121, %123 : vector<8x60xf32>
    %cst_62 = arith.constant 0.000000e+00 : f32
    %125 = vector.broadcast %cst_62 : f32 to vector<8x60xf32>
    %126 = arith.maximumf %124, %125 : vector<8x60xf32>
    %127 = arith.truncf %126 : vector<8x60xf32> to vector<8x60xbf16>
    %128 = vector.extract_strided_slice %127 {offsets = [0, 0], sizes = [8, 58], strides = [1, 1]} : vector<8x60xbf16> to vector<8x58xbf16>
    %129 = vector.extract_strided_slice %127 {offsets = [0, 1], sizes = [8, 58], strides = [1, 1]} : vector<8x60xbf16> to vector<8x58xbf16>
    %130 = vector.extract_strided_slice %127 {offsets = [0, 2], sizes = [8, 58], strides = [1, 1]} : vector<8x60xbf16> to vector<8x58xbf16>
    %131 = tpu.concatenate %128, %129, %130 in 0 : vector<8x58xbf16>, vector<8x58xbf16>, vector<8x58xbf16> -> vector<24x58xbf16>
    %c0_63 = arith.constant 0 : index
    %c0_64 = arith.constant 0 : index
    %132 = vector.load %arg5[%c0_63, %c0_64] : memref<16x24xbf16, #tpu.memory_space<vmem>>, vector<16x24xbf16>
    %cst_65 = arith.constant dense<0.000000e+00> : vector<16x58xf32>
    %133 = tpu.matmul %132, %131, %cst_65 {dimension_numbers = #tpu.dot_dimension_numbers<[1], [0], [0], [1], [0, 0, 1, 1], [], []>} : vector<16x24xbf16>, vector<24x58xbf16>, vector<16x58xf32> -> vector<16x58xf32>
    %c0_66 = arith.constant 0 : index
    %c0_67 = arith.constant 0 : index
    %134 = vector.load %arg6[%c0_66, %c0_67] : memref<16x1xf32, #tpu.memory_space<vmem>>, vector<16x1xf32>
    %135 = vector.broadcast %134 : vector<16x1xf32> to vector<16x58xf32>
    %136 = arith.addf %133, %135 : vector<16x58xf32>
    %cst_68 = arith.constant 0.000000e+00 : f32
    %137 = vector.broadcast %cst_68 : f32 to vector<16x58xf32>
    %138 = arith.maximumf %136, %137 : vector<16x58xf32>
    %139 = arith.truncf %138 : vector<16x58xf32> to vector<16x58xbf16>
    %c5 = arith.constant 5 : index
    %c0_69 = arith.constant 0 : index
    %c0_70 = arith.constant 0 : index
    %140 = vector.load %arg1[%c5, %c0_69, %c0_70] : memref<8x12x64xbf16, #tpu.memory_space<vmem>>, vector<1x12x64xbf16>
    %141 = vector.shape_cast %140 : vector<1x12x64xbf16> to vector<12x64xbf16>
    %142 = vector.extract_strided_slice %141 {offsets = [0, 0], sizes = [12, 60], strides = [1, 1]} : vector<12x64xbf16> to vector<12x60xbf16>
    %143 = vector.extract_strided_slice %141 {offsets = [0, 1], sizes = [12, 60], strides = [1, 1]} : vector<12x64xbf16> to vector<12x60xbf16>
    %144 = vector.extract_strided_slice %141 {offsets = [0, 2], sizes = [12, 60], strides = [1, 1]} : vector<12x64xbf16> to vector<12x60xbf16>
    %145 = vector.extract_strided_slice %141 {offsets = [0, 3], sizes = [12, 60], strides = [1, 1]} : vector<12x64xbf16> to vector<12x60xbf16>
    %146 = vector.extract_strided_slice %141 {offsets = [0, 4], sizes = [12, 60], strides = [1, 1]} : vector<12x64xbf16> to vector<12x60xbf16>
    %147 = tpu.concatenate %142, %143, %144, %145, %146 in 0 : vector<12x60xbf16>, vector<12x60xbf16>, vector<12x60xbf16>, vector<12x60xbf16>, vector<12x60xbf16> -> vector<60x60xbf16>
    %c0_71 = arith.constant 0 : index
    %c0_72 = arith.constant 0 : index
    %148 = vector.load %arg3[%c0_71, %c0_72] : memref<8x60xbf16, #tpu.memory_space<vmem>>, vector<8x60xbf16>
    %cst_73 = arith.constant dense<0.000000e+00> : vector<8x60xf32>
    %149 = tpu.matmul %148, %147, %cst_73 {dimension_numbers = #tpu.dot_dimension_numbers<[1], [0], [0], [1], [0, 0, 1, 1], [], []>} : vector<8x60xbf16>, vector<60x60xbf16>, vector<8x60xf32> -> vector<8x60xf32>
    %c0_74 = arith.constant 0 : index
    %c0_75 = arith.constant 0 : index
    %150 = vector.load %arg4[%c0_74, %c0_75] : memref<8x1xf32, #tpu.memory_space<vmem>>, vector<8x1xf32>
    %151 = vector.broadcast %150 : vector<8x1xf32> to vector<8x60xf32>
    %152 = arith.addf %149, %151 : vector<8x60xf32>
    %cst_76 = arith.constant 0.000000e+00 : f32
    %153 = vector.broadcast %cst_76 : f32 to vector<8x60xf32>
    %154 = arith.maximumf %152, %153 : vector<8x60xf32>
    %155 = arith.truncf %154 : vector<8x60xf32> to vector<8x60xbf16>
    %156 = vector.extract_strided_slice %155 {offsets = [0, 0], sizes = [8, 58], strides = [1, 1]} : vector<8x60xbf16> to vector<8x58xbf16>
    %157 = vector.extract_strided_slice %155 {offsets = [0, 1], sizes = [8, 58], strides = [1, 1]} : vector<8x60xbf16> to vector<8x58xbf16>
    %158 = vector.extract_strided_slice %155 {offsets = [0, 2], sizes = [8, 58], strides = [1, 1]} : vector<8x60xbf16> to vector<8x58xbf16>
    %159 = tpu.concatenate %156, %157, %158 in 0 : vector<8x58xbf16>, vector<8x58xbf16>, vector<8x58xbf16> -> vector<24x58xbf16>
    %c0_77 = arith.constant 0 : index
    %c0_78 = arith.constant 0 : index
    %160 = vector.load %arg5[%c0_77, %c0_78] : memref<16x24xbf16, #tpu.memory_space<vmem>>, vector<16x24xbf16>
    %cst_79 = arith.constant dense<0.000000e+00> : vector<16x58xf32>
    %161 = tpu.matmul %160, %159, %cst_79 {dimension_numbers = #tpu.dot_dimension_numbers<[1], [0], [0], [1], [0, 0, 1, 1], [], []>} : vector<16x24xbf16>, vector<24x58xbf16>, vector<16x58xf32> -> vector<16x58xf32>
    %c0_80 = arith.constant 0 : index
    %c0_81 = arith.constant 0 : index
    %162 = vector.load %arg6[%c0_80, %c0_81] : memref<16x1xf32, #tpu.memory_space<vmem>>, vector<16x1xf32>
    %163 = vector.broadcast %162 : vector<16x1xf32> to vector<16x58xf32>
    %164 = arith.addf %161, %163 : vector<16x58xf32>
    %cst_82 = arith.constant 0.000000e+00 : f32
    %165 = vector.broadcast %cst_82 : f32 to vector<16x58xf32>
    %166 = arith.maximumf %164, %165 : vector<16x58xf32>
    %167 = arith.truncf %166 : vector<16x58xf32> to vector<16x58xbf16>
    %c6 = arith.constant 6 : index
    %c0_83 = arith.constant 0 : index
    %c0_84 = arith.constant 0 : index
    %168 = vector.load %arg1[%c6, %c0_83, %c0_84] : memref<8x12x64xbf16, #tpu.memory_space<vmem>>, vector<1x12x64xbf16>
    %169 = vector.shape_cast %168 : vector<1x12x64xbf16> to vector<12x64xbf16>
    %170 = vector.extract_strided_slice %169 {offsets = [0, 0], sizes = [12, 60], strides = [1, 1]} : vector<12x64xbf16> to vector<12x60xbf16>
    %171 = vector.extract_strided_slice %169 {offsets = [0, 1], sizes = [12, 60], strides = [1, 1]} : vector<12x64xbf16> to vector<12x60xbf16>
    %172 = vector.extract_strided_slice %169 {offsets = [0, 2], sizes = [12, 60], strides = [1, 1]} : vector<12x64xbf16> to vector<12x60xbf16>
    %173 = vector.extract_strided_slice %169 {offsets = [0, 3], sizes = [12, 60], strides = [1, 1]} : vector<12x64xbf16> to vector<12x60xbf16>
    %174 = vector.extract_strided_slice %169 {offsets = [0, 4], sizes = [12, 60], strides = [1, 1]} : vector<12x64xbf16> to vector<12x60xbf16>
    %175 = tpu.concatenate %170, %171, %172, %173, %174 in 0 : vector<12x60xbf16>, vector<12x60xbf16>, vector<12x60xbf16>, vector<12x60xbf16>, vector<12x60xbf16> -> vector<60x60xbf16>
    %c0_85 = arith.constant 0 : index
    %c0_86 = arith.constant 0 : index
    %176 = vector.load %arg3[%c0_85, %c0_86] : memref<8x60xbf16, #tpu.memory_space<vmem>>, vector<8x60xbf16>
    %cst_87 = arith.constant dense<0.000000e+00> : vector<8x60xf32>
    %177 = tpu.matmul %176, %175, %cst_87 {dimension_numbers = #tpu.dot_dimension_numbers<[1], [0], [0], [1], [0, 0, 1, 1], [], []>} : vector<8x60xbf16>, vector<60x60xbf16>, vector<8x60xf32> -> vector<8x60xf32>
    %c0_88 = arith.constant 0 : index
    %c0_89 = arith.constant 0 : index
    %178 = vector.load %arg4[%c0_88, %c0_89] : memref<8x1xf32, #tpu.memory_space<vmem>>, vector<8x1xf32>
    %179 = vector.broadcast %178 : vector<8x1xf32> to vector<8x60xf32>
    %180 = arith.addf %177, %179 : vector<8x60xf32>
    %cst_90 = arith.constant 0.000000e+00 : f32
    %181 = vector.broadcast %cst_90 : f32 to vector<8x60xf32>
    %182 = arith.maximumf %180, %181 : vector<8x60xf32>
    %183 = arith.truncf %182 : vector<8x60xf32> to vector<8x60xbf16>
    %184 = vector.extract_strided_slice %183 {offsets = [0, 0], sizes = [8, 58], strides = [1, 1]} : vector<8x60xbf16> to vector<8x58xbf16>
    %185 = vector.extract_strided_slice %183 {offsets = [0, 1], sizes = [8, 58], strides = [1, 1]} : vector<8x60xbf16> to vector<8x58xbf16>
    %186 = vector.extract_strided_slice %183 {offsets = [0, 2], sizes = [8, 58], strides = [1, 1]} : vector<8x60xbf16> to vector<8x58xbf16>
    %187 = tpu.concatenate %184, %185, %186 in 0 : vector<8x58xbf16>, vector<8x58xbf16>, vector<8x58xbf16> -> vector<24x58xbf16>
    %c0_91 = arith.constant 0 : index
    %c0_92 = arith.constant 0 : index
    %188 = vector.load %arg5[%c0_91, %c0_92] : memref<16x24xbf16, #tpu.memory_space<vmem>>, vector<16x24xbf16>
    %cst_93 = arith.constant dense<0.000000e+00> : vector<16x58xf32>
    %189 = tpu.matmul %188, %187, %cst_93 {dimension_numbers = #tpu.dot_dimension_numbers<[1], [0], [0], [1], [0, 0, 1, 1], [], []>} : vector<16x24xbf16>, vector<24x58xbf16>, vector<16x58xf32> -> vector<16x58xf32>
    %c0_94 = arith.constant 0 : index
    %c0_95 = arith.constant 0 : index
    %190 = vector.load %arg6[%c0_94, %c0_95] : memref<16x1xf32, #tpu.memory_space<vmem>>, vector<16x1xf32>
    %191 = vector.broadcast %190 : vector<16x1xf32> to vector<16x58xf32>
    %192 = arith.addf %189, %191 : vector<16x58xf32>
    %cst_96 = arith.constant 0.000000e+00 : f32
    %193 = vector.broadcast %cst_96 : f32 to vector<16x58xf32>
    %194 = arith.maximumf %192, %193 : vector<16x58xf32>
    %195 = arith.truncf %194 : vector<16x58xf32> to vector<16x58xbf16>
    %c7 = arith.constant 7 : index
    %c0_97 = arith.constant 0 : index
    %c0_98 = arith.constant 0 : index
    %196 = vector.load %arg1[%c7, %c0_97, %c0_98] : memref<8x12x64xbf16, #tpu.memory_space<vmem>>, vector<1x12x64xbf16>
    %197 = vector.shape_cast %196 : vector<1x12x64xbf16> to vector<12x64xbf16>
    %198 = vector.extract_strided_slice %197 {offsets = [0, 0], sizes = [12, 60], strides = [1, 1]} : vector<12x64xbf16> to vector<12x60xbf16>
    %199 = vector.extract_strided_slice %197 {offsets = [0, 1], sizes = [12, 60], strides = [1, 1]} : vector<12x64xbf16> to vector<12x60xbf16>
    %200 = vector.extract_strided_slice %197 {offsets = [0, 2], sizes = [12, 60], strides = [1, 1]} : vector<12x64xbf16> to vector<12x60xbf16>
    %201 = vector.extract_strided_slice %197 {offsets = [0, 3], sizes = [12, 60], strides = [1, 1]} : vector<12x64xbf16> to vector<12x60xbf16>
    %202 = vector.extract_strided_slice %197 {offsets = [0, 4], sizes = [12, 60], strides = [1, 1]} : vector<12x64xbf16> to vector<12x60xbf16>
    %203 = tpu.concatenate %198, %199, %200, %201, %202 in 0 : vector<12x60xbf16>, vector<12x60xbf16>, vector<12x60xbf16>, vector<12x60xbf16>, vector<12x60xbf16> -> vector<60x60xbf16>
    %c0_99 = arith.constant 0 : index
    %c0_100 = arith.constant 0 : index
    %204 = vector.load %arg3[%c0_99, %c0_100] : memref<8x60xbf16, #tpu.memory_space<vmem>>, vector<8x60xbf16>
    %cst_101 = arith.constant dense<0.000000e+00> : vector<8x60xf32>
    %205 = tpu.matmul %204, %203, %cst_101 {dimension_numbers = #tpu.dot_dimension_numbers<[1], [0], [0], [1], [0, 0, 1, 1], [], []>} : vector<8x60xbf16>, vector<60x60xbf16>, vector<8x60xf32> -> vector<8x60xf32>
    %c0_102 = arith.constant 0 : index
    %c0_103 = arith.constant 0 : index
    %206 = vector.load %arg4[%c0_102, %c0_103] : memref<8x1xf32, #tpu.memory_space<vmem>>, vector<8x1xf32>
    %207 = vector.broadcast %206 : vector<8x1xf32> to vector<8x60xf32>
    %208 = arith.addf %205, %207 : vector<8x60xf32>
    %cst_104 = arith.constant 0.000000e+00 : f32
    %209 = vector.broadcast %cst_104 : f32 to vector<8x60xf32>
    %210 = arith.maximumf %208, %209 : vector<8x60xf32>
    %211 = arith.truncf %210 : vector<8x60xf32> to vector<8x60xbf16>
    %212 = vector.extract_strided_slice %211 {offsets = [0, 0], sizes = [8, 58], strides = [1, 1]} : vector<8x60xbf16> to vector<8x58xbf16>
    %213 = vector.extract_strided_slice %211 {offsets = [0, 1], sizes = [8, 58], strides = [1, 1]} : vector<8x60xbf16> to vector<8x58xbf16>
    %214 = vector.extract_strided_slice %211 {offsets = [0, 2], sizes = [8, 58], strides = [1, 1]} : vector<8x60xbf16> to vector<8x58xbf16>
    %215 = tpu.concatenate %212, %213, %214 in 0 : vector<8x58xbf16>, vector<8x58xbf16>, vector<8x58xbf16> -> vector<24x58xbf16>
    %c0_105 = arith.constant 0 : index
    %c0_106 = arith.constant 0 : index
    %216 = vector.load %arg5[%c0_105, %c0_106] : memref<16x24xbf16, #tpu.memory_space<vmem>>, vector<16x24xbf16>
    %cst_107 = arith.constant dense<0.000000e+00> : vector<16x58xf32>
    %217 = tpu.matmul %216, %215, %cst_107 {dimension_numbers = #tpu.dot_dimension_numbers<[1], [0], [0], [1], [0, 0, 1, 1], [], []>} : vector<16x24xbf16>, vector<24x58xbf16>, vector<16x58xf32> -> vector<16x58xf32>
    %c0_108 = arith.constant 0 : index
    %c0_109 = arith.constant 0 : index
    %218 = vector.load %arg6[%c0_108, %c0_109] : memref<16x1xf32, #tpu.memory_space<vmem>>, vector<16x1xf32>
    %219 = vector.broadcast %218 : vector<16x1xf32> to vector<16x58xf32>
    %220 = arith.addf %217, %219 : vector<16x58xf32>
    %cst_110 = arith.constant 0.000000e+00 : f32
    %221 = vector.broadcast %cst_110 : f32 to vector<16x58xf32>
    %222 = arith.maximumf %220, %221 : vector<16x58xf32>
    %223 = arith.truncf %222 : vector<16x58xf32> to vector<16x58xbf16>
    %c0_111 = arith.constant 0 : index
    %c0_112 = arith.constant 0 : index
    %c0_113 = arith.constant 0 : index
    %224 = vector.load %arg2[%c0_111, %c0_112, %c0_113] : memref<8x1x128xbf16, #tpu.memory_space<vmem>>, vector<1x1x128xbf16>
    %225 = vector.shape_cast %224 : vector<1x1x128xbf16> to vector<1x128xbf16>
    %226 = vector.extract_strided_slice %225 {offsets = [0, 0], sizes = [1, 122], strides = [1, 1]} : vector<1x128xbf16> to vector<1x122xbf16>
    %227 = vector.extract_strided_slice %225 {offsets = [0, 1], sizes = [1, 122], strides = [1, 1]} : vector<1x128xbf16> to vector<1x122xbf16>
    %228 = vector.extract_strided_slice %225 {offsets = [0, 2], sizes = [1, 122], strides = [1, 1]} : vector<1x128xbf16> to vector<1x122xbf16>
    %229 = vector.extract_strided_slice %225 {offsets = [0, 3], sizes = [1, 122], strides = [1, 1]} : vector<1x128xbf16> to vector<1x122xbf16>
    %230 = vector.extract_strided_slice %225 {offsets = [0, 4], sizes = [1, 122], strides = [1, 1]} : vector<1x128xbf16> to vector<1x122xbf16>
    %231 = vector.extract_strided_slice %225 {offsets = [0, 5], sizes = [1, 122], strides = [1, 1]} : vector<1x128xbf16> to vector<1x122xbf16>
    %232 = vector.extract_strided_slice %225 {offsets = [0, 6], sizes = [1, 122], strides = [1, 1]} : vector<1x128xbf16> to vector<1x122xbf16>
    %233 = tpu.concatenate %226, %227, %228, %229, %230, %231, %232 in 0 : vector<1x122xbf16>, vector<1x122xbf16>, vector<1x122xbf16>, vector<1x122xbf16>, vector<1x122xbf16>, vector<1x122xbf16>, vector<1x122xbf16> -> vector<7x122xbf16>
    %c0_114 = arith.constant 0 : index
    %c0_115 = arith.constant 0 : index
    %234 = vector.load %arg7[%c0_114, %c0_115] : memref<4x7xbf16, #tpu.memory_space<vmem>>, vector<4x7xbf16>
    %cst_116 = arith.constant dense<0.000000e+00> : vector<4x122xf32>
    %235 = tpu.matmul %234, %233, %cst_116 {dimension_numbers = #tpu.dot_dimension_numbers<[1], [0], [0], [1], [0, 0, 1, 1], [], []>} : vector<4x7xbf16>, vector<7x122xbf16>, vector<4x122xf32> -> vector<4x122xf32>
    %c0_117 = arith.constant 0 : index
    %c0_118 = arith.constant 0 : index
    %236 = vector.load %arg8[%c0_117, %c0_118] : memref<4x1xf32, #tpu.memory_space<vmem>>, vector<4x1xf32>
    %237 = vector.broadcast %236 : vector<4x1xf32> to vector<4x122xf32>
    %238 = arith.addf %235, %237 : vector<4x122xf32>
    %cst_119 = arith.constant 0.000000e+00 : f32
    %239 = vector.broadcast %cst_119 : f32 to vector<4x122xf32>
    %240 = arith.maximumf %238, %239 : vector<4x122xf32>
    %241 = arith.truncf %240 : vector<4x122xf32> to vector<4x122xbf16>
    %242 = vector.extract_strided_slice %241 {offsets = [0, 0], sizes = [4, 118], strides = [1, 1]} : vector<4x122xbf16> to vector<4x118xbf16>
    %243 = vector.extract_strided_slice %241 {offsets = [0, 1], sizes = [4, 118], strides = [1, 1]} : vector<4x122xbf16> to vector<4x118xbf16>
    %244 = vector.extract_strided_slice %241 {offsets = [0, 2], sizes = [4, 118], strides = [1, 1]} : vector<4x122xbf16> to vector<4x118xbf16>
    %245 = vector.extract_strided_slice %241 {offsets = [0, 3], sizes = [4, 118], strides = [1, 1]} : vector<4x122xbf16> to vector<4x118xbf16>
    %246 = vector.extract_strided_slice %241 {offsets = [0, 4], sizes = [4, 118], strides = [1, 1]} : vector<4x122xbf16> to vector<4x118xbf16>
    %247 = tpu.concatenate %242, %243, %244, %245, %246 in 0 : vector<4x118xbf16>, vector<4x118xbf16>, vector<4x118xbf16>, vector<4x118xbf16>, vector<4x118xbf16> -> vector<20x118xbf16>
    %c0_120 = arith.constant 0 : index
    %c0_121 = arith.constant 0 : index
    %248 = vector.load %arg9[%c0_120, %c0_121] : memref<8x20xbf16, #tpu.memory_space<vmem>>, vector<8x20xbf16>
    %cst_122 = arith.constant dense<0.000000e+00> : vector<8x118xf32>
    %249 = tpu.matmul %248, %247, %cst_122 {dimension_numbers = #tpu.dot_dimension_numbers<[1], [0], [0], [1], [0, 0, 1, 1], [], []>} : vector<8x20xbf16>, vector<20x118xbf16>, vector<8x118xf32> -> vector<8x118xf32>
    %c0_123 = arith.constant 0 : index
    %c0_124 = arith.constant 0 : index
    %250 = vector.load %arg10[%c0_123, %c0_124] : memref<8x1xf32, #tpu.memory_space<vmem>>, vector<8x1xf32>
    %251 = vector.broadcast %250 : vector<8x1xf32> to vector<8x118xf32>
    %252 = arith.addf %249, %251 : vector<8x118xf32>
    %cst_125 = arith.constant 0.000000e+00 : f32
    %253 = vector.broadcast %cst_125 : f32 to vector<8x118xf32>
    %254 = arith.maximumf %252, %253 : vector<8x118xf32>
    %255 = arith.truncf %254 : vector<8x118xf32> to vector<8x118xbf16>
    %c1_126 = arith.constant 1 : index
    %c0_127 = arith.constant 0 : index
    %c0_128 = arith.constant 0 : index
    %256 = vector.load %arg2[%c1_126, %c0_127, %c0_128] : memref<8x1x128xbf16, #tpu.memory_space<vmem>>, vector<1x1x128xbf16>
    %257 = vector.shape_cast %256 : vector<1x1x128xbf16> to vector<1x128xbf16>
    %258 = vector.extract_strided_slice %257 {offsets = [0, 0], sizes = [1, 122], strides = [1, 1]} : vector<1x128xbf16> to vector<1x122xbf16>
    %259 = vector.extract_strided_slice %257 {offsets = [0, 1], sizes = [1, 122], strides = [1, 1]} : vector<1x128xbf16> to vector<1x122xbf16>
    %260 = vector.extract_strided_slice %257 {offsets = [0, 2], sizes = [1, 122], strides = [1, 1]} : vector<1x128xbf16> to vector<1x122xbf16>
    %261 = vector.extract_strided_slice %257 {offsets = [0, 3], sizes = [1, 122], strides = [1, 1]} : vector<1x128xbf16> to vector<1x122xbf16>
    %262 = vector.extract_strided_slice %257 {offsets = [0, 4], sizes = [1, 122], strides = [1, 1]} : vector<1x128xbf16> to vector<1x122xbf16>
    %263 = vector.extract_strided_slice %257 {offsets = [0, 5], sizes = [1, 122], strides = [1, 1]} : vector<1x128xbf16> to vector<1x122xbf16>
    %264 = vector.extract_strided_slice %257 {offsets = [0, 6], sizes = [1, 122], strides = [1, 1]} : vector<1x128xbf16> to vector<1x122xbf16>
    %265 = tpu.concatenate %258, %259, %260, %261, %262, %263, %264 in 0 : vector<1x122xbf16>, vector<1x122xbf16>, vector<1x122xbf16>, vector<1x122xbf16>, vector<1x122xbf16>, vector<1x122xbf16>, vector<1x122xbf16> -> vector<7x122xbf16>
    %c0_129 = arith.constant 0 : index
    %c0_130 = arith.constant 0 : index
    %266 = vector.load %arg7[%c0_129, %c0_130] : memref<4x7xbf16, #tpu.memory_space<vmem>>, vector<4x7xbf16>
    %cst_131 = arith.constant dense<0.000000e+00> : vector<4x122xf32>
    %267 = tpu.matmul %266, %265, %cst_131 {dimension_numbers = #tpu.dot_dimension_numbers<[1], [0], [0], [1], [0, 0, 1, 1], [], []>} : vector<4x7xbf16>, vector<7x122xbf16>, vector<4x122xf32> -> vector<4x122xf32>
    %c0_132 = arith.constant 0 : index
    %c0_133 = arith.constant 0 : index
    %268 = vector.load %arg8[%c0_132, %c0_133] : memref<4x1xf32, #tpu.memory_space<vmem>>, vector<4x1xf32>
    %269 = vector.broadcast %268 : vector<4x1xf32> to vector<4x122xf32>
    %270 = arith.addf %267, %269 : vector<4x122xf32>
    %cst_134 = arith.constant 0.000000e+00 : f32
    %271 = vector.broadcast %cst_134 : f32 to vector<4x122xf32>
    %272 = arith.maximumf %270, %271 : vector<4x122xf32>
    %273 = arith.truncf %272 : vector<4x122xf32> to vector<4x122xbf16>
    %274 = vector.extract_strided_slice %273 {offsets = [0, 0], sizes = [4, 118], strides = [1, 1]} : vector<4x122xbf16> to vector<4x118xbf16>
    %275 = vector.extract_strided_slice %273 {offsets = [0, 1], sizes = [4, 118], strides = [1, 1]} : vector<4x122xbf16> to vector<4x118xbf16>
    %276 = vector.extract_strided_slice %273 {offsets = [0, 2], sizes = [4, 118], strides = [1, 1]} : vector<4x122xbf16> to vector<4x118xbf16>
    %277 = vector.extract_strided_slice %273 {offsets = [0, 3], sizes = [4, 118], strides = [1, 1]} : vector<4x122xbf16> to vector<4x118xbf16>
    %278 = vector.extract_strided_slice %273 {offsets = [0, 4], sizes = [4, 118], strides = [1, 1]} : vector<4x122xbf16> to vector<4x118xbf16>
    %279 = tpu.concatenate %274, %275, %276, %277, %278 in 0 : vector<4x118xbf16>, vector<4x118xbf16>, vector<4x118xbf16>, vector<4x118xbf16>, vector<4x118xbf16> -> vector<20x118xbf16>
    %c0_135 = arith.constant 0 : index
    %c0_136 = arith.constant 0 : index
    %280 = vector.load %arg9[%c0_135, %c0_136] : memref<8x20xbf16, #tpu.memory_space<vmem>>, vector<8x20xbf16>
    %cst_137 = arith.constant dense<0.000000e+00> : vector<8x118xf32>
    %281 = tpu.matmul %280, %279, %cst_137 {dimension_numbers = #tpu.dot_dimension_numbers<[1], [0], [0], [1], [0, 0, 1, 1], [], []>} : vector<8x20xbf16>, vector<20x118xbf16>, vector<8x118xf32> -> vector<8x118xf32>
    %c0_138 = arith.constant 0 : index
    %c0_139 = arith.constant 0 : index
    %282 = vector.load %arg10[%c0_138, %c0_139] : memref<8x1xf32, #tpu.memory_space<vmem>>, vector<8x1xf32>
    %283 = vector.broadcast %282 : vector<8x1xf32> to vector<8x118xf32>
    %284 = arith.addf %281, %283 : vector<8x118xf32>
    %cst_140 = arith.constant 0.000000e+00 : f32
    %285 = vector.broadcast %cst_140 : f32 to vector<8x118xf32>
    %286 = arith.maximumf %284, %285 : vector<8x118xf32>
    %287 = arith.truncf %286 : vector<8x118xf32> to vector<8x118xbf16>
    %c2_141 = arith.constant 2 : index
    %c0_142 = arith.constant 0 : index
    %c0_143 = arith.constant 0 : index
    %288 = vector.load %arg2[%c2_141, %c0_142, %c0_143] : memref<8x1x128xbf16, #tpu.memory_space<vmem>>, vector<1x1x128xbf16>
    %289 = vector.shape_cast %288 : vector<1x1x128xbf16> to vector<1x128xbf16>
    %290 = vector.extract_strided_slice %289 {offsets = [0, 0], sizes = [1, 122], strides = [1, 1]} : vector<1x128xbf16> to vector<1x122xbf16>
    %291 = vector.extract_strided_slice %289 {offsets = [0, 1], sizes = [1, 122], strides = [1, 1]} : vector<1x128xbf16> to vector<1x122xbf16>
    %292 = vector.extract_strided_slice %289 {offsets = [0, 2], sizes = [1, 122], strides = [1, 1]} : vector<1x128xbf16> to vector<1x122xbf16>
    %293 = vector.extract_strided_slice %289 {offsets = [0, 3], sizes = [1, 122], strides = [1, 1]} : vector<1x128xbf16> to vector<1x122xbf16>
    %294 = vector.extract_strided_slice %289 {offsets = [0, 4], sizes = [1, 122], strides = [1, 1]} : vector<1x128xbf16> to vector<1x122xbf16>
    %295 = vector.extract_strided_slice %289 {offsets = [0, 5], sizes = [1, 122], strides = [1, 1]} : vector<1x128xbf16> to vector<1x122xbf16>
    %296 = vector.extract_strided_slice %289 {offsets = [0, 6], sizes = [1, 122], strides = [1, 1]} : vector<1x128xbf16> to vector<1x122xbf16>
    %297 = tpu.concatenate %290, %291, %292, %293, %294, %295, %296 in 0 : vector<1x122xbf16>, vector<1x122xbf16>, vector<1x122xbf16>, vector<1x122xbf16>, vector<1x122xbf16>, vector<1x122xbf16>, vector<1x122xbf16> -> vector<7x122xbf16>
    %c0_144 = arith.constant 0 : index
    %c0_145 = arith.constant 0 : index
    %298 = vector.load %arg7[%c0_144, %c0_145] : memref<4x7xbf16, #tpu.memory_space<vmem>>, vector<4x7xbf16>
    %cst_146 = arith.constant dense<0.000000e+00> : vector<4x122xf32>
    %299 = tpu.matmul %298, %297, %cst_146 {dimension_numbers = #tpu.dot_dimension_numbers<[1], [0], [0], [1], [0, 0, 1, 1], [], []>} : vector<4x7xbf16>, vector<7x122xbf16>, vector<4x122xf32> -> vector<4x122xf32>
    %c0_147 = arith.constant 0 : index
    %c0_148 = arith.constant 0 : index
    %300 = vector.load %arg8[%c0_147, %c0_148] : memref<4x1xf32, #tpu.memory_space<vmem>>, vector<4x1xf32>
    %301 = vector.broadcast %300 : vector<4x1xf32> to vector<4x122xf32>
    %302 = arith.addf %299, %301 : vector<4x122xf32>
    %cst_149 = arith.constant 0.000000e+00 : f32
    %303 = vector.broadcast %cst_149 : f32 to vector<4x122xf32>
    %304 = arith.maximumf %302, %303 : vector<4x122xf32>
    %305 = arith.truncf %304 : vector<4x122xf32> to vector<4x122xbf16>
    %306 = vector.extract_strided_slice %305 {offsets = [0, 0], sizes = [4, 118], strides = [1, 1]} : vector<4x122xbf16> to vector<4x118xbf16>
    %307 = vector.extract_strided_slice %305 {offsets = [0, 1], sizes = [4, 118], strides = [1, 1]} : vector<4x122xbf16> to vector<4x118xbf16>
    %308 = vector.extract_strided_slice %305 {offsets = [0, 2], sizes = [4, 118], strides = [1, 1]} : vector<4x122xbf16> to vector<4x118xbf16>
    %309 = vector.extract_strided_slice %305 {offsets = [0, 3], sizes = [4, 118], strides = [1, 1]} : vector<4x122xbf16> to vector<4x118xbf16>
    %310 = vector.extract_strided_slice %305 {offsets = [0, 4], sizes = [4, 118], strides = [1, 1]} : vector<4x122xbf16> to vector<4x118xbf16>
    %311 = tpu.concatenate %306, %307, %308, %309, %310 in 0 : vector<4x118xbf16>, vector<4x118xbf16>, vector<4x118xbf16>, vector<4x118xbf16>, vector<4x118xbf16> -> vector<20x118xbf16>
    %c0_150 = arith.constant 0 : index
    %c0_151 = arith.constant 0 : index
    %312 = vector.load %arg9[%c0_150, %c0_151] : memref<8x20xbf16, #tpu.memory_space<vmem>>, vector<8x20xbf16>
    %cst_152 = arith.constant dense<0.000000e+00> : vector<8x118xf32>
    %313 = tpu.matmul %312, %311, %cst_152 {dimension_numbers = #tpu.dot_dimension_numbers<[1], [0], [0], [1], [0, 0, 1, 1], [], []>} : vector<8x20xbf16>, vector<20x118xbf16>, vector<8x118xf32> -> vector<8x118xf32>
    %c0_153 = arith.constant 0 : index
    %c0_154 = arith.constant 0 : index
    %314 = vector.load %arg10[%c0_153, %c0_154] : memref<8x1xf32, #tpu.memory_space<vmem>>, vector<8x1xf32>
    %315 = vector.broadcast %314 : vector<8x1xf32> to vector<8x118xf32>
    %316 = arith.addf %313, %315 : vector<8x118xf32>
    %cst_155 = arith.constant 0.000000e+00 : f32
    %317 = vector.broadcast %cst_155 : f32 to vector<8x118xf32>
    %318 = arith.maximumf %316, %317 : vector<8x118xf32>
    %319 = arith.truncf %318 : vector<8x118xf32> to vector<8x118xbf16>
    %c3_156 = arith.constant 3 : index
    %c0_157 = arith.constant 0 : index
    %c0_158 = arith.constant 0 : index
    %320 = vector.load %arg2[%c3_156, %c0_157, %c0_158] : memref<8x1x128xbf16, #tpu.memory_space<vmem>>, vector<1x1x128xbf16>
    %321 = vector.shape_cast %320 : vector<1x1x128xbf16> to vector<1x128xbf16>
    %322 = vector.extract_strided_slice %321 {offsets = [0, 0], sizes = [1, 122], strides = [1, 1]} : vector<1x128xbf16> to vector<1x122xbf16>
    %323 = vector.extract_strided_slice %321 {offsets = [0, 1], sizes = [1, 122], strides = [1, 1]} : vector<1x128xbf16> to vector<1x122xbf16>
    %324 = vector.extract_strided_slice %321 {offsets = [0, 2], sizes = [1, 122], strides = [1, 1]} : vector<1x128xbf16> to vector<1x122xbf16>
    %325 = vector.extract_strided_slice %321 {offsets = [0, 3], sizes = [1, 122], strides = [1, 1]} : vector<1x128xbf16> to vector<1x122xbf16>
    %326 = vector.extract_strided_slice %321 {offsets = [0, 4], sizes = [1, 122], strides = [1, 1]} : vector<1x128xbf16> to vector<1x122xbf16>
    %327 = vector.extract_strided_slice %321 {offsets = [0, 5], sizes = [1, 122], strides = [1, 1]} : vector<1x128xbf16> to vector<1x122xbf16>
    %328 = vector.extract_strided_slice %321 {offsets = [0, 6], sizes = [1, 122], strides = [1, 1]} : vector<1x128xbf16> to vector<1x122xbf16>
    %329 = tpu.concatenate %322, %323, %324, %325, %326, %327, %328 in 0 : vector<1x122xbf16>, vector<1x122xbf16>, vector<1x122xbf16>, vector<1x122xbf16>, vector<1x122xbf16>, vector<1x122xbf16>, vector<1x122xbf16> -> vector<7x122xbf16>
    %c0_159 = arith.constant 0 : index
    %c0_160 = arith.constant 0 : index
    %330 = vector.load %arg7[%c0_159, %c0_160] : memref<4x7xbf16, #tpu.memory_space<vmem>>, vector<4x7xbf16>
    %cst_161 = arith.constant dense<0.000000e+00> : vector<4x122xf32>
    %331 = tpu.matmul %330, %329, %cst_161 {dimension_numbers = #tpu.dot_dimension_numbers<[1], [0], [0], [1], [0, 0, 1, 1], [], []>} : vector<4x7xbf16>, vector<7x122xbf16>, vector<4x122xf32> -> vector<4x122xf32>
    %c0_162 = arith.constant 0 : index
    %c0_163 = arith.constant 0 : index
    %332 = vector.load %arg8[%c0_162, %c0_163] : memref<4x1xf32, #tpu.memory_space<vmem>>, vector<4x1xf32>
    %333 = vector.broadcast %332 : vector<4x1xf32> to vector<4x122xf32>
    %334 = arith.addf %331, %333 : vector<4x122xf32>
    %cst_164 = arith.constant 0.000000e+00 : f32
    %335 = vector.broadcast %cst_164 : f32 to vector<4x122xf32>
    %336 = arith.maximumf %334, %335 : vector<4x122xf32>
    %337 = arith.truncf %336 : vector<4x122xf32> to vector<4x122xbf16>
    %338 = vector.extract_strided_slice %337 {offsets = [0, 0], sizes = [4, 118], strides = [1, 1]} : vector<4x122xbf16> to vector<4x118xbf16>
    %339 = vector.extract_strided_slice %337 {offsets = [0, 1], sizes = [4, 118], strides = [1, 1]} : vector<4x122xbf16> to vector<4x118xbf16>
    %340 = vector.extract_strided_slice %337 {offsets = [0, 2], sizes = [4, 118], strides = [1, 1]} : vector<4x122xbf16> to vector<4x118xbf16>
    %341 = vector.extract_strided_slice %337 {offsets = [0, 3], sizes = [4, 118], strides = [1, 1]} : vector<4x122xbf16> to vector<4x118xbf16>
    %342 = vector.extract_strided_slice %337 {offsets = [0, 4], sizes = [4, 118], strides = [1, 1]} : vector<4x122xbf16> to vector<4x118xbf16>
    %343 = tpu.concatenate %338, %339, %340, %341, %342 in 0 : vector<4x118xbf16>, vector<4x118xbf16>, vector<4x118xbf16>, vector<4x118xbf16>, vector<4x118xbf16> -> vector<20x118xbf16>
    %c0_165 = arith.constant 0 : index
    %c0_166 = arith.constant 0 : index
    %344 = vector.load %arg9[%c0_165, %c0_166] : memref<8x20xbf16, #tpu.memory_space<vmem>>, vector<8x20xbf16>
    %cst_167 = arith.constant dense<0.000000e+00> : vector<8x118xf32>
    %345 = tpu.matmul %344, %343, %cst_167 {dimension_numbers = #tpu.dot_dimension_numbers<[1], [0], [0], [1], [0, 0, 1, 1], [], []>} : vector<8x20xbf16>, vector<20x118xbf16>, vector<8x118xf32> -> vector<8x118xf32>
    %c0_168 = arith.constant 0 : index
    %c0_169 = arith.constant 0 : index
    %346 = vector.load %arg10[%c0_168, %c0_169] : memref<8x1xf32, #tpu.memory_space<vmem>>, vector<8x1xf32>
    %347 = vector.broadcast %346 : vector<8x1xf32> to vector<8x118xf32>
    %348 = arith.addf %345, %347 : vector<8x118xf32>
    %cst_170 = arith.constant 0.000000e+00 : f32
    %349 = vector.broadcast %cst_170 : f32 to vector<8x118xf32>
    %350 = arith.maximumf %348, %349 : vector<8x118xf32>
    %351 = arith.truncf %350 : vector<8x118xf32> to vector<8x118xbf16>
    %c4_171 = arith.constant 4 : index
    %c0_172 = arith.constant 0 : index
    %c0_173 = arith.constant 0 : index
    %352 = vector.load %arg2[%c4_171, %c0_172, %c0_173] : memref<8x1x128xbf16, #tpu.memory_space<vmem>>, vector<1x1x128xbf16>
    %353 = vector.shape_cast %352 : vector<1x1x128xbf16> to vector<1x128xbf16>
    %354 = vector.extract_strided_slice %353 {offsets = [0, 0], sizes = [1, 122], strides = [1, 1]} : vector<1x128xbf16> to vector<1x122xbf16>
    %355 = vector.extract_strided_slice %353 {offsets = [0, 1], sizes = [1, 122], strides = [1, 1]} : vector<1x128xbf16> to vector<1x122xbf16>
    %356 = vector.extract_strided_slice %353 {offsets = [0, 2], sizes = [1, 122], strides = [1, 1]} : vector<1x128xbf16> to vector<1x122xbf16>
    %357 = vector.extract_strided_slice %353 {offsets = [0, 3], sizes = [1, 122], strides = [1, 1]} : vector<1x128xbf16> to vector<1x122xbf16>
    %358 = vector.extract_strided_slice %353 {offsets = [0, 4], sizes = [1, 122], strides = [1, 1]} : vector<1x128xbf16> to vector<1x122xbf16>
    %359 = vector.extract_strided_slice %353 {offsets = [0, 5], sizes = [1, 122], strides = [1, 1]} : vector<1x128xbf16> to vector<1x122xbf16>
    %360 = vector.extract_strided_slice %353 {offsets = [0, 6], sizes = [1, 122], strides = [1, 1]} : vector<1x128xbf16> to vector<1x122xbf16>
    %361 = tpu.concatenate %354, %355, %356, %357, %358, %359, %360 in 0 : vector<1x122xbf16>, vector<1x122xbf16>, vector<1x122xbf16>, vector<1x122xbf16>, vector<1x122xbf16>, vector<1x122xbf16>, vector<1x122xbf16> -> vector<7x122xbf16>
    %c0_174 = arith.constant 0 : index
    %c0_175 = arith.constant 0 : index
    %362 = vector.load %arg7[%c0_174, %c0_175] : memref<4x7xbf16, #tpu.memory_space<vmem>>, vector<4x7xbf16>
    %cst_176 = arith.constant dense<0.000000e+00> : vector<4x122xf32>
    %363 = tpu.matmul %362, %361, %cst_176 {dimension_numbers = #tpu.dot_dimension_numbers<[1], [0], [0], [1], [0, 0, 1, 1], [], []>} : vector<4x7xbf16>, vector<7x122xbf16>, vector<4x122xf32> -> vector<4x122xf32>
    %c0_177 = arith.constant 0 : index
    %c0_178 = arith.constant 0 : index
    %364 = vector.load %arg8[%c0_177, %c0_178] : memref<4x1xf32, #tpu.memory_space<vmem>>, vector<4x1xf32>
    %365 = vector.broadcast %364 : vector<4x1xf32> to vector<4x122xf32>
    %366 = arith.addf %363, %365 : vector<4x122xf32>
    %cst_179 = arith.constant 0.000000e+00 : f32
    %367 = vector.broadcast %cst_179 : f32 to vector<4x122xf32>
    %368 = arith.maximumf %366, %367 : vector<4x122xf32>
    %369 = arith.truncf %368 : vector<4x122xf32> to vector<4x122xbf16>
    %370 = vector.extract_strided_slice %369 {offsets = [0, 0], sizes = [4, 118], strides = [1, 1]} : vector<4x122xbf16> to vector<4x118xbf16>
    %371 = vector.extract_strided_slice %369 {offsets = [0, 1], sizes = [4, 118], strides = [1, 1]} : vector<4x122xbf16> to vector<4x118xbf16>
    %372 = vector.extract_strided_slice %369 {offsets = [0, 2], sizes = [4, 118], strides = [1, 1]} : vector<4x122xbf16> to vector<4x118xbf16>
    %373 = vector.extract_strided_slice %369 {offsets = [0, 3], sizes = [4, 118], strides = [1, 1]} : vector<4x122xbf16> to vector<4x118xbf16>
    %374 = vector.extract_strided_slice %369 {offsets = [0, 4], sizes = [4, 118], strides = [1, 1]} : vector<4x122xbf16> to vector<4x118xbf16>
    %375 = tpu.concatenate %370, %371, %372, %373, %374 in 0 : vector<4x118xbf16>, vector<4x118xbf16>, vector<4x118xbf16>, vector<4x118xbf16>, vector<4x118xbf16> -> vector<20x118xbf16>
    %c0_180 = arith.constant 0 : index
    %c0_181 = arith.constant 0 : index
    %376 = vector.load %arg9[%c0_180, %c0_181] : memref<8x20xbf16, #tpu.memory_space<vmem>>, vector<8x20xbf16>
    %cst_182 = arith.constant dense<0.000000e+00> : vector<8x118xf32>
    %377 = tpu.matmul %376, %375, %cst_182 {dimension_numbers = #tpu.dot_dimension_numbers<[1], [0], [0], [1], [0, 0, 1, 1], [], []>} : vector<8x20xbf16>, vector<20x118xbf16>, vector<8x118xf32> -> vector<8x118xf32>
    %c0_183 = arith.constant 0 : index
    %c0_184 = arith.constant 0 : index
    %378 = vector.load %arg10[%c0_183, %c0_184] : memref<8x1xf32, #tpu.memory_space<vmem>>, vector<8x1xf32>
    %379 = vector.broadcast %378 : vector<8x1xf32> to vector<8x118xf32>
    %380 = arith.addf %377, %379 : vector<8x118xf32>
    %cst_185 = arith.constant 0.000000e+00 : f32
    %381 = vector.broadcast %cst_185 : f32 to vector<8x118xf32>
    %382 = arith.maximumf %380, %381 : vector<8x118xf32>
    %383 = arith.truncf %382 : vector<8x118xf32> to vector<8x118xbf16>
    %c5_186 = arith.constant 5 : index
    %c0_187 = arith.constant 0 : index
    %c0_188 = arith.constant 0 : index
    %384 = vector.load %arg2[%c5_186, %c0_187, %c0_188] : memref<8x1x128xbf16, #tpu.memory_space<vmem>>, vector<1x1x128xbf16>
    %385 = vector.shape_cast %384 : vector<1x1x128xbf16> to vector<1x128xbf16>
    %386 = vector.extract_strided_slice %385 {offsets = [0, 0], sizes = [1, 122], strides = [1, 1]} : vector<1x128xbf16> to vector<1x122xbf16>
    %387 = vector.extract_strided_slice %385 {offsets = [0, 1], sizes = [1, 122], strides = [1, 1]} : vector<1x128xbf16> to vector<1x122xbf16>
    %388 = vector.extract_strided_slice %385 {offsets = [0, 2], sizes = [1, 122], strides = [1, 1]} : vector<1x128xbf16> to vector<1x122xbf16>
    %389 = vector.extract_strided_slice %385 {offsets = [0, 3], sizes = [1, 122], strides = [1, 1]} : vector<1x128xbf16> to vector<1x122xbf16>
    %390 = vector.extract_strided_slice %385 {offsets = [0, 4], sizes = [1, 122], strides = [1, 1]} : vector<1x128xbf16> to vector<1x122xbf16>
    %391 = vector.extract_strided_slice %385 {offsets = [0, 5], sizes = [1, 122], strides = [1, 1]} : vector<1x128xbf16> to vector<1x122xbf16>
    %392 = vector.extract_strided_slice %385 {offsets = [0, 6], sizes = [1, 122], strides = [1, 1]} : vector<1x128xbf16> to vector<1x122xbf16>
    %393 = tpu.concatenate %386, %387, %388, %389, %390, %391, %392 in 0 : vector<1x122xbf16>, vector<1x122xbf16>, vector<1x122xbf16>, vector<1x122xbf16>, vector<1x122xbf16>, vector<1x122xbf16>, vector<1x122xbf16> -> vector<7x122xbf16>
    %c0_189 = arith.constant 0 : index
    %c0_190 = arith.constant 0 : index
    %394 = vector.load %arg7[%c0_189, %c0_190] : memref<4x7xbf16, #tpu.memory_space<vmem>>, vector<4x7xbf16>
    %cst_191 = arith.constant dense<0.000000e+00> : vector<4x122xf32>
    %395 = tpu.matmul %394, %393, %cst_191 {dimension_numbers = #tpu.dot_dimension_numbers<[1], [0], [0], [1], [0, 0, 1, 1], [], []>} : vector<4x7xbf16>, vector<7x122xbf16>, vector<4x122xf32> -> vector<4x122xf32>
    %c0_192 = arith.constant 0 : index
    %c0_193 = arith.constant 0 : index
    %396 = vector.load %arg8[%c0_192, %c0_193] : memref<4x1xf32, #tpu.memory_space<vmem>>, vector<4x1xf32>
    %397 = vector.broadcast %396 : vector<4x1xf32> to vector<4x122xf32>
    %398 = arith.addf %395, %397 : vector<4x122xf32>
    %cst_194 = arith.constant 0.000000e+00 : f32
    %399 = vector.broadcast %cst_194 : f32 to vector<4x122xf32>
    %400 = arith.maximumf %398, %399 : vector<4x122xf32>
    %401 = arith.truncf %400 : vector<4x122xf32> to vector<4x122xbf16>
    %402 = vector.extract_strided_slice %401 {offsets = [0, 0], sizes = [4, 118], strides = [1, 1]} : vector<4x122xbf16> to vector<4x118xbf16>
    %403 = vector.extract_strided_slice %401 {offsets = [0, 1], sizes = [4, 118], strides = [1, 1]} : vector<4x122xbf16> to vector<4x118xbf16>
    %404 = vector.extract_strided_slice %401 {offsets = [0, 2], sizes = [4, 118], strides = [1, 1]} : vector<4x122xbf16> to vector<4x118xbf16>
    %405 = vector.extract_strided_slice %401 {offsets = [0, 3], sizes = [4, 118], strides = [1, 1]} : vector<4x122xbf16> to vector<4x118xbf16>
    %406 = vector.extract_strided_slice %401 {offsets = [0, 4], sizes = [4, 118], strides = [1, 1]} : vector<4x122xbf16> to vector<4x118xbf16>
    %407 = tpu.concatenate %402, %403, %404, %405, %406 in 0 : vector<4x118xbf16>, vector<4x118xbf16>, vector<4x118xbf16>, vector<4x118xbf16>, vector<4x118xbf16> -> vector<20x118xbf16>
    %c0_195 = arith.constant 0 : index
    %c0_196 = arith.constant 0 : index
    %408 = vector.load %arg9[%c0_195, %c0_196] : memref<8x20xbf16, #tpu.memory_space<vmem>>, vector<8x20xbf16>
    %cst_197 = arith.constant dense<0.000000e+00> : vector<8x118xf32>
    %409 = tpu.matmul %408, %407, %cst_197 {dimension_numbers = #tpu.dot_dimension_numbers<[1], [0], [0], [1], [0, 0, 1, 1], [], []>} : vector<8x20xbf16>, vector<20x118xbf16>, vector<8x118xf32> -> vector<8x118xf32>
    %c0_198 = arith.constant 0 : index
    %c0_199 = arith.constant 0 : index
    %410 = vector.load %arg10[%c0_198, %c0_199] : memref<8x1xf32, #tpu.memory_space<vmem>>, vector<8x1xf32>
    %411 = vector.broadcast %410 : vector<8x1xf32> to vector<8x118xf32>
    %412 = arith.addf %409, %411 : vector<8x118xf32>
    %cst_200 = arith.constant 0.000000e+00 : f32
    %413 = vector.broadcast %cst_200 : f32 to vector<8x118xf32>
    %414 = arith.maximumf %412, %413 : vector<8x118xf32>
    %415 = arith.truncf %414 : vector<8x118xf32> to vector<8x118xbf16>
    %c6_201 = arith.constant 6 : index
    %c0_202 = arith.constant 0 : index
    %c0_203 = arith.constant 0 : index
    %416 = vector.load %arg2[%c6_201, %c0_202, %c0_203] : memref<8x1x128xbf16, #tpu.memory_space<vmem>>, vector<1x1x128xbf16>
    %417 = vector.shape_cast %416 : vector<1x1x128xbf16> to vector<1x128xbf16>
    %418 = vector.extract_strided_slice %417 {offsets = [0, 0], sizes = [1, 122], strides = [1, 1]} : vector<1x128xbf16> to vector<1x122xbf16>
    %419 = vector.extract_strided_slice %417 {offsets = [0, 1], sizes = [1, 122], strides = [1, 1]} : vector<1x128xbf16> to vector<1x122xbf16>
    %420 = vector.extract_strided_slice %417 {offsets = [0, 2], sizes = [1, 122], strides = [1, 1]} : vector<1x128xbf16> to vector<1x122xbf16>
    %421 = vector.extract_strided_slice %417 {offsets = [0, 3], sizes = [1, 122], strides = [1, 1]} : vector<1x128xbf16> to vector<1x122xbf16>
    %422 = vector.extract_strided_slice %417 {offsets = [0, 4], sizes = [1, 122], strides = [1, 1]} : vector<1x128xbf16> to vector<1x122xbf16>
    %423 = vector.extract_strided_slice %417 {offsets = [0, 5], sizes = [1, 122], strides = [1, 1]} : vector<1x128xbf16> to vector<1x122xbf16>
    %424 = vector.extract_strided_slice %417 {offsets = [0, 6], sizes = [1, 122], strides = [1, 1]} : vector<1x128xbf16> to vector<1x122xbf16>
    %425 = tpu.concatenate %418, %419, %420, %421, %422, %423, %424 in 0 : vector<1x122xbf16>, vector<1x122xbf16>, vector<1x122xbf16>, vector<1x122xbf16>, vector<1x122xbf16>, vector<1x122xbf16>, vector<1x122xbf16> -> vector<7x122xbf16>
    %c0_204 = arith.constant 0 : index
    %c0_205 = arith.constant 0 : index
    %426 = vector.load %arg7[%c0_204, %c0_205] : memref<4x7xbf16, #tpu.memory_space<vmem>>, vector<4x7xbf16>
    %cst_206 = arith.constant dense<0.000000e+00> : vector<4x122xf32>
    %427 = tpu.matmul %426, %425, %cst_206 {dimension_numbers = #tpu.dot_dimension_numbers<[1], [0], [0], [1], [0, 0, 1, 1], [], []>} : vector<4x7xbf16>, vector<7x122xbf16>, vector<4x122xf32> -> vector<4x122xf32>
    %c0_207 = arith.constant 0 : index
    %c0_208 = arith.constant 0 : index
    %428 = vector.load %arg8[%c0_207, %c0_208] : memref<4x1xf32, #tpu.memory_space<vmem>>, vector<4x1xf32>
    %429 = vector.broadcast %428 : vector<4x1xf32> to vector<4x122xf32>
    %430 = arith.addf %427, %429 : vector<4x122xf32>
    %cst_209 = arith.constant 0.000000e+00 : f32
    %431 = vector.broadcast %cst_209 : f32 to vector<4x122xf32>
    %432 = arith.maximumf %430, %431 : vector<4x122xf32>
    %433 = arith.truncf %432 : vector<4x122xf32> to vector<4x122xbf16>
    %434 = vector.extract_strided_slice %433 {offsets = [0, 0], sizes = [4, 118], strides = [1, 1]} : vector<4x122xbf16> to vector<4x118xbf16>
    %435 = vector.extract_strided_slice %433 {offsets = [0, 1], sizes = [4, 118], strides = [1, 1]} : vector<4x122xbf16> to vector<4x118xbf16>
    %436 = vector.extract_strided_slice %433 {offsets = [0, 2], sizes = [4, 118], strides = [1, 1]} : vector<4x122xbf16> to vector<4x118xbf16>
    %437 = vector.extract_strided_slice %433 {offsets = [0, 3], sizes = [4, 118], strides = [1, 1]} : vector<4x122xbf16> to vector<4x118xbf16>
    %438 = vector.extract_strided_slice %433 {offsets = [0, 4], sizes = [4, 118], strides = [1, 1]} : vector<4x122xbf16> to vector<4x118xbf16>
    %439 = tpu.concatenate %434, %435, %436, %437, %438 in 0 : vector<4x118xbf16>, vector<4x118xbf16>, vector<4x118xbf16>, vector<4x118xbf16>, vector<4x118xbf16> -> vector<20x118xbf16>
    %c0_210 = arith.constant 0 : index
    %c0_211 = arith.constant 0 : index
    %440 = vector.load %arg9[%c0_210, %c0_211] : memref<8x20xbf16, #tpu.memory_space<vmem>>, vector<8x20xbf16>
    %cst_212 = arith.constant dense<0.000000e+00> : vector<8x118xf32>
    %441 = tpu.matmul %440, %439, %cst_212 {dimension_numbers = #tpu.dot_dimension_numbers<[1], [0], [0], [1], [0, 0, 1, 1], [], []>} : vector<8x20xbf16>, vector<20x118xbf16>, vector<8x118xf32> -> vector<8x118xf32>
    %c0_213 = arith.constant 0 : index
    %c0_214 = arith.constant 0 : index
    %442 = vector.load %arg10[%c0_213, %c0_214] : memref<8x1xf32, #tpu.memory_space<vmem>>, vector<8x1xf32>
    %443 = vector.broadcast %442 : vector<8x1xf32> to vector<8x118xf32>
    %444 = arith.addf %441, %443 : vector<8x118xf32>
    %cst_215 = arith.constant 0.000000e+00 : f32
    %445 = vector.broadcast %cst_215 : f32 to vector<8x118xf32>
    %446 = arith.maximumf %444, %445 : vector<8x118xf32>
    %447 = arith.truncf %446 : vector<8x118xf32> to vector<8x118xbf16>
    %c7_216 = arith.constant 7 : index
    %c0_217 = arith.constant 0 : index
    %c0_218 = arith.constant 0 : index
    %448 = vector.load %arg2[%c7_216, %c0_217, %c0_218] : memref<8x1x128xbf16, #tpu.memory_space<vmem>>, vector<1x1x128xbf16>
    %449 = vector.shape_cast %448 : vector<1x1x128xbf16> to vector<1x128xbf16>
    %450 = vector.extract_strided_slice %449 {offsets = [0, 0], sizes = [1, 122], strides = [1, 1]} : vector<1x128xbf16> to vector<1x122xbf16>
    %451 = vector.extract_strided_slice %449 {offsets = [0, 1], sizes = [1, 122], strides = [1, 1]} : vector<1x128xbf16> to vector<1x122xbf16>
    %452 = vector.extract_strided_slice %449 {offsets = [0, 2], sizes = [1, 122], strides = [1, 1]} : vector<1x128xbf16> to vector<1x122xbf16>
    %453 = vector.extract_strided_slice %449 {offsets = [0, 3], sizes = [1, 122], strides = [1, 1]} : vector<1x128xbf16> to vector<1x122xbf16>
    %454 = vector.extract_strided_slice %449 {offsets = [0, 4], sizes = [1, 122], strides = [1, 1]} : vector<1x128xbf16> to vector<1x122xbf16>
    %455 = vector.extract_strided_slice %449 {offsets = [0, 5], sizes = [1, 122], strides = [1, 1]} : vector<1x128xbf16> to vector<1x122xbf16>
    %456 = vector.extract_strided_slice %449 {offsets = [0, 6], sizes = [1, 122], strides = [1, 1]} : vector<1x128xbf16> to vector<1x122xbf16>
    %457 = tpu.concatenate %450, %451, %452, %453, %454, %455, %456 in 0 : vector<1x122xbf16>, vector<1x122xbf16>, vector<1x122xbf16>, vector<1x122xbf16>, vector<1x122xbf16>, vector<1x122xbf16>, vector<1x122xbf16> -> vector<7x122xbf16>
    %c0_219 = arith.constant 0 : index
    %c0_220 = arith.constant 0 : index
    %458 = vector.load %arg7[%c0_219, %c0_220] : memref<4x7xbf16, #tpu.memory_space<vmem>>, vector<4x7xbf16>
    %cst_221 = arith.constant dense<0.000000e+00> : vector<4x122xf32>
    %459 = tpu.matmul %458, %457, %cst_221 {dimension_numbers = #tpu.dot_dimension_numbers<[1], [0], [0], [1], [0, 0, 1, 1], [], []>} : vector<4x7xbf16>, vector<7x122xbf16>, vector<4x122xf32> -> vector<4x122xf32>
    %c0_222 = arith.constant 0 : index
    %c0_223 = arith.constant 0 : index
    %460 = vector.load %arg8[%c0_222, %c0_223] : memref<4x1xf32, #tpu.memory_space<vmem>>, vector<4x1xf32>
    %461 = vector.broadcast %460 : vector<4x1xf32> to vector<4x122xf32>
    %462 = arith.addf %459, %461 : vector<4x122xf32>
    %cst_224 = arith.constant 0.000000e+00 : f32
    %463 = vector.broadcast %cst_224 : f32 to vector<4x122xf32>
    %464 = arith.maximumf %462, %463 : vector<4x122xf32>
    %465 = arith.truncf %464 : vector<4x122xf32> to vector<4x122xbf16>
    %466 = vector.extract_strided_slice %465 {offsets = [0, 0], sizes = [4, 118], strides = [1, 1]} : vector<4x122xbf16> to vector<4x118xbf16>
    %467 = vector.extract_strided_slice %465 {offsets = [0, 1], sizes = [4, 118], strides = [1, 1]} : vector<4x122xbf16> to vector<4x118xbf16>
    %468 = vector.extract_strided_slice %465 {offsets = [0, 2], sizes = [4, 118], strides = [1, 1]} : vector<4x122xbf16> to vector<4x118xbf16>
    %469 = vector.extract_strided_slice %465 {offsets = [0, 3], sizes = [4, 118], strides = [1, 1]} : vector<4x122xbf16> to vector<4x118xbf16>
    %470 = vector.extract_strided_slice %465 {offsets = [0, 4], sizes = [4, 118], strides = [1, 1]} : vector<4x122xbf16> to vector<4x118xbf16>
    %471 = tpu.concatenate %466, %467, %468, %469, %470 in 0 : vector<4x118xbf16>, vector<4x118xbf16>, vector<4x118xbf16>, vector<4x118xbf16>, vector<4x118xbf16> -> vector<20x118xbf16>
    %c0_225 = arith.constant 0 : index
    %c0_226 = arith.constant 0 : index
    %472 = vector.load %arg9[%c0_225, %c0_226] : memref<8x20xbf16, #tpu.memory_space<vmem>>, vector<8x20xbf16>
    %cst_227 = arith.constant dense<0.000000e+00> : vector<8x118xf32>
    %473 = tpu.matmul %472, %471, %cst_227 {dimension_numbers = #tpu.dot_dimension_numbers<[1], [0], [0], [1], [0, 0, 1, 1], [], []>} : vector<8x20xbf16>, vector<20x118xbf16>, vector<8x118xf32> -> vector<8x118xf32>
    %c0_228 = arith.constant 0 : index
    %c0_229 = arith.constant 0 : index
    %474 = vector.load %arg10[%c0_228, %c0_229] : memref<8x1xf32, #tpu.memory_space<vmem>>, vector<8x1xf32>
    %475 = vector.broadcast %474 : vector<8x1xf32> to vector<8x118xf32>
    %476 = arith.addf %473, %475 : vector<8x118xf32>
    %cst_230 = arith.constant 0.000000e+00 : f32
    %477 = vector.broadcast %cst_230 : f32 to vector<8x118xf32>
    %478 = arith.maximumf %476, %477 : vector<8x118xf32>
    %479 = arith.truncf %478 : vector<8x118xf32> to vector<8x118xbf16>
    %480 = vector.shape_cast %27 : vector<16x58xbf16> to vector<16x1x58xbf16>
    %481 = vector.shape_cast %55 : vector<16x58xbf16> to vector<16x1x58xbf16>
    %482 = vector.shape_cast %83 : vector<16x58xbf16> to vector<16x1x58xbf16>
    %483 = vector.shape_cast %111 : vector<16x58xbf16> to vector<16x1x58xbf16>
    %484 = vector.shape_cast %139 : vector<16x58xbf16> to vector<16x1x58xbf16>
    %485 = vector.shape_cast %167 : vector<16x58xbf16> to vector<16x1x58xbf16>
    %486 = vector.shape_cast %195 : vector<16x58xbf16> to vector<16x1x58xbf16>
    %487 = vector.shape_cast %223 : vector<16x58xbf16> to vector<16x1x58xbf16>
    %488 = tpu.concatenate %480, %481, %482, %483, %484, %485, %486, %487 in 1 : vector<16x1x58xbf16>, vector<16x1x58xbf16>, vector<16x1x58xbf16>, vector<16x1x58xbf16>, vector<16x1x58xbf16>, vector<16x1x58xbf16>, vector<16x1x58xbf16>, vector<16x1x58xbf16> -> vector<16x8x58xbf16>
    %489 = vector.shape_cast %255 : vector<8x118xbf16> to vector<8x1x118xbf16>
    %490 = vector.shape_cast %287 : vector<8x118xbf16> to vector<8x1x118xbf16>
    %491 = vector.shape_cast %319 : vector<8x118xbf16> to vector<8x1x118xbf16>
    %492 = vector.shape_cast %351 : vector<8x118xbf16> to vector<8x1x118xbf16>
    %493 = vector.shape_cast %383 : vector<8x118xbf16> to vector<8x1x118xbf16>
    %494 = vector.shape_cast %415 : vector<8x118xbf16> to vector<8x1x118xbf16>
    %495 = vector.shape_cast %447 : vector<8x118xbf16> to vector<8x1x118xbf16>
    %496 = vector.shape_cast %479 : vector<8x118xbf16> to vector<8x1x118xbf16>
    %497 = tpu.concatenate %489, %490, %491, %492, %493, %494, %495, %496 in 1 : vector<8x1x118xbf16>, vector<8x1x118xbf16>, vector<8x1x118xbf16>, vector<8x1x118xbf16>, vector<8x1x118xbf16>, vector<8x1x118xbf16>, vector<8x1x118xbf16>, vector<8x1x118xbf16> -> vector<8x8x118xbf16>
    %c0_231 = arith.constant 0 : index
    %c0_232 = arith.constant 0 : index
    %c0_233 = arith.constant 0 : index
    %498 = vector.load %arg11[%c0_231, %c0_232, %c0_233] : memref<16x58x32xbf16, #tpu.memory_space<vmem>>, vector<16x58x32xbf16>
    "tpu.trace_start"() <{level = 10 : i32, message = "ctl,clf->ctf"}> : () -> ()
    %cst_234 = arith.constant dense<0.000000e+00> : vector<16x8x32xf32>
    %499 = tpu.matmul %488, %498, %cst_234 {dimension_numbers = #tpu.dot_dimension_numbers<[2], [1], [1], [2], [0, 0, 0, 1, 1, 2], [0], [0]>} : vector<16x8x58xbf16>, vector<16x58x32xbf16>, vector<16x8x32xf32> -> vector<16x8x32xf32>
    "tpu.trace_stop"() : () -> ()
    %cst_235 = arith.constant dense<0.000000e+00> : vector<8x32xf32>
    %500 = vector.multi_reduction <add>, %499, %cst_235 [0] : vector<16x8x32xf32> to vector<8x32xf32>
    %c0_236 = arith.constant 0 : index
    %c0_237 = arith.constant 0 : index
    %c0_238 = arith.constant 0 : index
    %501 = vector.load %arg12[%c0_236, %c0_237, %c0_238] : memref<8x118x32xbf16, #tpu.memory_space<vmem>>, vector<8x118x32xbf16>
    "tpu.trace_start"() <{level = 10 : i32, message = "ctl,clf->ctf"}> : () -> ()
    %cst_239 = arith.constant dense<0.000000e+00> : vector<8x8x32xf32>
    %502 = tpu.matmul %497, %501, %cst_239 {dimension_numbers = #tpu.dot_dimension_numbers<[2], [1], [1], [2], [0, 0, 0, 1, 1, 2], [0], [0]>} : vector<8x8x118xbf16>, vector<8x118x32xbf16>, vector<8x8x32xf32> -> vector<8x8x32xf32>
    "tpu.trace_stop"() : () -> ()
    %cst_240 = arith.constant dense<0.000000e+00> : vector<8x32xf32>
    %503 = vector.multi_reduction <add>, %502, %cst_240 [0] : vector<8x8x32xf32> to vector<8x32xf32>
    %504 = arith.addf %500, %503 : vector<8x32xf32>
    %c0_241 = arith.constant 0 : index
    %c0_242 = arith.constant 0 : index
    %505 = vector.load %arg13[%c0_241, %c0_242] : memref<1x32xf32, #tpu.memory_space<vmem>>, vector<1x32xf32>
    %506 = vector.broadcast %505 : vector<1x32xf32> to vector<8x32xf32>
    %507 = arith.addf %504, %506 : vector<8x32xf32>
    %cst_243 = arith.constant 0.000000e+00 : f32
    %508 = vector.broadcast %cst_243 : f32 to vector<8x32xf32>
    %509 = arith.maximumf %507, %508 : vector<8x32xf32>
    %510 = arith.truncf %509 : vector<8x32xf32> to vector<8x32xbf16>
    %c0_244 = arith.constant 0 : index
    %c0_245 = arith.constant 0 : index
    %511 = vector.load %arg14[%c0_244, %c0_245] : memref<32x1xbf16, #tpu.memory_space<vmem>>, vector<32x1xbf16>
    %cst_246 = arith.constant dense<0.000000e+00> : vector<8x1xf32>
    %512 = tpu.matmul %510, %511, %cst_246 {dimension_numbers = #tpu.dot_dimension_numbers<[1], [0], [0], [1], [0, 0, 1, 1], [], []>} : vector<8x32xbf16>, vector<32x1xbf16>, vector<8x1xf32> -> vector<8x1xf32>
    %c0_247 = arith.constant 0 : index
    %c0_248 = arith.constant 0 : index
    %513 = vector.load %arg15[%c0_247, %c0_248] : memref<1x1xf32, #tpu.memory_space<vmem>>, vector<1x1xf32>
    %514 = vector.broadcast %513 : vector<1x1xf32> to vector<8x1xf32>
    %515 = arith.addf %512, %514 : vector<8x1xf32>
    %c0_249 = arith.constant 0 : index
    %c0_250 = arith.constant 0 : index
    %516 = vector.load %arg16[%c0_249, %c0_250] : memref<8x1xf32, #tpu.memory_space<vmem>>, vector<8x1xf32>
    tpu.vector_store %arg16[%c0_249, %c0_250], %515 {strides = array<i32>} : memref<8x1xf32, #tpu.memory_space<vmem>>, vector<8x1xf32>,
    return
  }
  func.func @transform_0(%arg0: i32) -> (i32, i32, i32) {
    %c0_i32 = arith.constant 0 : i32
    %c0_i32_0 = arith.constant 0 : i32
    %c0_i32_1 = arith.constant 0 : i32
    return %arg0, %c0_i32, %c0_i32_0 : i32, i32, i32
  }
  func.func @transform_1(%arg0: i32) -> (i32, i32, i32) {
    %c0_i32 = arith.constant 0 : i32
    %c0_i32_0 = arith.constant 0 : i32
    %c0_i32_1 = arith.constant 0 : i32
    return %arg0, %c0_i32, %c0_i32_0 : i32, i32, i32
  }
  func.func @transform_2(%arg0: i32) -> (i32, i32) {
    %c0_i32 = arith.constant 0 : i32
    %c0_i32_0 = arith.constant 0 : i32
    %c0_i32_1 = arith.constant 0 : i32
    return %c0_i32, %c0_i32_0 : i32, i32
  }
  func.func @transform_3(%arg0: i32) -> (i32, i32) {
    %c0_i32 = arith.constant 0 : i32
    %c0_i32_0 = arith.constant 0 : i32
    %c0_i32_1 = arith.constant 0 : i32
    return %c0_i32, %c0_i32_0 : i32, i32
  }
  func.func @transform_4(%arg0: i32) -> (i32, i32) {
    %c0_i32 = arith.constant 0 : i32
    %c0_i32_0 = arith.constant 0 : i32
    %c0_i32_1 = arith.constant 0 : i32
    return %c0_i32, %c0_i32_0 : i32, i32
  }
  func.func @transform_5(%arg0: i32) -> (i32, i32) {
    %c0_i32 = arith.constant 0 : i32
    %c0_i32_0 = arith.constant 0 : i32
    %c0_i32_1 = arith.constant 0 : i32
    return %c0_i32, %c0_i32_0 : i32, i32
  }
  func.func @transform_6(%arg0: i32) -> (i32, i32) {
    %c0_i32 = arith.constant 0 : i32
    %c0_i32_0 = arith.constant 0 : i32
    %c0_i32_1 = arith.constant 0 : i32
    return %c0_i32, %c0_i32_0 : i32, i32
  }
  func.func @transform_7(%arg0: i32) -> (i32, i32) {
    %c0_i32 = arith.constant 0 : i32
    %c0_i32_0 = arith.constant 0 : i32
    %c0_i32_1 = arith.constant 0 : i32
    return %c0_i32, %c0_i32_0 : i32, i32
  }
  func.func @transform_8(%arg0: i32) -> (i32, i32) {
    %c0_i32 = arith.constant 0 : i32
    %c0_i32_0 = arith.constant 0 : i32
    %c0_i32_1 = arith.constant 0 : i32
    return %c0_i32, %c0_i32_0 : i32, i32
  }
  func.func @transform_9(%arg0: i32) -> (i32, i32) {
    %c0_i32 = arith.constant 0 : i32
    %c0_i32_0 = arith.constant 0 : i32
    %c0_i32_1 = arith.constant 0 : i32
    return %c0_i32, %c0_i32_0 : i32, i32
  }
  func.func @transform_10(%arg0: i32) -> (i32, i32, i32) {
    %c0_i32 = arith.constant 0 : i32
    %c0_i32_0 = arith.constant 0 : i32
    %c0_i32_1 = arith.constant 0 : i32
    %c0_i32_2 = arith.constant 0 : i32
    return %c0_i32, %c0_i32_0, %c0_i32_1 : i32, i32, i32
  }
  func.func @transform_11(%arg0: i32) -> (i32, i32, i32) {
    %c0_i32 = arith.constant 0 : i32
    %c0_i32_0 = arith.constant 0 : i32
    %c0_i32_1 = arith.constant 0 : i32
    %c0_i32_2 = arith.constant 0 : i32
    return %c0_i32, %c0_i32_0, %c0_i32_1 : i32, i32, i32
  }
  func.func @transform_12(%arg0: i32) -> (i32, i32) {
    %c0_i32 = arith.constant 0 : i32
    %c0_i32_0 = arith.constant 0 : i32
    %c0_i32_1 = arith.constant 0 : i32
    return %c0_i32, %c0_i32_0 : i32, i32
  }
  func.func @transform_13(%arg0: i32) -> (i32, i32) {
    %c0_i32 = arith.constant 0 : i32
    %c0_i32_0 = arith.constant 0 : i32
    %c0_i32_1 = arith.constant 0 : i32
    return %c0_i32, %c0_i32_0 : i32, i32
  }
  func.func @transform_14(%arg0: i32) -> (i32, i32) {
    %c0_i32 = arith.constant 0 : i32
    %c0_i32_0 = arith.constant 0 : i32
    %c0_i32_1 = arith.constant 0 : i32
    return %c0_i32, %c0_i32_0 : i32, i32
  }
  func.func @transform_15(%arg0: i32) -> (i32, i32) {
    %c0_i32 = arith.constant 0 : i32
    %c0_i32_0 = arith.constant 0 : i32
    return %arg0, %c0_i32 : i32, i32
  }
}

</mosaic_0001>

<bundles_post_ra>
// kernel: fwd.1
= control target key start
LH: loop header
LB: loop body
LE: loop exit
PB: predicated region body
PF: predicated region fallthrough
CT: control target
= control target key end

     0   :  { %s9303_s20 = smov 0   ;;  %s11934_s0 = inlined_call_operand.vmem [shape: bf16[16,12,64], index: 0, kind: input, shape index: {}]   ;;  %s11935_s1 = inlined_call_operand.vmem [shape: bf16[16,1,128], index: 1, kind: input, shape index: {}]   ;;  %s11936_s2 = inlined_call_operand.vmem [shape: bf16[8,60], index: 2, kind: input, shape index: {}]   ;;  %s11937_s3 = inlined_call_operand.vmem [shape: f32[8,1], index: 3, kind: input, shape index: {}]   ;;  %s11938_s4 = inlined_call_operand.vmem [shape: bf16[16,24], index: 4, kind: input, shape index: {}]   ;;  %s11939_s5 = inlined_call_operand.vmem [shape: f32[16,1], index: 5, kind: input, shape index: {}]   ;;  %s11940_s6 = inlined_call_operand.vmem [shape: bf16[4,7], index: 6, kind: input, shape index: {}]   ;;  %s11941_s7 = inlined_call_operand.vmem [shape: f32[4,1], index: 7, kind: input, shape index: {}]   ;;  %s11942_s8 = inlined_call_operand.vmem [shape: bf16[8,20], index: 8, kind: input, shape index: {}]   ;;  %s11943_s9 = inlined_call_operand.vmem [shape: f32[8,1], index: 9, kind: input, shape index: {}]   ;;  %s11944_s10 = inlined_call_operand.vmem [shape: bf16[16,58,32], index: 10, kind: input, shape index: {}]   ;;  %s11945_s11 = inlined_call_operand.vmem [shape: bf16[8,118,32], index: 11, kind: input, shape index: {}]   ;;  %s11946_s12 = inlined_call_operand.vmem [shape: f32[1,32], index: 12, kind: input, shape index: {}]   ;;  %s11947_s13 = inlined_call_operand.vmem [shape: bf16[32,1], index: 13, kind: input, shape index: {}]   ;;  %s11948_s14 = inlined_call_operand.<no memory space> [shape: f32[1,1], index: 14, kind: input, shape index: {}]   ;;  %s11949_s15 = inlined_call_operand.vmem [shape: f32[16,1], index: 15, kind: output, shape index: {}]  }
   0x1   :  { %v20_v0 = vstv %s11948_s14 }
   0x2   :  { %21 = vst [vmem:[#allocation2] sm:$0x1] %v20_v0 }
   0x3 LB: > { %s9309_s21 = sadd.s32 4294967295, %s9207_s20   ;;  %p7732_p0 = scmp.ge.s32.totalorder %s9207_s20, 1  ;;  %s9207_s20 = sphi %s9303_s20, %s27_s20  }
   0x4   : > { %p451_p1 = scmp.lt.s32.totalorder %s9207_s20, 3 }
   0x6   : > { %p452_p2 = pnand %p7732_p0, %p451_p1 }
   0x8   : > { %455 = sbr.rel (%p452_p2) target bundleno = 3944 (0xf68), region = 80 }
   0xd   : > { %s7733_s22 = sshll.u32 %s9309_s21, 3  ;;  %v11950_v1 = vmov 0.0   ;;  %s9210_s26 = smov 124   ;;  %vm9211_vm0 = vmmov 0   ;;  %v9214_v9 = vmov 0   ;;  %v556_v10 = vld [vmem:[%s11937_s3] sm:$0xff] }
   0xe   : > { %p504_p3 = scmp.lt.s32.totalorder %s7733_s22, 15  ;;  %8339 = vmatprep.subr.bf16.mxu0 %v11950_v1  ;;  %8351 = vmatprep.subr.bf16.mxu1 %v11950_v1  ;;  %s9212_s27 = smov 125   ;;  %vm541_vm1 = vcmask 1045504   ;;  %vm550_vm2 = vcmask 1041408   ;;  %vm546_vm3 = vcmask 1043456   ;;  %vm562_vm4 = vcmask 490496  }
   0xf   : > { %8347 = vmatprep.mubr.msk.bf16.mxu0 %vm9211_vm0, %v11950_v1  ;;  %8355 = vmatprep.mubr.msk.bf16.mxu1 %vm9211_vm0, %v11950_v1  ;;  %s9213_s28 = smov 126   ;;  %s9215_s16 = smov 127   ;;  %v9348_v20 = vld [vmem:[%s11936_s2] sm:$0xf]  ;;  %vm640_vm5 = vcmask 195584   ;;  %vm1703_vm6 = vcmask 1040384  }
  0x10   : > { %s11980_s22 = smov (!%p504_p3, %s7733_s22), 15  ;;  %8990 = vset.pattern.permute.xlu1 %v9214_v9  ;;  %9036 = vset.pattern.permute.xlu0 %v9214_v9  ;;  %v9373_v42 = vld [vmem:[%s11938_s4] sm:$0xff]   ;;  %s9218_s29 = smov 122   ;;  %vm1704_vm7 = vsmask.f32 256  ;;  %vm1720_vm11 = vcmask 1042432  }
  0x11   : > { %s8079_s14 = sshll.u32 %s11980_s22, 3  ;;  %vm9757_vm8 = vmand %vm1703_vm6, %vm1704_vm7  ;;  %vm1713_vm9 = vsmask.f32 1280  ;;  %vm1721_vm12 = vsmask.f32 2304  ;;  %vm1735_vm14 = vcmask 56320  }
  0x12   : > { %s9322_s25 = scalar_lea.vmem %s11934_s0, %s8079_s14  ;;  %vm9766_vm10 = vmand %vm550_vm2, %vm1713_vm9  ;;  %vm5612_vm15 = vcmask 1044480   ;;  %vm6691_vm9 = vcmask 261120   ;;  %p515_p4 = scmp.lt.s32.totalorder %s9309_s21, 1 }
  0x13   : > { %v520_v2 = vld [vmem:[%s9322_s25] sm:$0xf]  ;;  %v521_v3 = vld [vmem:[%s9322_s25 + $0x4] sm:$0x3]  ;;  %v7744_v27 = vld [vmem:[%s9322_s25 + $0x8] sm:$0xf] }
  0x14   : > { %v7738_v4 = vcombine.low %v520_v2, %v521_v3  ;;  %v7740_v5 = vcombine.low %v521_v3, %v521_v3  ;;  %v7739_v8 = vcombine.low %v520_v2, %v520_v2  ;;  %v7745_v28 = vld [vmem:[%s9322_s25 + $0xc] sm:$0x3]  ;;  %v7747_v36 = vcombine.low %v7744_v27, %v7744_v27  ;;  %v7751_v60 = vld [vmem:[%s9322_s25 + $0x10] sm:$0xf]  ;;  %v7752_v61 = vld [vmem:[%s9322_s25 + $0x14] sm:$0x3] }
  0x15   : > { %v7746_v32 = vcombine.low %v7744_v27, %v7745_v28  ;;  %v7748_v33 = vcombine.low %v7745_v28, %v7745_v28  ;;  %v7753_v2 = vcombine.low %v7751_v60, %v7752_v61  ;;  %v7755_v3 = vcombine.low %v7752_v61, %v7752_v61  ;;  %vm9774_vm13 = vmand %vm1720_vm11, %vm1721_vm12  ;;  %s11982_s21 = smov (!%p515_p4, %s9309_s21), 1 }
  0x16   : > { %539 = vrot.lane.b32.xlu0 %v7738_v4, %s9210_s26  ;;  %v536_v6 = vrot.slane %v7738_v4, 6  ;;  %v527_v7 = vrot.slane %v7738_v4, 2 }
  0x17   : > { %v708_v34 = vrot.slane %v7746_v32, 6  ;;  %v699_v35 = vrot.slane %v7746_v32, 2 }
  0x18   : > { %537 = vrot.lane.b32.xlu1 %v536_v6, %s9212_s27  ;;  %v7754_v6 = vcombine.low %v7751_v60, %v7751_v60 }
  0x1a   : > { %534 = vrot.lane.b32.xlu0 %v7740_v5, %s9213_s28  ;;  %v834_v5 = vrot.slane %v7753_v2, 2 }
  0x1c   : > { %528 = vrot.lane.b32.xlu1 %v527_v7, %s9215_s16 }
  0x1e   : > { %532 = vrot.lane.b32.xlu0 %v7739_v8, %s9213_s28 }
  0x20   : > { %559 = vperm.xlu1 %8990, %v556_v10  }
  0x88   : > { %v540_v11 = vpop.permute.xlu0 %539 }
  0x89   : > { %v567_v12 = vsel %vm541_vm1, %v540_v11, 0 }
  0x8a   : > { %8340 = vmatpush3.bf16.msra.mxu0 %v567_v12  ;;  %v538_v13 = vpop.permute.xlu1 %537 }
  0x8b   : > { %8341 = vmatprep.subr.bf16.mxu0 %v11950_v1 }
  0x8c   : > { %v535_v14 = vpop.permute.xlu0 %534 }
  0x8d   : > { %v553_v15 = vsel %vm550_vm2, %v535_v14, %v538_v13 }
  0x8e   : > { %8342 = vmatpush3.bf16.msra.mxu0 %v553_v15  ;;  %v529_v16 = vpop.permute.xlu1 %528 }
  0x8f   : > { %8343 = vmatprep.subr.bf16.mxu0 %v11950_v1  ;;  %v544_v19 = vsel %vm541_vm1, %v7738_v4, %v529_v16  ;;  %v843_v4 = vrot.slane %v7753_v2, 6 }
  0x90   : > { %v533_v17 = vpop.permute.xlu0 %532 }
  0x91   : > { %v548_v18 = vsel %vm546_vm3, %v529_v16, %v533_v17 }
  0x92   : > { %8344 = vmatpush3.bf16.msra.mxu0 %v548_v18 }
  0x93   : > { %8345 = vmatprep.subr.bf16.mxu0 %v11950_v1 }
  0x96   : > { %8346 = vmatpush3.bf16.msra.mxu0 %v544_v19 }
  0x97   : > { %8371 = vmatprep.subr.bf16.mxu0 %v11950_v1 }
  0x99   : > { %8348 = vmatmul.mubr.msk.bf16.vlgmr.msra.gmra.mxu0 %vm562_vm4, %v9348_v20 }
  0x9a   : > { %8375 = vmatprep.mubr.msk.bf16.mxu0 %vm9211_vm0, %v11950_v1 }
  0x9b   : > { %v9355_v21 = vpop.permute.xlu1 %559 }
 0x159   : > { %v603_v22 = vpop.f32.mrf.mxu0 }
 0x15a   : > { %v604_v23 = vadd.f32 %v603_v22, %v9355_v21 }
 0x15b   : > { %v8349_v24 = vpop.f32.mrf.mxu0 }
 0x15c   : > { %v609_v25 = vmax.f32 %v604_v23, 0.0 }
 0x15d   : > { %v606_v26 = vpop.f32.mrf.mxu0 }
 0x15e   : > { %v610_v29 = vpack.c.bf16 %v609_v25, %v609_v25 }
 0x15f   : > { %v8350_v30 = vpop.f32.mrf.mxu0 }
 0x160   : > { %615 = vrot.lane.b32.xlu0 %v610_v29, %s9213_s28  ;;  %v612_v31 = vrot.slane %v610_v29, 4 }
 0x162   : > { %613 = vrot.lane.b32.xlu1 %v612_v31, %s9215_s16  ;;  %v7758_v31 = vld [vmem:[%s9322_s25 + $0x18] sm:$0xf] }
 0x164   : > { %711 = vrot.lane.b32.xlu0 %v7746_v32, %s9210_s26 }
 0x166   : > { %706 = vrot.lane.b32.xlu1 %v7748_v33, %s9213_s28 }
 0x168   : > { %709 = vrot.lane.b32.xlu0 %v708_v34, %s9212_s27 }
 0x16a   : > { %700 = vrot.lane.b32.xlu1 %v699_v35, %s9215_s16 }
 0x16c   : > { %704 = vrot.lane.b32.xlu0 %v7747_v36, %s9213_s28 }
 0x1d2   : > { %v616_v37 = vpop.permute.xlu0 %615 }
 0x1d3   : > { %v645_v38 = vsel %vm546_vm3, %v616_v37, 0 }
 0x1d4   : > { %8352 = vmatpush3.bf16.msra.mxu1 %v645_v38  ;;  %v614_v39 = vpop.permute.xlu1 %613 }
 0x1d5   : > { %8353 = vmatprep.subr.bf16.mxu1 %v11950_v1  ;;  %v619_v41 = vsel %vm546_vm3, %v610_v29, %v614_v39 }
 0x1d6   : > { %v712_v40 = vpop.permute.xlu0 %711 }
 0x1d7   : > { %v725_v44 = vsel %vm541_vm1, %v712_v40, 0  ;;  %v7761_v40 = vcombine.low %v7758_v31, %v7758_v31 }
 0x1d8   : > { %8354 = vmatpush3.bf16.msra.mxu1 %v619_v41  ;;  %v707_v43 = vpop.permute.xlu1 %706 }
 0x1d9   : > { %8359 = vmatprep.subr.bf16.mxu1 %v11950_v1 }
 0x1da   : > { %v710_v45 = vpop.permute.xlu0 %709 }
 0x1db   : > { %8356 = vmatmul.mubr.msk.bf16.vlgmr.msra.gmra.mxu1 %vm640_vm5, %v9373_v42  ;;  %v722_v46 = vsel %vm550_vm2, %v707_v43, %v710_v45 }
 0x1dc   : > { %8360 = vmatpush3.bf16.msra.mxu1 %v725_v44  ;;  %8367 = vmatprep.mubr.msk.bf16.mxu1 %vm9211_vm0, %v11950_v1  ;;  %v701_v48 = vpop.permute.xlu1 %700 }
 0x1dd   : > { %8361 = vmatprep.subr.bf16.mxu1 %v11950_v1  ;;  %v715_v50 = vsel %vm541_vm1, %v7746_v32, %v701_v48  ;;  %v7759_v32 = vld [vmem:[%s9322_s25 + $0x1c] sm:$0x3] }
 0x1de   : > { %v705_v47 = vpop.permute.xlu0 %704  ;;  %v7760_v36 = vcombine.low %v7758_v31, %v7759_v32  ;;  %v7762_v37 = vcombine.low %v7759_v32, %v7759_v32 }
 0x1df   : > { %v718_v49 = vsel %vm546_vm3, %v701_v48, %v705_v47 }
 0x1e0   : > { %8362 = vmatpush3.bf16.msra.mxu1 %v722_v46  ;;  %v978_v38 = vrot.slane %v7760_v36, 6  ;;  %v969_v39 = vrot.slane %v7760_v36, 2 }
 0x1e1   : > { %8363 = vmatprep.subr.bf16.mxu1 %v11950_v1 }
 0x1e4   : > { %8364 = vmatpush3.bf16.msra.mxu1 %v718_v49 }
 0x1e5   : > { %8365 = vmatprep.subr.bf16.mxu1 %v11950_v1 }
 0x1e8   : > { %8366 = vmatpush3.bf16.msra.mxu1 %v715_v50 }
 0x1e9   : > { %8391 = vmatprep.subr.bf16.mxu1 %v11950_v1 }
 0x1eb   : > { %8368 = vmatmul.mubr.msk.bf16.vlgmr.msra.gmra.mxu1 %vm562_vm4, %v9348_v20 }
 0x1ec   : > { %8395 = vmatprep.mubr.msk.bf16.mxu1 %vm9211_vm0, %v11950_v1 }
 0x29b   : > { %v9392_v51 = vpop.f32.mrf.mxu1 }
 0x29d   : > { %v8357_v52 = vpop.f32.mrf.mxu1 }
 0x29f   : > { %v9394_v53 = vpop.f32.mrf.mxu1 }
 0x2a1   : > { %v8358_v54 = vpop.f32.mrf.mxu1 }
 0x2ab   : > { %v761_v55 = vpop.f32.mrf.mxu1 }
 0x2ac   : > { %v762_v56 = vadd.f32 %v761_v55, %v9355_v21 }
 0x2ad   : > { %v8369_v57 = vpop.f32.mrf.mxu1 }
 0x2ae   : > { %v767_v58 = vmax.f32 %v762_v56, 0.0 }
 0x2af   : > { %v764_v59 = vpop.f32.mrf.mxu1 }
 0x2b0   : > { %v768_v62 = vpack.c.bf16 %v767_v58, %v767_v58 }
 0x2b1   : > { %v8370_v63 = vpop.f32.mrf.mxu1 }
 0x2b2   : > { %773 = vrot.lane.b32.xlu1 %v768_v62, %s9213_s28  ;;  %v770_v0 = vrot.slane %v768_v62, 4 }
 0x2b4   : > { %771 = vrot.lane.b32.xlu0 %v770_v0, %s9215_s16 }
 0x2b6   : > { %846 = vrot.lane.b32.xlu1 %v7753_v2, %s9210_s26 }
 0x2b8   : > { %841 = vrot.lane.b32.xlu0 %v7755_v3, %s9213_s28  ;;  %v7765_v3 = vld [vmem:[%s9322_s25 + $0x20] sm:$0xf] }
 0x2ba   : > { %844 = vrot.lane.b32.xlu1 %v843_v4, %s9212_s27  ;;  %v7766_v4 = vld [vmem:[%s9322_s25 + $0x24] sm:$0x3] }
 0x2bc   : > { %835 = vrot.lane.b32.xlu0 %v834_v5, %s9215_s16 }
 0x2be   : > { %839 = vrot.lane.b32.xlu1 %v7754_v6, %s9213_s28 }
 0x324   : > { %v774_v7 = vpop.permute.xlu1 %773 }
 0x325   : > { %v780_v8 = vsel %vm546_vm3, %v774_v7, 0 }
 0x326   : > { %8372 = vmatpush3.bf16.msra.mxu0 %v780_v8  ;;  %v772_v9 = vpop.permute.xlu0 %771  ;;  %v7767_v8 = vcombine.low %v7765_v3, %v7766_v4 }
 0x327   : > { %8373 = vmatprep.subr.bf16.mxu0 %v11950_v1  ;;  %v777_v11 = vsel %vm546_vm3, %v768_v62, %v772_v9  ;;  %v7769_v9 = vcombine.low %v7766_v4, %v7766_v4 }
 0x328   : > { %v847_v10 = vpop.permute.xlu1 %846 }
 0x329   : > { %v860_v13 = vsel %vm541_vm1, %v847_v10, 0  ;;  %v1113_v10 = vrot.slane %v7767_v8, 6 }
 0x32a   : > { %8374 = vmatpush3.bf16.msra.mxu0 %v777_v11  ;;  %v842_v12 = vpop.permute.xlu0 %841  ;;  %v1104_v11 = vrot.slane %v7767_v8, 2 }
 0x32b   : > { %8379 = vmatprep.subr.bf16.mxu0 %v11950_v1 }
 0x32c   : > { %v845_v14 = vpop.permute.xlu1 %844 }
 0x32d   : > { %8376 = vmatmul.mubr.msk.bf16.vlgmr.msra.gmra.mxu0 %vm640_vm5, %v9373_v42  ;;  %v857_v15 = vsel %vm550_vm2, %v842_v12, %v845_v14  ;;  %v7768_v12 = vcombine.low %v7765_v3, %v7765_v3 }
 0x32e   : > { %8380 = vmatpush3.bf16.msra.mxu0 %v860_v13  ;;  %8387 = vmatprep.mubr.msk.bf16.mxu0 %vm9211_vm0, %v11950_v1  ;;  %v836_v17 = vpop.permute.xlu0 %835 }
 0x32f   : > { %8381 = vmatprep.subr.bf16.mxu0 %v11950_v1  ;;  %v850_v19 = vsel %vm541_vm1, %v7753_v2, %v836_v17 }
 0x330   : > { %v840_v16 = vpop.permute.xlu1 %839 }
 0x331   : > { %v853_v18 = vsel %vm546_vm3, %v836_v17, %v840_v16 }
 0x332   : > { %8382 = vmatpush3.bf16.msra.mxu0 %v857_v15 }
 0x333   : > { %8383 = vmatprep.subr.bf16.mxu0 %v11950_v1 }
 0x336   : > { %8384 = vmatpush3.bf16.msra.mxu0 %v853_v18 }
 0x337   : > { %8385 = vmatprep.subr.bf16.mxu0 %v11950_v1 }
 0x33a   : > { %8386 = vmatpush3.bf16.msra.mxu0 %v850_v19 }
 0x33b   : > { %8411 = vmatprep.subr.bf16.mxu0 %v11950_v1 }
 0x33d   : > { %8388 = vmatmul.mubr.msk.bf16.vlgmr.msra.gmra.mxu0 %vm562_vm4, %v9348_v20 }
 0x33e   : > { %8415 = vmatprep.mubr.msk.bf16.mxu0 %vm9211_vm0, %v11950_v1 }
 0x3ed   : > { %v9426_v22 = vpop.f32.mrf.mxu0 }
 0x3ef   : > { %v8377_v23 = vpop.f32.mrf.mxu0 }
 0x3f1   : > { %v9428_v24 = vpop.f32.mrf.mxu0 }
 0x3f3   : > { %v8378_v25 = vpop.f32.mrf.mxu0 }
 0x3fd   : > { %v896_v26 = vpop.f32.mrf.mxu0 }
 0x3fe   : > { %v897_v27 = vadd.f32 %v896_v26, %v9355_v21 }
 0x3ff   : > { %v8389_v28 = vpop.f32.mrf.mxu0 }
 0x400   : > { %v902_v29 = vmax.f32 %v897_v27, 0.0 }
 0x401   : > { %v899_v30 = vpop.f32.mrf.mxu0 }
 0x402   : > { %v903_v33 = vpack.c.bf16 %v902_v29, %v902_v29 }
 0x403   : > { %v8390_v34 = vpop.f32.mrf.mxu0 }
 0x404   : > { %908 = vrot.lane.b32.xlu0 %v903_v33, %s9213_s28  ;;  %v905_v35 = vrot.slane %v903_v33, 4 }
 0x406   : > { %906 = vrot.lane.b32.xlu1 %v905_v35, %s9215_s16 }
 0x408   : > { %981 = vrot.lane.b32.xlu0 %v7760_v36, %s9210_s26 }
 0x40a   : > { %976 = vrot.lane.b32.xlu1 %v7762_v37, %s9213_s28 }
 0x40c   : > { %979 = vrot.lane.b32.xlu0 %v978_v38, %s9212_s27 }
 0x40e   : > { %970 = vrot.lane.b32.xlu1 %v969_v39, %s9215_s16  ;;  %v7772_v39 = vld [vmem:[%s9322_s25 + $0x28] sm:$0xf] }
 0x410   : > { %974 = vrot.lane.b32.xlu0 %v7761_v40, %s9213_s28  ;;  %v7773_v40 = vld [vmem:[%s9322_s25 + $0x2c] sm:$0x3] }
 0x476   : > { %v909_v41 = vpop.permute.xlu0 %908 }
 0x477   : > { %v915_v43 = vsel %vm546_vm3, %v909_v41, 0 }
 0x478   : > { %8392 = vmatpush3.bf16.msra.mxu1 %v915_v43  ;;  %v907_v44 = vpop.permute.xlu1 %906 }
 0x479   : > { %8393 = vmatprep.subr.bf16.mxu1 %v11950_v1  ;;  %v912_v46 = vsel %vm546_vm3, %v903_v33, %v907_v44 }
 0x47a   : > { %v982_v45 = vpop.permute.xlu0 %981 }
 0x47b   : > { %v995_v48 = vsel %vm541_vm1, %v982_v45, 0  ;;  %v7774_v45 = vcombine.low %v7772_v39, %v7773_v40 }
 0x47c   : > { %8394 = vmatpush3.bf16.msra.mxu1 %v912_v46  ;;  %v977_v47 = vpop.permute.xlu1 %976  ;;  %v7776_v46 = vcombine.low %v7773_v40, %v7773_v40 }
 0x47d   : > { %8399 = vmatprep.subr.bf16.mxu1 %v11950_v1 }
 0x47e   : > { %v980_v49 = vpop.permute.xlu0 %979 }
 0x47f   : > { %8396 = vmatmul.mubr.msk.bf16.vlgmr.msra.gmra.mxu1 %vm640_vm5, %v9373_v42  ;;  %v992_v50 = vsel %vm550_vm2, %v977_v47, %v980_v49  ;;  %v1248_v47 = vrot.slane %v7774_v45, 6  ;;  %v7775_v49 = vcombine.low %v7772_v39, %v7772_v39 }
 0x480   : > { %8400 = vmatpush3.bf16.msra.mxu1 %v995_v48  ;;  %8407 = vmatprep.mubr.msk.bf16.mxu1 %vm9211_vm0, %v11950_v1  ;;  %v971_v54 = vpop.permute.xlu1 %970  ;;  %v1239_v48 = vrot.slane %v7774_v45, 2 }
 0x481   : > { %8401 = vmatprep.subr.bf16.mxu1 %v11950_v1  ;;  %v985_v56 = vsel %vm541_vm1, %v7760_v36, %v971_v54 }
 0x482   : > { %v975_v52 = vpop.permute.xlu0 %974 }
 0x483   : > { %v988_v55 = vsel %vm546_vm3, %v971_v54, %v975_v52 }
 0x484   : > { %8402 = vmatpush3.bf16.msra.mxu1 %v992_v50 }
 0x485   : > { %8403 = vmatprep.subr.bf16.mxu1 %v11950_v1 }
 0x488   : > { %8404 = vmatpush3.bf16.msra.mxu1 %v988_v55 }
 0x489   : > { %8405 = vmatprep.subr.bf16.mxu1 %v11950_v1 }
 0x48c   : > { %8406 = vmatpush3.bf16.msra.mxu1 %v985_v56 }
 0x48d   : > { %8431 = vmatprep.subr.bf16.mxu1 %v11950_v1 }
 0x48f   : > { %8408 = vmatmul.mubr.msk.bf16.vlgmr.msra.gmra.mxu1 %vm562_vm4, %v9348_v20 }
 0x490   : > { %8435 = vmatprep.mubr.msk.bf16.mxu1 %vm9211_vm0, %v11950_v1 }
 0x53f   : > { %v9460_v57 = vpop.f32.mrf.mxu1 }
 0x541   : > { %v8397_v58 = vpop.f32.mrf.mxu1 }
 0x543   : > { %v9462_v59 = vpop.f32.mrf.mxu1 }
 0x545   : > { %v8398_v60 = vpop.f32.mrf.mxu1 }
 0x54f   : > { %v1031_v61 = vpop.f32.mrf.mxu1 }
 0x550   : > { %v1032_v62 = vadd.f32 %v1031_v61, %v9355_v21 }
 0x551   : > { %v8409_v63 = vpop.f32.mrf.mxu1 }
 0x552   : > { %v1037_v0 = vmax.f32 %v1032_v62, 0.0 }
 0x553   : > { %v1034_v2 = vpop.f32.mrf.mxu1 }
 0x554   : > { %v1038_v5 = vpack.c.bf16 %v1037_v0, %v1037_v0 }
 0x555   : > { %v8410_v6 = vpop.f32.mrf.mxu1 }
 0x556   : > { %1043 = vrot.lane.b32.xlu1 %v1038_v5, %s9213_s28  ;;  %v1040_v7 = vrot.slane %v1038_v5, 4 }
 0x558   : > { %1041 = vrot.lane.b32.xlu0 %v1040_v7, %s9215_s16 }
 0x55a   : > { %1116 = vrot.lane.b32.xlu1 %v7767_v8, %s9210_s26 }
 0x55c   : > { %1111 = vrot.lane.b32.xlu0 %v7769_v9, %s9213_s28 }
 0x55e   : > { %1114 = vrot.lane.b32.xlu1 %v1113_v10, %s9212_s27 }
 0x560   : > { %1105 = vrot.lane.b32.xlu0 %v1104_v11, %s9215_s16 }
 0x562   : > { %1109 = vrot.lane.b32.xlu1 %v7768_v12, %s9213_s28 }
 0x5c8   : > { %v1044_v13 = vpop.permute.xlu1 %1043 }
 0x5c9   : > { %v1050_v14 = vsel %vm546_vm3, %v1044_v13, 0  ;;  %v7779_v13 = vld [vmem:[%s9322_s25 + $0x30] sm:$0xf] }
 0x5ca   : > { %8412 = vmatpush3.bf16.msra.mxu0 %v1050_v14  ;;  %v1042_v15 = vpop.permute.xlu0 %1041  ;;  %v7780_v14 = vld [vmem:[%s9322_s25 + $0x34] sm:$0x3] }
 0x5cb   : > { %8413 = vmatprep.subr.bf16.mxu0 %v11950_v1  ;;  %v1047_v17 = vsel %vm546_vm3, %v1038_v5, %v1042_v15 }
 0x5cc   : > { %v1117_v16 = vpop.permute.xlu1 %1116 }
 0x5cd   : > { %v1130_v19 = vsel %vm541_vm1, %v1117_v16, 0 }
 0x5ce   : > { %8414 = vmatpush3.bf16.msra.mxu0 %v1047_v17  ;;  %v1112_v18 = vpop.permute.xlu0 %1111 }
 0x5cf   : > { %8419 = vmatprep.subr.bf16.mxu0 %v11950_v1 }
 0x5d0   : > { %v1115_v23 = vpop.permute.xlu1 %1114 }
 0x5d1   : > { %8416 = vmatmul.mubr.msk.bf16.vlgmr.msra.gmra.mxu0 %vm640_vm5, %v9373_v42  ;;  %v1127_v25 = vsel %vm550_vm2, %v1112_v18, %v1115_v23  ;;  %v7781_v18 = vcombine.low %v7779_v13, %v7780_v14 }
 0x5d2   : > { %8420 = vmatpush3.bf16.msra.mxu0 %v1130_v19  ;;  %8427 = vmatprep.mubr.msk.bf16.mxu0 %vm9211_vm0, %v11950_v1  ;;  %v1106_v27 = vpop.permute.xlu0 %1105  ;;  %v7783_v19 = vcombine.low %v7780_v14, %v7780_v14 }
 0x5d3   : > { %8421 = vmatprep.subr.bf16.mxu0 %v11950_v1  ;;  %v1120_v29 = vsel %vm541_vm1, %v7767_v8, %v1106_v27  ;;  %v1383_v23 = vrot.slane %v7781_v18, 6 }
 0x5d4   : > { %v1110_v26 = vpop.permute.xlu1 %1109 }
 0x5d5   : > { %v1123_v28 = vsel %vm546_vm3, %v1106_v27, %v1110_v26  ;;  %v7782_v26 = vcombine.low %v7779_v13, %v7779_v13 }
 0x5d6   : > { %8422 = vmatpush3.bf16.msra.mxu0 %v1127_v25  ;;  %v1374_v25 = vrot.slane %v7781_v18, 2 }
 0x5d7   : > { %8423 = vmatprep.subr.bf16.mxu0 %v11950_v1 }
 0x5da   : > { %8424 = vmatpush3.bf16.msra.mxu0 %v1123_v28 }
 0x5db   : > { %8425 = vmatprep.subr.bf16.mxu0 %v11950_v1 }
 0x5de   : > { %8426 = vmatpush3.bf16.msra.mxu0 %v1120_v29 }
 0x5df   : > { %8451 = vmatprep.subr.bf16.mxu0 %v11950_v1 }
 0x5e1   : > { %8428 = vmatmul.mubr.msk.bf16.vlgmr.msra.gmra.mxu0 %vm562_vm4, %v9348_v20 }
 0x5e2   : > { %8455 = vmatprep.mubr.msk.bf16.mxu0 %vm9211_vm0, %v11950_v1 }
 0x691   : > { %v9494_v30 = vpop.f32.mrf.mxu0 }
 0x693   : > { %v8417_v31 = vpop.f32.mrf.mxu0 }
 0x695   : > { %v9496_v32 = vpop.f32.mrf.mxu0 }
 0x697   : > { %v8418_v33 = vpop.f32.mrf.mxu0 }
 0x6a1   : > { %v1166_v34 = vpop.f32.mrf.mxu0 }
 0x6a2   : > { %v1167_v35 = vadd.f32 %v1166_v34, %v9355_v21 }
 0x6a3   : > { %v8429_v36 = vpop.f32.mrf.mxu0 }
 0x6a4   : > { %v1172_v37 = vmax.f32 %v1167_v35, 0.0 }
 0x6a5   : > { %v1169_v38 = vpop.f32.mrf.mxu0 }
 0x6a6   : > { %v1173_v41 = vpack.c.bf16 %v1172_v37, %v1172_v37 }
 0x6a7   : > { %v8430_v43 = vpop.f32.mrf.mxu0 }
 0x6a8   : > { %1178 = vrot.lane.b32.xlu0 %v1173_v41, %s9213_s28  ;;  %v1175_v44 = vrot.slane %v1173_v41, 4 }
 0x6aa   : > { %1176 = vrot.lane.b32.xlu1 %v1175_v44, %s9215_s16 }
 0x6ac   : > { %1251 = vrot.lane.b32.xlu0 %v7774_v45, %s9210_s26 }
 0x6ae   : > { %1246 = vrot.lane.b32.xlu1 %v7776_v46, %s9213_s28 }
 0x6b0   : > { %1249 = vrot.lane.b32.xlu0 %v1248_v47, %s9212_s27 }
 0x6b2   : > { %1240 = vrot.lane.b32.xlu1 %v1239_v48, %s9215_s16 }
 0x6b4   : > { %1244 = vrot.lane.b32.xlu0 %v7775_v49, %s9213_s28 }
 0x71a   : > { %v1179_v50 = vpop.permute.xlu0 %1178 }
 0x71b   : > { %v1185_v52 = vsel %vm546_vm3, %v1179_v50, 0 }
 0x71c   : > { %8432 = vmatpush3.bf16.msra.mxu1 %v1185_v52  ;;  %v1177_v54 = vpop.permute.xlu1 %1176 }
 0x71d   : > { %8433 = vmatprep.subr.bf16.mxu1 %v11950_v1  ;;  %v1182_v56 = vsel %vm546_vm3, %v1173_v41, %v1177_v54  ;;  %v7786_v54 = vld [vmem:[%s9322_s25 + $0x38] sm:$0xf] }
 0x71e   : > { %v1252_v55 = vpop.permute.xlu0 %1251 }
 0x71f   : > { %v1265_v60 = vsel %vm541_vm1, %v1252_v55, 0  ;;  %v7787_v55 = vld [vmem:[%s9322_s25 + $0x3c] sm:$0x3]  ;;  %s9602_s25 = scalar_lea.vmem %s11935_s1, %s11980_s22  ;;  %s9217_s22 = smov 123  }
 0x720   : > { %8434 = vmatpush3.bf16.msra.mxu1 %v1182_v56  ;;  %v1247_v58 = vpop.permute.xlu1 %1246 }
 0x721   : > { %8439 = vmatprep.subr.bf16.mxu1 %v11950_v1 }
 0x722   : > { %v1250_v61 = vpop.permute.xlu0 %1249 }
 0x723   : > { %8436 = vmatmul.mubr.msk.bf16.vlgmr.msra.gmra.mxu1 %vm640_vm5, %v9373_v42  ;;  %v1262_v62 = vsel %vm550_vm2, %v1247_v58, %v1250_v61  ;;  %v7788_v61 = vcombine.low %v7786_v54, %v7787_v55 }
 0x724   : > { %8440 = vmatpush3.bf16.msra.mxu1 %v1265_v60  ;;  %8447 = vmatprep.mubr.msk.bf16.mxu1 %vm9211_vm0, %v11950_v1  ;;  %v1241_v0 = vpop.permute.xlu1 %1240 }
 0x725   : > { %8441 = vmatprep.subr.bf16.mxu1 %v11950_v1  ;;  %v1255_v3 = vsel %vm541_vm1, %v7774_v45, %v1241_v0 }
 0x726   : > { %v1245_v63 = vpop.permute.xlu0 %1244 }
 0x727   : > { %v1258_v2 = vsel %vm546_vm3, %v1241_v0, %v1245_v63  ;;  %v1518_v63 = vrot.slane %v7788_v61, 6  ;;  %v1509_v0 = vrot.slane %v7788_v61, 2 }
 0x728   : > { %8442 = vmatpush3.bf16.msra.mxu1 %v1262_v62  ;;  %v7790_v62 = vcombine.low %v7787_v55, %v7787_v55 }
 0x729   : > { %8443 = vmatprep.subr.bf16.mxu1 %v11950_v1 }
 0x72c   : > { %8444 = vmatpush3.bf16.msra.mxu1 %v1258_v2  ;;  %v7789_v2 = vcombine.low %v7786_v54, %v7786_v54 }
 0x72d   : > { %8445 = vmatprep.subr.bf16.mxu1 %v11950_v1 }
 0x730   : > { %8446 = vmatpush3.bf16.msra.mxu1 %v1255_v3 }
 0x731   : > { %8471 = vmatprep.subr.bf16.mxu1 %v11950_v1 }
 0x733   : > { %8448 = vmatmul.mubr.msk.bf16.vlgmr.msra.gmra.mxu1 %vm562_vm4, %v9348_v20 }
 0x734   : > { %8475 = vmatprep.mubr.msk.bf16.mxu1 %vm9211_vm0, %v11950_v1 }
 0x7e3   : > { %v9528_v4 = vpop.f32.mrf.mxu1 }
 0x7e5   : > { %v8437_v5 = vpop.f32.mrf.mxu1 }
 0x7e7   : > { %v9530_v6 = vpop.f32.mrf.mxu1 }
 0x7e9   : > { %v8438_v7 = vpop.f32.mrf.mxu1 }
 0x7f3   : > { %v1301_v8 = vpop.f32.mrf.mxu1 }
 0x7f4   : > { %v1302_v9 = vadd.f32 %v1301_v8, %v9355_v21 }
 0x7f5   : > { %v8449_v10 = vpop.f32.mrf.mxu1 }
 0x7f6   : > { %v1307_v11 = vmax.f32 %v1302_v9, 0.0 }
 0x7f7   : > { %v1304_v12 = vpop.f32.mrf.mxu1 }
 0x7f8   : > { %v1308_v15 = vpack.c.bf16 %v1307_v11, %v1307_v11 }
 0x7f9   : > { %v8450_v16 = vpop.f32.mrf.mxu1 }
 0x7fa   : > { %1313 = vrot.lane.b32.xlu1 %v1308_v15, %s9213_s28  ;;  %v1310_v17 = vrot.slane %v1308_v15, 4 }
 0x7fc   : > { %1311 = vrot.lane.b32.xlu0 %v1310_v17, %s9215_s16  ;;  %v9216_v17 = vmov 1966171168  }
 0x7fe   : > { %1386 = vrot.lane.b32.xlu1 %v7781_v18, %s9210_s26 }
 0x800   : > { %1381 = vrot.lane.b32.xlu0 %v7783_v19, %s9213_s28  ;;  %v1641_v19 = vlaneseq }
 0x802   : > { %1384 = vrot.lane.b32.xlu1 %v1383_v23, %s9212_s27 }
 0x804   : > { %1375 = vrot.lane.b32.xlu0 %v1374_v25, %s9215_s16  ;;  %v9596_v25 = vshrl.u32 %v1641_v19, 7 }
 0x806   : > { %1379 = vrot.lane.b32.xlu1 %v7782_v26, %s9213_s28 }
 0x86c   : > { %v1314_v27 = vpop.permute.xlu1 %1313 }
 0x86d   : > { %v1320_v28 = vsel %vm546_vm3, %v1314_v27, 0  ;;  %v9611_v27 = vld [vmem:[%s9602_s25 + $0x1] sm:$0x1] }
 0x86e   : > { %8452 = vmatpush3.bf16.msra.mxu0 %v1320_v28  ;;  %v1312_v29 = vpop.permute.xlu0 %1311 }
 0x86f   : > { %8453 = vmatprep.subr.bf16.mxu0 %v11950_v1  ;;  %v1317_v33 = vsel %vm546_vm3, %v1308_v15, %v1312_v29 }
 0x870   : > { %v1387_v31 = vpop.permute.xlu1 %1386 }
 0x871   : > { %v1400_v35 = vsel %vm541_vm1, %v1387_v31, 0 }
 0x872   : > { %8454 = vmatpush3.bf16.msra.mxu0 %v1317_v33  ;;  %v1382_v34 = vpop.permute.xlu0 %1381 }
 0x873   : > { %8459 = vmatprep.subr.bf16.mxu0 %v11950_v1 }
 0x874   : > { %v1385_v36 = vpop.permute.xlu1 %1384 }
 0x875   : > { %8456 = vmatmul.mubr.msk.bf16.vlgmr.msra.gmra.mxu0 %vm640_vm5, %v9373_v42  ;;  %v1397_v37 = vsel %vm550_vm2, %v1382_v34, %v1385_v36 }
 0x876   : > { %8460 = vmatpush3.bf16.msra.mxu0 %v1400_v35  ;;  %8467 = vmatprep.mubr.msk.bf16.mxu0 %vm9211_vm0, %v11950_v1  ;;  %v1376_v39 = vpop.permute.xlu0 %1375 }
 0x877   : > { %8461 = vmatprep.subr.bf16.mxu0 %v11950_v1  ;;  %v1390_v41 = vsel %vm541_vm1, %v7781_v18, %v1376_v39  ;;  %v1639_v18 = vunpack.c.l.s4 %v9216_v17 }
 0x878   : > { %v1380_v38 = vpop.permute.xlu1 %1379 }
 0x879   : > { %v1393_v40 = vsel %vm546_vm3, %v1376_v39, %v1380_v38  ;;  %v1640_v23 = vunpack.c.0.s8 %v1639_v18 }
 0x87a   : > { %8462 = vmatpush3.bf16.msra.mxu0 %v1397_v37 }
 0x87b   : > { %8463 = vmatprep.subr.bf16.mxu0 %v11950_v1  ;;  %v9605_v26 = vsub.s32 %v1640_v23, %v9596_v25 }
 0x87d   : > { %v1870_v29 = vrot.slane %v9611_v27, %v9605_v26 }
 0x87e   : > { %8464 = vmatpush3.bf16.msra.mxu0 %v1393_v40 }
 0x87f   : > { %8465 = vmatprep.subr.bf16.mxu0 %v11950_v1  ;;  %v1877_v33 = vrot.slane %v1870_v29, %v9605_v26 }
 0x881   : > { %v1879_v35 = vshll.u32 %v1877_v33, 16 }
 0x882   : > { %8466 = vmatpush3.bf16.msra.mxu0 %v1390_v41 }
 0x883   : > { %8491 = vmatprep.subr.bf16.mxu0 %v11950_v1  ;;  %v1901_v40 = vrot.slane %v1879_v35, 7 }
 0x885   : > { %8468 = vmatmul.mubr.msk.bf16.vlgmr.msra.gmra.mxu0 %vm562_vm4, %v9348_v20 }
 0x886   : > { %8495 = vmatprep.mubr.msk.bf16.mxu0 %vm9211_vm0, %v11950_v1 }
 0x935   : > { %v9562_v43 = vpop.f32.mrf.mxu0 }
 0x937   : > { %v8457_v44 = vpop.f32.mrf.mxu0 }
 0x939   : > { %v9564_v45 = vpop.f32.mrf.mxu0 }
 0x93b   : > { %v8458_v46 = vpop.f32.mrf.mxu0 }
 0x93c   : > { %v1915_v46 = vrot.slane %v1879_v35, 6 }
 0x945   : > { %v1436_v47 = vpop.f32.mrf.mxu0 }
 0x946   : > { %v1437_v48 = vadd.f32 %v1436_v47, %v9355_v21 }
 0x947   : > { %v8469_v49 = vpop.f32.mrf.mxu0 }
 0x948   : > { %v1442_v50 = vmax.f32 %v1437_v48, 0.0 }
 0x949   : > { %v1439_v52 = vpop.f32.mrf.mxu0 }
 0x94a   : > { %v1443_v56 = vpack.c.bf16 %v1442_v50, %v1442_v50 }
 0x94b   : > { %v8470_v58 = vpop.f32.mrf.mxu0 }
 0x94c   : > { %1448 = vrot.lane.b32.xlu0 %v1443_v56, %s9213_s28  ;;  %v1445_v60 = vrot.slane %v1443_v56, 4 }
 0x94e   : > { %1446 = vrot.lane.b32.xlu1 %v1445_v60, %s9215_s16 }
 0x950   : > { %1521 = vrot.lane.b32.xlu0 %v7788_v61, %s9210_s26 }
 0x952   : > { %1516 = vrot.lane.b32.xlu1 %v7790_v62, %s9213_s28  ;;  %v9639_v62 = vld [vmem:[%s9602_s25 + $0x3] sm:$0x1] }
 0x954   : > { %1519 = vrot.lane.b32.xlu0 %v1518_v63, %s9212_s27  ;;  %v1884_v63 = vcombine.low %v9611_v27, %v9611_v27 }
 0x956   : > { %1510 = vrot.lane.b32.xlu1 %v1509_v0, %s9215_s16 }
 0x958   : > { %1514 = vrot.lane.b32.xlu0 %v7789_v2, %s9213_s28 }
 0x9be   : > { %v1449_v3 = vpop.permute.xlu0 %1448 }
 0x9bf   : > { %v1455_v5 = vsel %vm546_vm3, %v1449_v3, 0 }
 0x9c0   : > { %8472 = vmatpush3.bf16.msra.mxu1 %v1455_v5  ;;  %v1447_v7 = vpop.permute.xlu1 %1446  ;;  %v2252_v5 = vrot.slane %v9639_v62, %v9605_v26 }
 0x9c1   : > { %8473 = vmatprep.subr.bf16.mxu1 %v11950_v1  ;;  %v1452_v9 = vsel %vm546_vm3, %v1443_v56, %v1447_v7 }
 0x9c2   : > { %v1522_v8 = vpop.permute.xlu0 %1521 }
 0x9c3   : > { %v1535_v11 = vsel %vm541_vm1, %v1522_v8, 0 }
 0x9c4   : > { %8474 = vmatpush3.bf16.msra.mxu1 %v1452_v9  ;;  %v1517_v10 = vpop.permute.xlu1 %1516  ;;  %v1891_v9 = vrot.slane %v1884_v63, %v9605_v26 }
 0x9c5   : > { %8479 = vmatprep.subr.bf16.mxu1 %v11950_v1 }
 0x9c6   : > { %v1520_v12 = vpop.permute.xlu0 %1519 }
 0x9c7   : > { %8476 = vmatmul.mubr.msk.bf16.vlgmr.msra.gmra.mxu1 %vm640_vm5, %v9373_v42  ;;  %v1532_v13 = vsel %vm550_vm2, %v1517_v10, %v1520_v12  ;;  %v1905_v12 = vcombine.low %v1870_v29, %v1870_v29 }
 0x9c8   : > { %8480 = vmatpush3.bf16.msra.mxu1 %v1535_v11  ;;  %8487 = vmatprep.mubr.msk.bf16.mxu1 %vm9211_vm0, %v11950_v1  ;;  %v1511_v15 = vpop.permute.xlu1 %1510 }
 0x9c9   : > { %8481 = vmatprep.subr.bf16.mxu1 %v11950_v1  ;;  %v1525_v42 = vsel %vm541_vm1, %v7788_v61, %v1511_v15  ;;  %v9636_v61 = vld [vmem:[%s9602_s25 + $0x2] sm:$0x1]  ;;  %v1912_v18 = vrot.slane %v1905_v12, %v9605_v26 }
 0x9ca   : > { %v1515_v14 = vpop.permute.xlu0 %1514  ;;  %v2061_v3 = vrot.slane %v9636_v61, %v9605_v26  ;;  %v2075_v17 = vcombine.low %v9636_v61, %v9636_v61 }
 0x9cb   : > { %v1528_v16 = vsel %vm546_vm3, %v1511_v15, %v1515_v14  ;;  %v2259_v14 = vrot.slane %v2252_v5, %v9605_v26 }
 0x9cc   : > { %8482 = vmatpush3.bf16.msra.mxu1 %v1532_v13  ;;  %v2068_v13 = vrot.slane %v2061_v3, %v9605_v26  ;;  %v2082_v29 = vrot.slane %v2075_v17, %v9605_v26 }
 0x9cd   : > { %8483 = vmatprep.subr.bf16.mxu1 %v11950_v1  ;;  %v2261_v23 = vshll.u32 %v2259_v14, 16 }
 0x9ce   : > { %v2070_v19 = vshll.u32 %v2068_v13, 16 }
 0x9d0   : > { %8484 = vmatpush3.bf16.msra.mxu1 %v1528_v16  ;;  %v1898_v16 = vrot.slane %v1891_v9, %v9605_v26  ;;  %v2092_v33 = vrot.slane %v2070_v19, 7 }
 0x9d1   : > { %8485 = vmatprep.subr.bf16.mxu1 %v11950_v1 }
 0x9d4   : > { %8486 = vmatpush3.bf16.msra.mxu1 %v1525_v42  ;;  %v1919_v42 = vcombine.low %v1891_v9, %v1891_v9 }
 0x9d5   : > { %8505 = vmatprep.subr.bf16.mxu1 %v11950_v1 }
 0x9d7   : > { %8488 = vmatmul.mubr.msk.bf16.vlgmr.msra.gmra.mxu1 %vm562_vm4, %v9348_v20  ;;  %v9608_v20 = vld [vmem:[%s9602_s25] sm:$0x1]  ;;  %vm1812_vm4 = vcmask 162816  }
 0x9d8   : > { %8509 = vmatprep.mubr.msk.bf16.mxu1 %vm9211_vm0, %v11950_v1  ;;  %v1644_v28 = vrot.slane %v9608_v20, %v9605_v26  ;;  %v1658_v36 = vcombine.low %v9608_v20, %v9608_v20 }
 0x9da   : > { %v1651_v31 = vrot.slane %v1644_v28, %v9605_v26  ;;  %v1665_v38 = vrot.slane %v1658_v36, %v9605_v26  ;;  %v1679_v41 = vcombine.low %v1644_v28, %v1644_v28  ;;  %v1926_v28 = vrot.slane %v1919_v42, %v9605_v26 }
 0x9db   : > { %v2096_v36 = vcombine.low %v2061_v3, %v2061_v3 }
 0x9dc   : > { %v1653_v34 = vshll.u32 %v1651_v31, 16  ;;  %v1672_v47 = vrot.slane %v1665_v38, %v9605_v26  ;;  %v1686_v49 = vrot.slane %v1679_v41, %v9605_v26  ;;  %v1693_v52 = vcombine.low %v1665_v38, %v1665_v38  ;;  %v9671_v38 = vld [vmem:[%s9602_s25 + $0x5] sm:$0x1] }
 0x9dd   : > { %v9006_v31 = vpack.i.bf16 %v2261_v23, %v2070_v19  ;;  %v2297_v41 = vrot.slane %v2261_v23, 6 }
 0x9de   : > { %v8991_v37 = vpack.i.bf16 %v1879_v35, %v1653_v34  ;;  %v1675_v39 = vrot.slane %v1653_v34, 7  ;;  %v1689_v44 = vrot.slane %v1653_v34, 6  ;;  %1673 = vrot.lane.b32.xlu0 %v1672_v47, %s9213_s28  ;;  %v1700_v54 = vrot.slane %v1693_v52, %v9605_v26 }
 0x9df   : > { %v2283_v34 = vrot.slane %v2261_v23, 7  ;;  %v2089_v35 = vrot.slane %v2082_v29, %v9605_v26  ;;  %v2110_v47 = vcombine.low %v2082_v29, %v2082_v29 }
 0x9e0   : > { %8992 = vrot.lane.b32.xlu1 %v8991_v37, %s9215_s16  ;;  %v8996_v48 = vpack.i.bf16 %v1901_v40, %v1675_v39  ;;  %v9001_v50 = vpack.i.bf16 %v1915_v46, %v1689_v44  ;;  %v9668_v37 = vld [vmem:[%s9602_s25 + $0x4] sm:$0x1]  ;;  %v2106_v40 = vrot.slane %v2070_v19, 6  ;;  %v2266_v44 = vcombine.low %v9639_v62, %v9639_v62 }
 0x9e1   : > { %v9011_v39 = vpack.i.bf16 %v2283_v34, %v2092_v33  ;;  %v2103_v46 = vrot.slane %v2096_v36, %v9605_v26  ;;  %v2457_v3 = vcombine.low %v9668_v37, %v9668_v37 }
 0x9e2   : > { %1687 = vrot.lane.b32.xlu0 %v1686_v49, %s9210_s26  ;;  %v2634_v49 = vrot.slane %v9671_v38, %v9605_v26  ;;  %v2273_v52 = vrot.slane %v2266_v44, %v9605_v26 }
 0x9e4   : > { %8997 = vrot.lane.b32.xlu1 %v8996_v48, %s9212_s27  ;;  %v2443_v48 = vrot.slane %v9668_v37, %v9605_v26  ;;  %v2641_v63 = vrot.slane %v2634_v49, %v9605_v26  ;;  %v2669_v34 = vcombine.low %v2634_v49, %v2634_v49  ;;  %v9726_v49 = vld [vmem:[%s9602_s25 + $0x7] sm:$0x1] }
 0x9e6   : > { %1701 = vrot.lane.b32.xlu0 %v1700_v54, %s9218_s29  ;;  %v2117_v54 = vrot.slane %v2110_v47, %v9605_v26  ;;  %v2643_v9 = vshll.u32 %v2641_v63, 16 }
 0x9e8   : > { %9002 = vrot.lane.b32.xlu1 %v9001_v50, %s9217_s22  ;;  %v9016_v50 = vpack.i.bf16 %v2297_v41, %v2106_v40  ;;  %v2665_v14 = vrot.slane %v2643_v9, 7  ;;  %v2679_v17 = vrot.slane %v2643_v9, 6  ;;  %v2676_v41 = vrot.slane %v2669_v34, %v9605_v26 }
 0xa87   : > { %v9631_v55 = vpop.f32.mrf.mxu1 }
 0xa89   : > { %v8477_v56 = vpop.f32.mrf.mxu1 }
 0xa8a   : > { %v2287_v56 = vcombine.low %v2252_v5, %v2252_v5 }
 0xa8b   : > { %v9633_v58 = vpop.f32.mrf.mxu1 }
 0xa8d   : > { %v8478_v60 = vpop.f32.mrf.mxu1 }
 0xa8e   : > { %v2450_v60 = vrot.slane %v2443_v48, %v9605_v26 }
 0xa97   : > { %v1571_v0 = vpop.f32.mrf.mxu1 }
 0xa98   : > { %v1572_v2 = vadd.f32 %v1571_v0, %v9355_v21  ;;  %v2280_v0 = vrot.slane %v2273_v52, %v9605_v26 }
 0xa99   : > { %v8489_v7 = vpop.f32.mrf.mxu1 }
 0xa9a   : > { %v1577_v8 = vmax.f32 %v1572_v2, 0.0  ;;  %v2301_v2 = vcombine.low %v2273_v52, %v2273_v52  ;;  %v2294_v7 = vrot.slane %v2287_v56, %v9605_v26  ;;  %v3016_v56 = vrot.slane %v9726_v49, %v9605_v26 }
 0xa9b   : > { %v1574_v10 = vpop.f32.mrf.mxu1 }
 0xa9c   : > { %v9649_v11 = vpack.c.bf16 %v1577_v8, %v1577_v8  ;;  %v2452_v8 = vshll.u32 %v2450_v60, 16  ;;  %v2308_v5 = vrot.slane %v2301_v2, %v9605_v26  ;;  %v2464_v10 = vrot.slane %v2457_v3, %v9605_v26 }
 0xa9d   : > { %v8490_v15 = vpop.f32.mrf.mxu1  ;;  %v3023_v3 = vrot.slane %v3016_v56, %v9605_v26 }
 0xa9e   : > { %1583 = vrot.lane.b32.xlu1 %v9649_v11, %s9213_s28  ;;  %v1580_v21 = vrot.slane %v9649_v11, 4  ;;  %v9021_v12 = vpack.i.bf16 %v2643_v9, %v2452_v8  ;;  %v2474_v13 = vrot.slane %v2452_v8, 7  ;;  %v2471_v15 = vrot.slane %v2464_v10, %v9605_v26 }
 0xa9f   : > { %v2488_v42 = vrot.slane %v2452_v8, 6  ;;  %v2492_v23 = vcombine.low %v2464_v10, %v2464_v10  ;;  %v3025_v9 = vshll.u32 %v3023_v3, 16  ;;  %v3051_v10 = vcombine.low %v3016_v56, %v3016_v56 }
 0xaa0   : > { %1581 = vrot.lane.b32.xlu0 %v1580_v21, %s9215_s16  ;;  %v2478_v21 = vcombine.low %v2443_v48, %v2443_v48 }
 0xaa1   : > { %v9031_v29 = vpack.i.bf16 %v2679_v17, %v2488_v42  ;;  %v2499_v33 = vrot.slane %v2492_v23, %v9605_v26  ;;  %v8993_v42 = vpop.permute.xlu1 %8992 }
 0xaa2   : > { %1899 = vrot.lane.b32.xlu1 %v1898_v16, %s9213_s28  ;;  %v9026_v16 = vpack.i.bf16 %v2665_v14, %v2474_v13  ;;  %v2485_v19 = vrot.slane %v2478_v21, %v9605_v26  ;;  %v3058_v13 = vrot.slane %v3051_v10, %v9605_v26  ;;  %v8994_v17 = vunpack.i.l.bf16 %v8993_v42 }
 0xaa4   : > { %1913 = vrot.lane.b32.xlu0 %v1912_v18, %s9210_s26  ;;  %v2648_v18 = vcombine.low %v9671_v38, %v9671_v38 }
 0xaa5   : > { %v8998_v23 = vpop.permute.xlu1 %8997 }
 0xaa6   : > { %1927 = vrot.lane.b32.xlu1 %v1926_v28, %s9218_s29  ;;  %v9706_v28 = vld [vmem:[%s9602_s25 + $0x6] sm:$0x1] }
 0xaa7   : > { %v2839_v40 = vcombine.low %v9706_v28, %v9706_v28 }
 0xaa8   : > { %9007 = vrot.lane.b32.xlu0 %v9006_v31, %s9215_s16  ;;  %v2655_v31 = vrot.slane %v2648_v18, %v9605_v26  ;;  %v1674_v18 = vpop.permute.xlu0 %1673 }
 0xaa9   : > { %v2846_v47 = vrot.slane %v2839_v40, %v9605_v26 }
 0xaaa   : > { %2090 = vrot.lane.b32.xlu1 %v2089_v35, %s9213_s28  ;;  %v2825_v35 = vrot.slane %v9706_v28, %v9605_v26  ;;  %v2662_v36 = vrot.slane %v2655_v31, %v9605_v26 }
 0xaab   : > { %v2874_v63 = vcombine.low %v2846_v47, %v2846_v47 }
 0xaac   : > { %9012 = vrot.lane.b32.xlu0 %v9011_v39, %s9212_s27  ;;  %v2683_v39 = vcombine.low %v2655_v31, %v2655_v31  ;;  %v2832_v44 = vrot.slane %v2825_v35, %v9605_v26  ;;  %v2860_v52 = vcombine.low %v2825_v35, %v2825_v35  ;;  %v8999_v31 = vunpack.i.l.bf16 %v8998_v23 }
 0xaae   : > { %2104 = vrot.lane.b32.xlu1 %v2103_v46, %s9210_s26  ;;  %v2690_v46 = vrot.slane %v2683_v39, %v9605_v26  ;;  %v2834_v48 = vshll.u32 %v2832_v44, 16  ;;  %v2867_v60 = vrot.slane %v2860_v52, %v9605_v26 }
 0xab0   : > { %9017 = vrot.lane.b32.xlu0 %v9016_v50, %s9217_s22  ;;  %v2853_v50 = vrot.slane %v2846_v47, %v9605_v26  ;;  %v2870_v2 = vrot.slane %v2834_v48, 6 }
 0xab2   : > { %2118 = vrot.lane.b32.xlu1 %v2117_v54, %s9218_s29  ;;  %v2856_v54 = vrot.slane %v2834_v48, 7 }
 0xab4   : > { %2281 = vrot.lane.b32.xlu0 %v2280_v0, %s9213_s28  ;;  %v3030_v0 = vcombine.low %v9726_v49, %v9726_v49 }
 0xab6   : > { %2295 = vrot.lane.b32.xlu1 %v2294_v7, %s9210_s26  ;;  %v2881_v7 = vrot.slane %v2874_v63, %v9605_v26  ;;  %v3037_v8 = vrot.slane %v3030_v0, %v9605_v26 }
 0xab8   : > { %2309 = vrot.lane.b32.xlu0 %v2308_v5, %s9218_s29  ;;  %v3044_v5 = vrot.slane %v3037_v8, %v9605_v26  ;;  %v3065_v14 = vcombine.low %v3037_v8, %v3037_v8 }
 0xaba   : > { %9022 = vrot.lane.b32.xlu1 %v9021_v12, %s9215_s16  ;;  %v3047_v12 = vrot.slane %v3025_v9, 7  ;;  %v3072_v21 = vrot.slane %v3065_v14, %v9605_v26  ;;  %v9200_v14 = vld [vmem:[%s11938_s4] sm:$0xff]  }
 0xabc   : > { %2472 = vrot.lane.b32.xlu0 %v2471_v15, %s9213_s28  ;;  %v3061_v15 = vrot.slane %v3025_v9, 6 }
 0xabe   : > { %9027 = vrot.lane.b32.xlu1 %v9026_v16, %s9212_s27  ;;  %v1729_v16 = vld [vmem:[%s11941_s7] sm:$0xf] }
 0xac0   : > { %2486 = vrot.lane.b32.xlu0 %v2485_v19, %s9210_s26 }
 0xac2   : > { %9032 = vrot.lane.b32.xlu1 %v9031_v29, %s9217_s22  ;;  %v1706_v29 = vsel %vm9757_vm8, %v9608_v20, %v8994_v17 }
 0xac3   : > { %v1710_v34 = vsel %vm1703_vm6, %v1706_v29, %v1674_v18 }
 0xac4   : > { %2500 = vrot.lane.b32.xlu0 %v2499_v33, %s9218_s29  ;;  %v1688_v33 = vpop.permute.xlu0 %1687  ;;  %v1715_v39 = vsel %vm9766_vm10, %v1710_v34, %v8999_v31 }
 0xac5   : > { %v1718_v20 = vsel %vm550_vm2, %v1715_v39, %v1688_v33 }
 0xac6   : > { %2663 = vrot.lane.b32.xlu1 %v2662_v36, %s9213_s28  ;;  %v9003_v36 = vpop.permute.xlu1 %9002 }
 0xac7   : > { %v9004_v40 = vunpack.i.l.bf16 %v9003_v36 }
 0xac8   : > { %2677 = vrot.lane.b32.xlu0 %v2676_v41, %s9210_s26  ;;  %v1702_v41 = vpop.permute.xlu0 %1701 }
 0xaca   : > { %2691 = vrot.lane.b32.xlu1 %v2690_v46, %s9218_s29  ;;  %v8995_v46 = vunpack.i.h.bf16 %v8993_v42 }
 0xacc   : > { %2836 = vrot.lane.b32.xlu0 %v2834_v48, %s9215_s16  ;;  %v1929_v63 = vsel %vm9757_vm8, %v9611_v27, %v8995_v46  ;;  %v9005_v27 = vunpack.i.h.bf16 %v9003_v36 }
 0xace   : > { %2854 = vrot.lane.b32.xlu1 %v2853_v50, %s9213_s28  ;;  %v9219_v50 = vmov 65535  }
 0xacf   : > { %v1739_v52 = vsel %vm1720_vm11, 4294967295, %v9219_v50 }
 0xad0   : > { %2857 = vrot.lane.b32.xlu0 %v2856_v54, %s9212_s27  ;;  %v1723_v54 = vsel %vm9774_vm13, %v1718_v20, %v9004_v40 }
 0xad1   : > { %v1727_v3 = vsel %vm1720_vm11, %v1723_v54, %v1702_v41 }
 0xad2   : > { %2868 = vrot.lane.b32.xlu1 %v2867_v60, %s9210_s26  ;;  %v9000_v60 = vunpack.i.h.bf16 %v8998_v23  ;;  %v9814_v23 = vld [vmem:[%s11940_s6] sm:$0x3] }
 0xad4   : > { %2871 = vrot.lane.b32.xlu0 %v2870_v2, %s9217_s22  ;;  %v9787_v2 = vsel %vm546_vm3, %v1739_v52, 0 }
 0xad6   : > { %2882 = vrot.lane.b32.xlu1 %v2881_v7, %s9218_s29 }
 0xad8   : > { %3027 = vrot.lane.b32.xlu0 %v3025_v9, %s9215_s16 }
 0xada   : > { %3045 = vrot.lane.b32.xlu1 %v3044_v5, %s9213_s28 }
 0xadc   : > { %3048 = vrot.lane.b32.xlu0 %v3047_v12, %s9212_s27  ;;  %v1741_v12 = vand.u32 %v9787_v2, %v1727_v3 }
 0xade   : > { %3059 = vrot.lane.b32.xlu1 %v3058_v13, %s9210_s26 }
 0xae0   : > { %3062 = vrot.lane.b32.xlu0 %v3061_v15, %s9217_s22 }
 0xae2   : > { %3073 = vrot.lane.b32.xlu1 %v3072_v21, %s9218_s29 }
 0xae4   : > { %1732 = vperm.xlu0 %9036, %v1729_v16  }
 0xb10   : > { %v1584_v47 = vpop.permute.xlu1 %1583 }
 0xb11   : > { %v1590_v48 = vsel %vm546_vm3, %v1584_v47, 0 }
 0xb12   : > { %8492 = vmatpush3.bf16.msra.mxu0 %v1590_v48  ;;  %v1582_v56 = vpop.permute.xlu0 %1581 }
 0xb13   : > { %8493 = vmatprep.subr.bf16.mxu0 %v11950_v1  ;;  %v1587_v7 = vsel %vm546_vm3, %v9649_v11, %v1582_v56 }
 0xb14   : > { %v1900_v0 = vpop.permute.xlu1 %1899 }
 0xb15   : > { %v1932_v8 = vsel %vm1703_vm6, %v1929_v63, %v1900_v0 }
 0xb16   : > { %8494 = vmatpush3.bf16.msra.mxu0 %v1587_v7  ;;  %v1934_v9 = vsel %vm9766_vm10, %v1932_v8, %v9000_v60  ;;  %v1914_v5 = vpop.permute.xlu0 %1913 }
 0xb17   : > { %v1937_v10 = vsel %vm550_vm2, %v1934_v9, %v1914_v5  ;;  %8499 = vmatprep.subr.bf16.mxu0 %v11950_v1 }
 0xb18   : > { %v1928_v13 = vpop.permute.xlu1 %1927  ;;  %v1939_v11 = vsel %vm9774_vm13, %v1937_v10, %v9005_v27 }
 0xb19   : > { %8496 = vmatmul.mubr.msk.bf16.vlgmr.msra.gmra.mxu0 %vm640_vm5, %v9200_v14  ;;  %v1942_v42 = vsel %vm1720_vm11, %v1939_v11, %v1928_v13  ;;  %vm5608_vm5 = vcmask 474112  }
 0xb1a   : > { %8500 = vmatpush3.bf16.msra.mxu0 %v1741_v12  ;;  %v9008_v15 = vpop.permute.xlu0 %9007  ;;  %8501 = vmatprep.mubr.msk.bf16.mxu0 %vm9211_vm0, %v11950_v1  ;;  %v1943_v31 = vand.u32 %v1942_v42, %v9787_v2 }
 0xb1b   : > { %v9009_v21 = vunpack.i.l.bf16 %v9008_v15  ;;  %8513 = vmatprep.subr.bf16.mxu0 %v11950_v1 }
 0xb1c   : > { %v2091_v16 = vpop.permute.xlu1 %2090 }
 0xb1d   : > { %v2120_v17 = vsel %vm9757_vm8, %v9636_v61, %v9009_v21  ;;  %v9010_v61 = vunpack.i.h.bf16 %v9008_v15 }
 0xb1e   : > { %v9013_v18 = vpop.permute.xlu0 %9012  ;;  %v2123_v33 = vsel %vm1703_vm6, %v2120_v17, %v2091_v16 }
 0xb1f   : > { %v9014_v29 = vunpack.i.l.bf16 %v9013_v18  ;;  %v9015_v47 = vunpack.i.h.bf16 %v9013_v18  ;;  %v2311_v52 = vsel %vm9757_vm8, %v9639_v62, %v9010_v61 }
 0xb20   : > { %v2105_v34 = vpop.permute.xlu1 %2104 }
 0xb21   : > { %v2125_v36 = vsel %vm9766_vm10, %v2123_v33, %v9014_v29  ;;  %8502 = vmatmul.mubr.msk.bf16.vlgmr.msra.gmra.mxu0 %vm1735_vm14, %v9814_v23 }
 0xb22   : > { %8514 = vmatpush3.bf16.msra.mxu0 %v1943_v31  ;;  %v9018_v39 = vpop.permute.xlu0 %9017  ;;  %8515 = vmatprep.mubr.msk.bf16.mxu0 %vm9211_vm0, %v11950_v1  ;;  %v2128_v41 = vsel %vm550_vm2, %v2125_v36, %v2105_v34 }
 0xb23   : > { %v9019_v40 = vunpack.i.l.bf16 %v9018_v39  ;;  %8527 = vmatprep.subr.bf16.mxu0 %v11950_v1  ;;  %v9020_v60 = vunpack.i.h.bf16 %v9018_v39 }
 0xb24   : > { %v2119_v20 = vpop.permute.xlu1 %2118 }
 0xb25   : > { %v2130_v46 = vsel %vm9774_vm13, %v2128_v41, %v9019_v40 }
 0xb26   : > { %v2133_v48 = vsel %vm1720_vm11, %v2130_v46, %v2119_v20  ;;  %v2282_v50 = vpop.permute.xlu0 %2281 }
 0xb27   : > { %v2134_v54 = vand.u32 %v2133_v48, %v9787_v2  ;;  %v2314_v56 = vsel %vm1703_vm6, %v2311_v52, %v2282_v50 }
 0xb28   : > { %v2296_v63 = vpop.permute.xlu1 %2295  ;;  %v2316_v0 = vsel %vm9766_vm10, %v2314_v56, %v9015_v47 }
 0xb29   : > { %v2319_v3 = vsel %vm550_vm2, %v2316_v0, %v2296_v63  ;;  %8516 = vmatmul.mubr.msk.bf16.vlgmr.msra.gmra.mxu0 %vm1735_vm14, %v9814_v23 }
 0xb2a   : > { %8528 = vmatpush3.bf16.msra.mxu0 %v2134_v54  ;;  %v2310_v7 = vpop.permute.xlu0 %2309  ;;  %v2321_v8 = vsel %vm9774_vm13, %v2319_v3, %v9020_v60  ;;  %8529 = vmatprep.mubr.msk.bf16.mxu0 %vm9211_vm0, %v11950_v1 }
 0xb2b   : > { %8541 = vmatprep.subr.bf16.mxu0 %v11950_v1  ;;  %v2324_v9 = vsel %vm1720_vm11, %v2321_v8, %v2310_v7 }
 0xb2c   : > { %v9023_v62 = vpop.permute.xlu1 %9022  ;;  %v2325_v12 = vand.u32 %v2324_v9, %v9787_v2 }
 0xb2d   : > { %v9024_v5 = vunpack.i.l.bf16 %v9023_v62 }
 0xb2e   : > { %v2473_v10 = vpop.permute.xlu0 %2472 }
 0xb2f   : > { %v2502_v27 = vsel %vm9757_vm8, %v9668_v37, %v9024_v5  ;;  %v9025_v37 = vunpack.i.h.bf16 %v9023_v62 }
 0xb30   : > { %v9028_v13 = vpop.permute.xlu1 %9027  ;;  %v2505_v11 = vsel %vm1703_vm6, %v2502_v27, %v2473_v10 }
 0xb31   : > { %v9029_v14 = vunpack.i.l.bf16 %v9028_v13  ;;  %8530 = vmatmul.mubr.msk.bf16.vlgmr.msra.gmra.mxu0 %vm1735_vm14, %v9814_v23  ;;  %v9030_v31 = vunpack.i.h.bf16 %v9028_v13  ;;  %v2693_v36 = vsel %vm9757_vm8, %v9671_v38, %v9025_v37 }
 0xb32   : > { %8542 = vmatpush3.bf16.msra.mxu0 %v2325_v12  ;;  %v2487_v15 = vpop.permute.xlu0 %2486  ;;  %8543 = vmatprep.mubr.msk.bf16.mxu0 %vm9211_vm0, %v11950_v1 }
 0xb33   : > { %v2507_v21 = vsel %vm9766_vm10, %v2505_v11, %v9029_v14  ;;  %8555 = vmatprep.subr.bf16.mxu0 %v11950_v1 }
 0xb34   : > { %v9033_v16 = vpop.permute.xlu1 %9032  ;;  %v2510_v17 = vsel %vm550_vm2, %v2507_v21, %v2487_v15 }
 0xb35   : > { %v9034_v42 = vunpack.i.l.bf16 %v9033_v16  ;;  %v9035_v40 = vunpack.i.h.bf16 %v9033_v16 }
 0xb36   : > { %v2501_v18 = vpop.permute.xlu0 %2500 }
 0xb37   : > { %v2512_v29 = vsel %vm9774_vm13, %v2510_v17, %v9034_v42 }
 0xb38   : > { %v2515_v33 = vsel %vm1720_vm11, %v2512_v29, %v2501_v18  ;;  %v2664_v34 = vpop.permute.xlu1 %2663 }
 0xb39   : > { %v2516_v61 = vand.u32 %v2515_v33, %v9787_v2  ;;  %v2696_v39 = vsel %vm1703_vm6, %v2693_v36, %v2664_v34  ;;  %8544 = vmatmul.mubr.msk.bf16.vlgmr.msra.gmra.mxu0 %vm1735_vm14, %v9814_v23 }
 0xb3a   : > { %v2698_v41 = vsel %vm9766_vm10, %v2696_v39, %v9030_v31  ;;  %v2678_v20 = vpop.permute.xlu0 %2677  ;;  %8557 = vmatprep.mubr.msk.bf16.mxu0 %vm9211_vm0, %v11950_v1 }
 0xb3b   : > { %v2701_v46 = vsel %vm550_vm2, %v2698_v41, %v2678_v20  ;;  %8556 = vmatpush3.bf16.msra.mxu0 %v2516_v61 }
 0xb3c   : > { %v2692_v47 = vpop.permute.xlu1 %2691  ;;  %v2703_v38 = vsel %vm9774_vm13, %v2701_v46, %v9035_v40  ;;  %8569 = vmatprep.subr.bf16.mxu0 %v11950_v1 }
 0xb3d   : > { %v2706_v48 = vsel %vm1720_vm11, %v2703_v38, %v2692_v47 }
 0xb3e   : > { %v2707_v50 = vand.u32 %v2706_v48, %v9787_v2  ;;  %v2837_v52 = vpop.permute.xlu0 %2836 }
 0xb3f   : > { %v2884_v54 = vsel %vm9757_vm8, %v9706_v28, %v2837_v52 }
 0xb40   : > { %v2855_v56 = vpop.permute.xlu1 %2854 }
 0xb41   : > { %v2887_v60 = vsel %vm1703_vm6, %v2884_v54, %v2855_v56  ;;  %8558 = vmatmul.mubr.msk.bf16.vlgmr.msra.gmra.mxu0 %vm1735_vm14, %v9814_v23 }
 0xb42   : > { %8570 = vmatpush3.bf16.msra.mxu0 %v2707_v50  ;;  %v2858_v63 = vpop.permute.xlu0 %2857  ;;  %8571 = vmatprep.mubr.msk.bf16.mxu0 %vm9211_vm0, %v11950_v1 }
 0xb43   : > { %v2889_v0 = vsel %vm9766_vm10, %v2887_v60, %v2858_v63  ;;  %8583 = vmatprep.subr.bf16.mxu0 %v11950_v1 }
 0xb44   : > { %v2869_v3 = vpop.permute.xlu1 %2868 }
 0xb45   : > { %v2892_v7 = vsel %vm550_vm2, %v2889_v0, %v2869_v3 }
 0xb46   : > { %v2872_v28 = vpop.permute.xlu0 %2871 }
 0xb47   : > { %v2894_v8 = vsel %vm9774_vm13, %v2892_v7, %v2872_v28 }
 0xb48   : > { %v2883_v62 = vpop.permute.xlu1 %2882 }
 0xb49   : > { %v2897_v9 = vsel %vm1720_vm11, %v2894_v8, %v2883_v62  ;;  %8572 = vmatmul.mubr.msk.bf16.vlgmr.msra.gmra.mxu0 %vm1735_vm14, %v9814_v23 }
 0xb4a   : > { %v2898_v5 = vand.u32 %v2897_v9, %v9787_v2  ;;  %v3028_v10 = vpop.permute.xlu0 %3027  ;;  %8585 = vmatprep.mubr.msk.bf16.mxu0 %vm9211_vm0, %v11950_v1 }
 0xb4b   : > { %v3075_v27 = vsel %vm9757_vm8, %v9726_v49, %v3028_v10 }
 0xb4c   : > { %v3046_v12 = vpop.permute.xlu1 %3045  ;;  %8584 = vmatpush3.bf16.msra.mxu0 %v2898_v5 }
 0xb4d   : > { %v3078_v13 = vsel %vm1703_vm6, %v3075_v27, %v3046_v12  ;;  %8597 = vmatprep.subr.bf16.mxu0 %v11950_v1 }
 0xb4e   : > { %v3049_v14 = vpop.permute.xlu0 %3048 }
 0xb4f   : > { %v3080_v11 = vsel %vm9766_vm10, %v3078_v13, %v3049_v14 }
 0xb50   : > { %v3060_v15 = vpop.permute.xlu1 %3059 }
 0xb51   : > { %v3083_v21 = vsel %vm550_vm2, %v3080_v11, %v3060_v15  ;;  %8586 = vmatmul.mubr.msk.bf16.vlgmr.msra.gmra.mxu0 %vm1735_vm14, %v9814_v23 }
 0xb52   : > { %v3063_v37 = vpop.permute.xlu0 %3062  ;;  %8599 = vmatprep.mubr.msk.bf16.mxu0 %vm9211_vm0, %v11950_v1 }
 0xb53   : > { %v3085_v49 = vsel %vm9774_vm13, %v3083_v21, %v3063_v37 }
 0xb54   : > { %v3074_v16 = vpop.permute.xlu1 %3073 }
 0xb55   : > { %v3088_v42 = vsel %vm1720_vm11, %v3085_v49, %v3074_v16 }
 0xb56   : > { %v3089_v17 = vand.u32 %v3088_v42, %v9787_v2 }
 0xb58   : > { %8598 = vmatpush3.bf16.msra.mxu0 %v3089_v17 }
 0xb59   : > { %8611 = vmatprep.subr.bf16.mxu0 %v11950_v1 }
 0xb5b   : > { %8600 = vmatmul.mubr.msk.bf16.vlgmr.msra.gmra.mxu0 %vm1735_vm14, %v9814_v23 }
 0xb5c   : > { %8619 = vmatprep.mubr.msk.bf16.mxu0 %vm9211_vm0, %v11950_v1 }
 0xb5f   : > { %v9923_v34 = vpop.permute.xlu0 %1732 }
 0xbd9   : > { %v9919_v18 = vpop.f32.mrf.mxu0 }
 0xbdb   : > { %v8497_v29 = vpop.f32.mrf.mxu0 }
 0xbdd   : > { %v9921_v31 = vpop.f32.mrf.mxu0 }
 0xbdf   : > { %v8498_v33 = vpop.f32.mrf.mxu0 }
 0xbe1   : > { %v1777_v36 = vpop.f32.mrf.mxu0 }
 0xbe2   : > { %v1778_v2 = vadd.f32 %v1777_v36, %v9923_v34 }
 0xbe3   : > { %v8503_v61 = vpop.f32.mrf.mxu0 }
 0xbe4   : > { %v1783_v39 = vmax.f32 %v1778_v2, 0.0 }
 0xbe5   : > { %v1780_v40 = vpop.f32.mrf.mxu0 }
 0xbe6   : > { %v9926_v41 = vpack.c.bf16 %v1783_v39, %v1783_v39 }
 0xbe7   : > { %v8504_v23 = vpop.f32.mrf.mxu0 }
 0xbe8   : > { %1795 = vrot.lane.b32.xlu1 %v9926_v41, %s9210_s26  ;;  %v1789_v20 = vrot.slane %v9926_v41, 4  ;;  %v1786_v38 = vrot.slane %v9926_v41, 6  ;;  %v1792_v56 = vrot.slane %v9926_v41, 2 }
 0xbe9   : > { %v1979_v46 = vpop.f32.mrf.mxu0 }
 0xbea   : > { %v1980_v47 = vadd.f32 %v1979_v46, %v9923_v34  ;;  %1790 = vrot.lane.b32.xlu0 %v1789_v20, %s9213_s28 }
 0xbeb   : > { %v8517_v48 = vpop.f32.mrf.mxu0 }
 0xbec   : > { %v1985_v50 = vmax.f32 %v1980_v47, 0.0  ;;  %1787 = vrot.lane.b32.xlu1 %v1786_v38, %s9215_s16 }
 0xbed   : > { %v1982_v52 = vpop.f32.mrf.mxu0 }
 0xbee   : > { %v9935_v54 = vpack.c.bf16 %v1985_v50, %v1985_v50 }
 0xbef   : > { %v8518_v60 = vpop.f32.mrf.mxu0 }
 0xbf0   : > { %1997 = vrot.lane.b32.xlu0 %v9935_v54, %s9210_s26  ;;  %1793 = vrot.lane.b32.xlu1 %v1792_v56, %s9212_s27  ;;  %v1991_v3 = vrot.slane %v9935_v54, 4  ;;  %v1988_v7 = vrot.slane %v9935_v54, 6  ;;  %v1994_v5 = vrot.slane %v9935_v54, 2 }
 0xbf1   : > { %v2170_v63 = vpop.f32.mrf.mxu0 }
 0xbf2   : > { %v2171_v0 = vadd.f32 %v2170_v63, %v9923_v34 }
 0xbf3   : > { %v8531_v28 = vpop.f32.mrf.mxu0 }
 0xbf4   : > { %v2176_v8 = vmax.f32 %v2171_v0, 0.0  ;;  %1992 = vrot.lane.b32.xlu0 %v1991_v3, %s9213_s28  ;;  %1989 = vrot.lane.b32.xlu1 %v1988_v7, %s9215_s16 }
 0xbf5   : > { %v2173_v62 = vpop.f32.mrf.mxu0 }
 0xbf6   : > { %v9946_v9 = vpack.c.bf16 %v2176_v8, %v2176_v8 }
 0xbf7   : > { %v8532_v10 = vpop.f32.mrf.mxu0 }
 0xbf8   : > { %1995 = vrot.lane.b32.xlu1 %v1994_v5, %s9212_s27  ;;  %2188 = vrot.lane.b32.xlu0 %v9946_v9, %s9210_s26  ;;  %v2182_v13 = vrot.slane %v9946_v9, 4  ;;  %v2179_v14 = vrot.slane %v9946_v9, 6  ;;  %v2185_v49 = vrot.slane %v9946_v9, 2 }
 0xbf9   : > { %v2361_v27 = vpop.f32.mrf.mxu0 }
 0xbfa   : > { %v2362_v12 = vadd.f32 %v2361_v27, %v9923_v34 }
 0xbfb   : > { %v8545_v11 = vpop.f32.mrf.mxu0 }
 0xbfc   : > { %v2367_v15 = vmax.f32 %v2362_v12, 0.0  ;;  %2183 = vrot.lane.b32.xlu0 %v2182_v13, %s9213_s28  ;;  %2180 = vrot.lane.b32.xlu1 %v2179_v14, %s9215_s16 }
 0xbfd   : > { %v2364_v21 = vpop.f32.mrf.mxu0 }
 0xbfe   : > { %v9957_v37 = vpack.c.bf16 %v2367_v15, %v2367_v15 }
 0xbff   : > { %v8546_v16 = vpop.f32.mrf.mxu0 }
 0xc00   : > { %2186 = vrot.lane.b32.xlu1 %v2185_v49, %s9212_s27  ;;  %2379 = vrot.lane.b32.xlu0 %v9957_v37, %s9210_s26  ;;  %v2373_v29 = vrot.slane %v9957_v37, 4  ;;  %v2370_v33 = vrot.slane %v9957_v37, 6  ;;  %v2376_v40 = vrot.slane %v9957_v37, 2 }
 0xc01   : > { %v2552_v42 = vpop.f32.mrf.mxu0 }
 0xc02   : > { %v2553_v17 = vadd.f32 %v2552_v42, %v9923_v34 }
 0xc03   : > { %v8559_v36 = vpop.f32.mrf.mxu0 }
 0xc04   : > { %v2558_v2 = vmax.f32 %v2553_v17, 0.0  ;;  %2374 = vrot.lane.b32.xlu0 %v2373_v29, %s9213_s28  ;;  %2371 = vrot.lane.b32.xlu1 %v2370_v33, %s9215_s16 }
 0xc05   : > { %v2555_v61 = vpop.f32.mrf.mxu0 }
 0xc06   : > { %v9968_v39 = vpack.c.bf16 %v2558_v2, %v2558_v2  ;;  %v623_v2 = vld [vmem:[%s11939_s5] sm:$0xff]  ;;  %v624_v61 = vld [vmem:[%s11939_s5 + $0x8] sm:$0xff] }
 0xc07   : > { %v8560_v23 = vpop.f32.mrf.mxu0 }
 0xc08   : > { %2377 = vrot.lane.b32.xlu1 %v2376_v40, %s9212_s27  ;;  %2570 = vrot.lane.b32.xlu0 %v9968_v39, %s9210_s26  ;;  %v2564_v47 = vrot.slane %v9968_v39, 4  ;;  %v2561_v38 = vrot.slane %v9968_v39, 6  ;;  %v2567_v60 = vrot.slane %v9968_v39, 2  ;;  %v1806_v40 = vld [vmem:[%s11943_s9] sm:$0xff]  ;;  %v9070_v23 = vld [vmem:[%s11944_s10 + $0x18] sm:$0x1f]  }
 0xc09   : > { %v2743_v20 = vpop.f32.mrf.mxu0 }
 0xc0a   : > { %v2744_v46 = vadd.f32 %v2743_v20, %v9923_v34  ;;  %v5614_v20 = vsel %vm5612_vm15, %v9070_v23, 0 }
 0xc0b   : > { %v8573_v48 = vpop.f32.mrf.mxu0  ;;  %8612 = vmatpush3.bf16.msra.mxu0 %v5614_v20 }
 0xc0c   : > { %v2749_v50 = vmax.f32 %v2744_v46, 0.0  ;;  %2565 = vrot.lane.b32.xlu0 %v2564_v47, %s9213_s28  ;;  %2562 = vrot.lane.b32.xlu1 %v2561_v38, %s9215_s16  ;;  %v9072_v46 = vld [vmem:[%s11944_s10 + $0x10] sm:$0xff]   ;;  %v9074_v47 = vld [vmem:[%s11944_s10 + $0x8] sm:$0xff]  }
 0xc0d   : > { %v2746_v52 = vpop.f32.mrf.mxu0  ;;  %8613 = vmatprep.subr.bf16.mxu0 %v11950_v1  ;;  %v9076_v38 = vld [vmem:[%s11944_s10] sm:$0xff]  }
 0xc0e   : > { %v9979_v56 = vpack.c.bf16 %v2749_v50, %v2749_v50 }
 0xc0f   : > { %v8574_v63 = vpop.f32.mrf.mxu0  ;;  %8614 = vmatpush3.bf16.msra.mxu0 %v9072_v46 }
 0xc10   : > { %2568 = vrot.lane.b32.xlu1 %v2567_v60, %s9212_s27  ;;  %2761 = vrot.lane.b32.xlu0 %v9979_v56, %s9210_s26  ;;  %v2755_v7 = vrot.slane %v9979_v56, 4  ;;  %v2752_v28 = vrot.slane %v9979_v56, 6  ;;  %v2758_v27 = vrot.slane %v9979_v56, 2 }
 0xc11   : > { %v2934_v0 = vpop.f32.mrf.mxu0  ;;  %8615 = vmatprep.subr.bf16.mxu0 %v11950_v1 }
 0xc12   : > { %v2935_v3 = vadd.f32 %v2934_v0, %v9923_v34 }
 0xc13   : > { %v8587_v8 = vpop.f32.mrf.mxu0  ;;  %8616 = vmatpush3.bf16.msra.mxu0 %v9074_v47 }
 0xc14   : > { %v2940_v62 = vmax.f32 %v2935_v3, 0.0  ;;  %2756 = vrot.lane.b32.xlu0 %v2755_v7, %s9213_s28  ;;  %2753 = vrot.lane.b32.xlu1 %v2752_v28, %s9215_s16  ;;  %v10048_v8 = vld [vmem:[%s11942_s8] sm:$0xf] }
 0xc15   : > { %v2937_v5 = vpop.f32.mrf.mxu0  ;;  %8617 = vmatprep.subr.bf16.mxu0 %v11950_v1 }
 0xc16   : > { %v9990_v10 = vpack.c.bf16 %v2940_v62, %v2940_v62 }
 0xc17   : > { %v8588_v12 = vpop.f32.mrf.mxu0  ;;  %8618 = vmatpush3.bf16.msra.mxu0 %v9076_v38 }
 0xc18   : > { %2759 = vrot.lane.b32.xlu1 %v2758_v27, %s9212_s27  ;;  %2952 = vrot.lane.b32.xlu0 %v9990_v10, %s9210_s26  ;;  %v2946_v13 = vrot.slane %v9990_v10, 4  ;;  %v2943_v14 = vrot.slane %v9990_v10, 6  ;;  %v2949_v16 = vrot.slane %v9990_v10, 2 }
 0xc19   : > { %8635 = vmatprep.subr.bf16.mxu0 %v11950_v1 }
 0xc1b   : > { %v3125_v11 = vpop.f32.mrf.mxu0 }
 0xc1c   : > { %v3126_v15 = vadd.f32 %v3125_v11, %v9923_v34  ;;  %2947 = vrot.lane.b32.xlu0 %v2946_v13, %s9213_s28  ;;  %2944 = vrot.lane.b32.xlu1 %v2943_v14, %s9215_s16 }
 0xc1d   : > { %v8601_v21 = vpop.f32.mrf.mxu0 }
 0xc1e   : > { %v3131_v49 = vmax.f32 %v3126_v15, 0.0 }
 0xc1f   : > { %v3128_v42 = vpop.f32.mrf.mxu0 }
 0xc20   : > { %v10002_v17 = vpack.c.bf16 %v3131_v49, %v3131_v49  ;;  %2950 = vrot.lane.b32.xlu1 %v2949_v16, %s9212_s27 }
 0xc21   : > { %v8602_v29 = vpop.f32.mrf.mxu0 }
 0xc22   : > { %3143 = vrot.lane.b32.xlu0 %v10002_v17, %s9210_s26  ;;  %v3134_v33 = vrot.slane %v10002_v17, 6  ;;  %v3137_v34 = vrot.slane %v10002_v17, 4  ;;  %v3140_v36 = vrot.slane %v10002_v17, 2  ;;  %s7737_s26 = sshll.u32 %s11982_s21, 3 }
 0xc24   : > { %3135 = vrot.lane.b32.xlu1 %v3134_v33, %s9215_s16  ;;  %s518_s16 = scalar_lea.vmem %s11949_s15, %s7737_s26 }
 0xc26   : > { %3138 = vrot.lane.b32.xlu0 %v3137_v34, %s9213_s28 }
 0xc28   : > { %3141 = vrot.lane.b32.xlu1 %v3140_v36, %s9212_s27 }
 0xc2a   : > { %627 = vperm.xlu0 %9036, %v623_v2  }
 0xc2c   : > { %632 = vperm.xlu1 %8990, %v624_v61  }
 0xc2e   : > { %1809 = vperm.xlu0 %9036, %v1806_v40  }
 0xc5a   : > { %v1796_v48 = vpop.permute.xlu1 %1795 }
 0xc5b   : > { %v1817_v50 = vsel %vm550_vm2, %v1796_v48, 0 }
 0xc5c   : > { %8506 = vmatpush3.bf16.msra.mxu1 %v1817_v50  ;;  %v1791_v52 = vpop.permute.xlu0 %1790 }
 0xc5d   : > { %8507 = vmatprep.subr.bf16.mxu1 %v11950_v1 }
 0xc5e   : > { %v1788_v60 = vpop.permute.xlu1 %1787 }
 0xc5f   : > { %v1799_v63 = vsel %vm550_vm2, %v9926_v41, %v1788_v60 }
 0xc60   : > { %v1801_v3 = vsel %vm546_vm3, %v1799_v63, %v1791_v52 }
 0xc62   : > { %v1998_v0 = vpop.permute.xlu0 %1997  ;;  %v1794_v7 = vpop.permute.xlu1 %1793 }
 0xc63   : > { %v1803_v28 = vsel %vm541_vm1, %v1801_v3, %v1794_v7  ;;  %v2008_v27 = vsel %vm550_vm2, %v1998_v0, 0 }
 0xc64   : > { %8508 = vmatpush3.bf16.msra.mxu1 %v1803_v28 }
 0xc65   : > { %8519 = vmatprep.subr.bf16.mxu1 %v11950_v1 }
 0xc66   : > { %v1993_v62 = vpop.permute.xlu0 %1992  ;;  %v1990_v5 = vpop.permute.xlu1 %1989 }
 0xc67   : > { %v2001_v41 = vsel %vm550_vm2, %v9935_v54, %v1990_v5  ;;  %8510 = vmatmul.mubr.msk.bf16.vlgmr.msra.gmra.mxu1 %vm1812_vm4, %v10048_v8 }
 0xc68   : > { %8520 = vmatpush3.bf16.msra.mxu1 %v2008_v27  ;;  %8523 = vmatprep.mubr.msk.bf16.mxu1 %vm9211_vm0, %v11950_v1  ;;  %v2003_v12 = vsel %vm546_vm3, %v2001_v41, %v1993_v62 }
 0xc69   : > { %8521 = vmatprep.subr.bf16.mxu1 %v11950_v1 }
 0xc6a   : > { %v1996_v13 = vpop.permute.xlu1 %1995  ;;  %v2189_v14 = vpop.permute.xlu0 %2188 }
 0xc6b   : > { %v2005_v11 = vsel %vm541_vm1, %v2003_v12, %v1996_v13  ;;  %v2199_v21 = vsel %vm550_vm2, %v2189_v14, 0 }
 0xc6c   : > { %8522 = vmatpush3.bf16.msra.mxu1 %v2005_v11 }
 0xc6d   : > { %8533 = vmatprep.subr.bf16.mxu1 %v11950_v1 }
 0xc6e   : > { %v2184_v15 = vpop.permute.xlu0 %2183  ;;  %v2181_v54 = vpop.permute.xlu1 %2180 }
 0xc6f   : > { %v2192_v49 = vsel %vm550_vm2, %v9946_v9, %v2181_v54  ;;  %8524 = vmatmul.mubr.msk.bf16.vlgmr.msra.gmra.mxu1 %vm1812_vm4, %v10048_v8 }
 0xc70   : > { %8534 = vmatpush3.bf16.msra.mxu1 %v2199_v21  ;;  %8537 = vmatprep.mubr.msk.bf16.mxu1 %vm9211_vm0, %v11950_v1  ;;  %v2194_v16 = vsel %vm546_vm3, %v2192_v49, %v2184_v15 }
 0xc71   : > { %8535 = vmatprep.subr.bf16.mxu1 %v11950_v1 }
 0xc72   : > { %v2187_v42 = vpop.permute.xlu1 %2186  ;;  %v2380_v29 = vpop.permute.xlu0 %2379 }
 0xc73   : > { %v2196_v33 = vsel %vm541_vm1, %v2194_v16, %v2187_v42  ;;  %v2390_v36 = vsel %vm550_vm2, %v2380_v29, 0  ;;  %v9071_v42 = vld [vmem:[%s11944_s10 + $0x38] sm:$0x1f]  }
 0xc74   : > { %8536 = vmatpush3.bf16.msra.mxu1 %v2196_v33 }
 0xc75   : > { %8547 = vmatprep.subr.bf16.mxu1 %v11950_v1 }
 0xc76   : > { %v2375_v34 = vpop.permute.xlu0 %2374  ;;  %v2372_v9 = vpop.permute.xlu1 %2371 }
 0xc77   : > { %v2383_v2 = vsel %vm550_vm2, %v9957_v37, %v2372_v9  ;;  %8538 = vmatmul.mubr.msk.bf16.vlgmr.msra.gmra.mxu1 %vm1812_vm4, %v10048_v8  ;;  %v9078_v9 = vld [vmem:[%s11944_s10 + $0x58] sm:$0x1f]  }
 0xc78   : > { %8548 = vmatpush3.bf16.msra.mxu1 %v2390_v36  ;;  %8551 = vmatprep.mubr.msk.bf16.mxu1 %vm9211_vm0, %v11950_v1  ;;  %v2385_v61 = vsel %vm546_vm3, %v2383_v2, %v2375_v34  ;;  %v9073_v34 = vld [vmem:[%s11944_s10 + $0x30] sm:$0xff]   ;;  %v9079_v36 = vld [vmem:[%s11944_s10 + $0x78] sm:$0x1f]  }
 0xc79   : > { %8549 = vmatprep.subr.bf16.mxu1 %v11950_v1  ;;  %v9086_v2 = vld [vmem:[%s11944_s10 + $0x98] sm:$0x1f]  }
 0xc7a   : > { %v2378_v40 = vpop.permute.xlu1 %2377  ;;  %v2571_v23 = vpop.permute.xlu0 %2570 }
 0xc7b   : > { %v2387_v20 = vsel %vm541_vm1, %v2385_v61, %v2378_v40  ;;  %v2581_v47 = vsel %vm550_vm2, %v2571_v23, 0  ;;  %v9094_v61 = vld [vmem:[%s11944_s10 + $0xd8] sm:$0x1f]  }
 0xc7c   : > { %8550 = vmatpush3.bf16.msra.mxu1 %v2387_v20  ;;  %v9095_v40 = vld [vmem:[%s11944_s10 + $0xf8] sm:$0x1f]  }
 0xc7d   : > { %8561 = vmatprep.subr.bf16.mxu1 %v11950_v1  ;;  %v9102_v23 = vld [vmem:[%s11944_s10 + $0x118] sm:$0x1f]  }
 0xc7e   : > { %v2566_v46 = vpop.permute.xlu0 %2565  ;;  %v2563_v37 = vpop.permute.xlu1 %2562  ;;  %v9103_v20 = vld [vmem:[%s11944_s10 + $0x138] sm:$0x1f]  }
 0xc7f   : > { %v2574_v38 = vsel %vm550_vm2, %v9968_v39, %v2563_v37  ;;  %8552 = vmatmul.mubr.msk.bf16.vlgmr.msra.gmra.mxu1 %vm1812_vm4, %v10048_v8  ;;  %v10168_v37 = vsub.s32 0, %v9596_v25  ;;  %v10186_v25 = vsel %vm5612_vm15, %v9094_v61, 0 }
 0xc80   : > { %8562 = vmatpush3.bf16.msra.mxu1 %v2581_v47  ;;  %8565 = vmatprep.mubr.msk.bf16.mxu1 %vm9211_vm0, %v11950_v1  ;;  %v2576_v48 = vsel %vm546_vm3, %v2574_v38, %v2566_v46  ;;  %v9110_v46 = vld [vmem:[%s11944_s10 + $0x158] sm:$0x1f]   ;;  %v10171_v47 = vsel %vm5612_vm15, %v9078_v9, 0  ;;  %v9075_v38 = vld [vmem:[%s11944_s10 + $0x28] sm:$0xff]  }
 0xc81   : > { %8563 = vmatprep.subr.bf16.mxu1 %v11950_v1 }
 0xc82   : > { %v2569_v50 = vpop.permute.xlu1 %2568  ;;  %v2762_v52 = vpop.permute.xlu0 %2761 }
 0xc83   : > { %v2578_v60 = vsel %vm541_vm1, %v2576_v48, %v2569_v50  ;;  %v2772_v0 = vsel %vm550_vm2, %v2762_v52, 0  ;;  %v10177_v48 = vsel %vm5612_vm15, %v9079_v36, 0  ;;  %v10180_v50 = vsel %vm5612_vm15, %v9086_v2, 0 }
 0xc84   : > { %8564 = vmatpush3.bf16.msra.mxu1 %v2578_v60 }
 0xc85   : > { %8575 = vmatprep.subr.bf16.mxu1 %v11950_v1 }
 0xc86   : > { %v2757_v63 = vpop.permute.xlu0 %2756  ;;  %v2754_v39 = vpop.permute.xlu1 %2753 }
 0xc87   : > { %v2765_v3 = vsel %vm550_vm2, %v9979_v56, %v2754_v39  ;;  %8566 = vmatmul.mubr.msk.bf16.vlgmr.msra.gmra.mxu1 %vm1812_vm4, %v10048_v8  ;;  %v10193_v39 = vsel %vm5612_vm15, %v9102_v23, 0 }
 0xc88   : > { %8576 = vmatpush3.bf16.msra.mxu1 %v2772_v0  ;;  %8579 = vmatprep.mubr.msk.bf16.mxu1 %vm9211_vm0, %v11950_v1  ;;  %v2767_v7 = vsel %vm546_vm3, %v2765_v3, %v2757_v63  ;;  %v10190_v63 = vsel %vm5612_vm15, %v9095_v40, 0  ;;  %v10196_v0 = vsel %vm5612_vm15, %v9103_v20, 0  ;;  %v10199_v3 = vsel %vm5612_vm15, %v9110_v46, 0 }
 0xc89   : > { %8577 = vmatprep.subr.bf16.mxu1 %v11950_v1  ;;  %11962 = vst [vmem:[#allocation3_spill] sm:$0xff] %v10199_v3 }
 0xc8a   : > { %v2760_v28 = vpop.permute.xlu1 %2759  ;;  %v2953_v62 = vpop.permute.xlu0 %2952 }
 0xc8b   : > { %v2769_v5 = vsel %vm541_vm1, %v2767_v7, %v2760_v28  ;;  %v2963_v56 = vsel %vm550_vm2, %v2953_v62, 0 }
 0xc8c   : > { %8578 = vmatpush3.bf16.msra.mxu1 %v2769_v5 }
 0xc8d   : > { %8589 = vmatprep.subr.bf16.mxu1 %v11950_v1 }
 0xc8e   : > { %v2945_v27 = vpop.permute.xlu1 %2944  ;;  %v2948_v41 = vpop.permute.xlu0 %2947 }
 0xc8f   : > { %v2956_v12 = vsel %vm550_vm2, %v9990_v10, %v2945_v27  ;;  %8580 = vmatmul.mubr.msk.bf16.vlgmr.msra.gmra.mxu1 %vm1812_vm4, %v10048_v8 }
 0xc90   : > { %8590 = vmatpush3.bf16.msra.mxu1 %v2963_v56  ;;  %8593 = vmatprep.mubr.msk.bf16.mxu1 %vm9211_vm0, %v11950_v1  ;;  %v2958_v13 = vsel %vm546_vm3, %v2956_v12, %v2948_v41 }
 0xc91   : > { %8591 = vmatprep.subr.bf16.mxu1 %v11950_v1 }
 0xc92   : > { %v2951_v14 = vpop.permute.xlu1 %2950 }
 0xc93   : > { %v2960_v11 = vsel %vm541_vm1, %v2958_v13, %v2951_v14 }
 0xc94   : > { %8592 = vmatpush3.bf16.msra.mxu1 %v2960_v11  ;;  %v3144_v15 = vpop.permute.xlu0 %3143 }
 0xc95   : > { %8603 = vmatprep.subr.bf16.mxu1 %v11950_v1  ;;  %v3154_v10 = vsel %vm550_vm2, %v3144_v15, 0 }
 0xc96   : > { %v3136_v54 = vpop.permute.xlu1 %3135 }
 0xc97   : > { %v3147_v21 = vsel %vm550_vm2, %v10002_v17, %v3136_v54  ;;  %8594 = vmatmul.mubr.msk.bf16.vlgmr.msra.gmra.mxu1 %vm1812_vm4, %v10048_v8  ;;  %v5683_v17 = vsel %vm5612_vm15, %v9071_v42, 0 }
 0xc98   : > { %8604 = vmatpush3.bf16.msra.mxu1 %v3154_v10  ;;  %v3139_v49 = vpop.permute.xlu0 %3138  ;;  %8607 = vmatprep.mubr.msk.bf16.mxu1 %vm9211_vm0, %v11950_v1 }
 0xc99   : > { %v3149_v16 = vsel %vm546_vm3, %v3147_v21, %v3139_v49  ;;  %8605 = vmatprep.subr.bf16.mxu1 %v11950_v1 }
 0xc9a   : > { %v3142_v29 = vpop.permute.xlu1 %3141 }
 0xc9b   : > { %v3151_v33 = vsel %vm541_vm1, %v3149_v16, %v3142_v29  ;;  %vm4687_vm1 = vsmask.f32 3328 }
 0xc9c   : > { %8606 = vmatpush3.bf16.msra.mxu1 %v3151_v33  ;;  %vm10393_vm7 = vmand %vm546_vm3, %vm4687_vm1  ;;  %vm6888_vm3 = vcmask 965632  }
 0xc9d   : > { %8623 = vmatprep.subr.bf16.mxu1 %v11950_v1 }
 0xc9f   : > { %8608 = vmatmul.mubr.msk.bf16.vlgmr.msra.gmra.mxu1 %vm1812_vm4, %v10048_v8  ;;  %v9087_v8 = vld [vmem:[%s11944_s10 + $0xb8] sm:$0x1f]  }
 0xca0   : > { %8624 = vmatpush3.bf16.msra.mxu1 %v5683_v17  ;;  %8631 = vmatprep.mubr.msk.bf16.mxu1 %vm9211_vm0, %v11950_v1  ;;  %v10183_v52 = vsel %vm5612_vm15, %v9087_v8, 0 }
 0xca1   : > { %8625 = vmatprep.subr.bf16.mxu1 %v11950_v1 }
 0xca4   : > { %8626 = vmatpush3.bf16.msra.mxu1 %v9073_v34 }
 0xca5   : > { %v628_v60 = vpop.permute.xlu0 %627  ;;  %8627 = vmatprep.subr.bf16.mxu1 %v11950_v1 }
 0xca6   : > { %v682_v7 = vadd.f32 %v9392_v51, %v628_v60  ;;  %v817_v28 = vadd.f32 %v9426_v22, %v628_v60  ;;  %v952_v62 = vadd.f32 %v9460_v57, %v628_v60  ;;  %v1087_v5 = vadd.f32 %v9494_v30, %v628_v60  ;;  %v9077_v51 = vld [vmem:[%s11944_s10 + $0x20] sm:$0xff]  }
 0xca7   : > { %v1222_v27 = vadd.f32 %v9528_v4, %v628_v60  ;;  %v1357_v56 = vadd.f32 %v9562_v43, %v628_v60  ;;  %v1492_v41 = vadd.f32 %v9631_v55, %v628_v60  ;;  %v1627_v12 = vadd.f32 %v9919_v18, %v628_v60  ;;  %v633_v13 = vpop.permute.xlu1 %632 }
 0xca8   : > { %v688_v14 = vmax.f32 %v682_v7, 0.0  ;;  %v823_v11 = vmax.f32 %v817_v28, 0.0  ;;  %v958_v15 = vmax.f32 %v952_v62, 0.0  ;;  %v1093_v54 = vmax.f32 %v1087_v5, 0.0  ;;  %8628 = vmatpush3.bf16.msra.mxu1 %v9075_v38 }
 0xca9   : > { %v1228_v22 = vmax.f32 %v1222_v27, 0.0  ;;  %v1363_v57 = vmax.f32 %v1357_v56, 0.0  ;;  %v1498_v30 = vmax.f32 %v1492_v41, 0.0  ;;  %v1633_v4 = vmax.f32 %v1627_v12, 0.0  ;;  %8629 = vmatprep.subr.bf16.mxu1 %v11950_v1 }
 0xcaa   : > { %v685_v43 = vadd.f32 %v9394_v53, %v633_v13  ;;  %v820_v55 = vadd.f32 %v9428_v24, %v633_v13  ;;  %v955_v18 = vadd.f32 %v9462_v59, %v633_v13  ;;  %v1090_v10 = vadd.f32 %v9496_v32, %v633_v13 }
 0xcab   : > { %v1225_v21 = vadd.f32 %v9530_v6, %v633_v13  ;;  %v1360_v49 = vadd.f32 %v9564_v45, %v633_v13  ;;  %v1495_v16 = vadd.f32 %v9633_v58, %v633_v13  ;;  %v1630_v42 = vadd.f32 %v9921_v31, %v633_v13 }
 0xcac   : > { %v689_v29 = vmax.f32 %v685_v43, 0.0  ;;  %v824_v33 = vmax.f32 %v820_v55, 0.0  ;;  %v959_v17 = vmax.f32 %v955_v18, 0.0  ;;  %v1094_v34 = vmax.f32 %v1090_v10, 0.0  ;;  %8630 = vmatpush3.bf16.msra.mxu1 %v9077_v51 }
 0xcad   : > { %v1229_v53 = vmax.f32 %v1225_v21, 0.0  ;;  %v1364_v9 = vmax.f32 %v1360_v49, 0.0  ;;  %v10221_v24 = vmax.f32 %v1495_v16, 0.0  ;;  %v10223_v59 = vmax.f32 %v1630_v42, 0.0  ;;  %8647 = vmatprep.subr.bf16.mxu1 %v11950_v1 }
 0xcae   : > { %v690_v32 = vpack.c.bf16 %v689_v29, %v688_v14  ;;  %v825_v6 = vpack.c.bf16 %v824_v33, %v823_v11  ;;  %v960_v45 = vpack.c.bf16 %v959_v17, %v958_v15  ;;  %v1095_v36 = vpack.c.bf16 %v1094_v34, %v1093_v54 }
 0xcaf   : > { %v1230_v58 = vpack.c.bf16 %v1229_v53, %v1228_v22  ;;  %v1365_v2 = vpack.c.bf16 %v1364_v9, %v1363_v57  ;;  %v1500_v31 = vpack.c.bf16 %v10221_v24, %v1498_v30  ;;  %v1635_v8 = vpack.c.bf16 %v10223_v59, %v1633_v4 }
 0xcb0   : > { %v7816_v61 = vpack.c.bf16 %v689_v29, %v689_v29  ;;  %v3206_v40 = vrot.slane %v690_v32, %v9605_v26  ;;  %v7817_v23 = vpack.c.bf16 %v824_v33, %v824_v33  ;;  %v3272_v20 = vrot.slane %v825_v6, %v9605_v26 }
 0xcb1   : > { %v7818_v46 = vpack.c.bf16 %v959_v17, %v959_v17  ;;  %v3338_v38 = vrot.slane %v960_v45, %v9605_v26  ;;  %v7819_v60 = vpack.c.bf16 %v1094_v34, %v1094_v34  ;;  %v3404_v7 = vrot.slane %v1095_v36, %v9605_v26 }
 0xcb2   : > { %v3213_v28 = vrot.slane %v7816_v61, %v9605_v26  ;;  %v3214_v62 = vcombine.high %v3206_v40, %v3206_v40  ;;  %v10234_v5 = vrot.slane %v3206_v40, %v9605_v26  ;;  %v3279_v27 = vrot.slane %v7817_v23, %v9605_v26 }
 0xcb3   : > { %v3280_v56 = vcombine.high %v3272_v20, %v3272_v20  ;;  %v10238_v41 = vrot.slane %v3272_v20, %v9605_v26  ;;  %v3345_v12 = vrot.slane %v7818_v46, %v9605_v26  ;;  %v3346_v13 = vcombine.high %v3338_v38, %v3338_v38 }
 0xcb4   : > { %v3215_v14 = vcombine.high %v3213_v28, %v3213_v28  ;;  %v10242_v11 = vrot.slane %v3213_v28, %v9605_v26  ;;  %v10245_v15 = vrot.slane %v3214_v62, %v9605_v26  ;;  %v10249_v54 = vcombine.high %v10234_v5, %v10234_v5 }
 0xcb5   : > { %v3281_v51 = vcombine.high %v3279_v27, %v3279_v27  ;;  %v10252_v22 = vrot.slane %v3279_v27, %v9605_v26  ;;  %v10255_v57 = vrot.slane %v3280_v56, %v9605_v26  ;;  %v10259_v30 = vcombine.high %v10238_v41, %v10238_v41 }
 0xcb6   : > { %v10262_v4 = vrot.slane %v3215_v14, %v9605_v26  ;;  %v10266_v43 = vcombine.high %v10242_v11, %v10242_v11  ;;  %v3347_v55 = vcombine.high %v3345_v12, %v3345_v12  ;;  %v10269_v18 = vrot.slane %v3338_v38, %v9605_v26 }
 0xcb7   : > { %v10272_v10 = vrot.slane %v3281_v51, %v9605_v26  ;;  %v10276_v21 = vcombine.high %v10252_v22, %v10252_v22  ;;  %v10279_v49 = vrot.slane %v3345_v12, %v9605_v26  ;;  %v10282_v16 = vrot.slane %v3346_v13, %v9605_v26 }
 0xcb8   : > { %11963 = vst [vmem:[#allocation4_spill] sm:$0xff] %v10266_v43  ;;  %v10285_v42 = vrot.slane %v3347_v55, %v9605_v26  ;;  %v3411_v29 = vrot.slane %v7819_v60, %v9605_v26  ;;  %v3412_v33 = vcombine.high %v3404_v7, %v3404_v7  ;;  %v10289_v17 = vrot.slane %v3404_v7, %v9605_v26 }
 0xcb9   : > { %11964 = vst [vmem:[#allocation5_spill] sm:$0xff] %v10276_v21  ;;  %v7820_v34 = vpack.c.bf16 %v1229_v53, %v1229_v53  ;;  %v10292_v32 = vrot.slane %v1230_v58, %v9605_v26  ;;  %v7821_v6 = vpack.c.bf16 %v1364_v9, %v1364_v9  ;;  %v10295_v45 = vrot.slane %v1365_v2, %v9605_v26 }
 0xcba   : > { %11965 = vst [vmem:[#allocation6_spill] sm:$0xff] %v10285_v42  ;;  %v3413_v36 = vcombine.high %v3411_v29, %v3411_v29  ;;  %v10298_v61 = vrot.slane %v3411_v29, %v9605_v26  ;;  %v10301_v40 = vrot.slane %v3412_v33, %v9605_v26  ;;  %v7822_v23 = vpack.c.bf16 %v10221_v24, %v10221_v24 }
 0xcbb   : > { %v10306_v20 = vrot.slane %v7820_v34, %v9605_v26  ;;  %v10312_v9 = vrot.slane %v10292_v32, %v9605_v26  ;;  %v10315_v58 = vrot.slane %v7821_v6, %v9605_v26  ;;  %v3544_v24 = vcombine.high %v10295_v45, %v10295_v45 }
 0xcbc   : > { %v10318_v2 = vrot.slane %v3413_v36, %v9605_v26  ;;  %v10323_v46 = vrot.slane %v1500_v31, %v9605_v26  ;;  %v10326_v38 = vrot.slane %v7822_v23, %v9605_v26  ;;  %v10340_v31 = vrot.slane %v10295_v45, %v9605_v26 }
 0xcbd   : > { %v10332_v7 = vrot.slane %v10306_v20, %v9605_v26  ;;  %v10347_v56 = vrot.slane %v1635_v8, %v9605_v26  ;;  %v7824_v12 = vpack.i.b16 %v10234_v5, %v10234_v5  ;;  %v7832_v13 = vpack.i.b16 %v10238_v41, %v10238_v41 }
 0xcbe   : > { %11966 = vst [vmem:[#allocation7_spill] sm:$0xff] %v10318_v2  ;;  %v10344_v27 = vrot.slane %v10323_v46, %v9605_v26  ;;  %v7840_v14 = vpack.i.b16 %v10269_v18, %v10269_v18  ;;  %v7848_v51 = vpack.i.b16 %v10289_v17, %v10289_v17  ;;  %v7856_v55 = vpack.i.b16 %v10312_v9, %v10312_v9 }
 0xcbf   : > { %v10361_v8 = vrot.slane %v10347_v56, %v9605_v26  ;;  %v3745_v29 = vrot.slane %v7824_v12, %v10168_v37  ;;  %v7864_v33 = vpack.i.b16 %v10340_v31, %v10340_v31  ;;  %v3841_v6 = vrot.slane %v7832_v13, %v10168_v37 }
 0xcc0   : > { %v7872_v34 = vpack.i.b16 %v10344_v27, %v10344_v27  ;;  %v3937_v45 = vrot.slane %v7840_v14, %v10168_v37  ;;  %v4017_v36 = vrot.slane %v7848_v51, %v10168_v37  ;;  %v4113_v23 = vrot.slane %v7856_v55, %v10168_v37 }
 0xcc1   : > { %v4193_v28 = vrot.slane %v7864_v33, %v10168_v37  ;;  %v7880_v12 = vpack.i.b16 %v10361_v8, %v10361_v8  ;;  %v3249_v62 = vunpack.i.h.s16 %v10234_v5  ;;  %v4446_v1 = vsel %vm9757_vm8, %v3745_v29, %v3841_v6 }
 0xcc2   : > { %v4289_v60 = vrot.slane %v7872_v34, %v10168_v37  ;;  %v3315_v13 = vunpack.i.h.s16 %v10238_v41  ;;  %v3381_v14 = vunpack.i.h.s16 %v10269_v18  ;;  %v3447_v51 = vunpack.i.h.s16 %v10289_v17 }
 0xcc3   : > { %v4369_v55 = vrot.slane %v7880_v12, %v10168_v37  ;;  %v4464_v33 = vsel %vm1703_vm6, %v4446_v1, %v3937_v45  ;;  %v3513_v34 = vunpack.i.h.s16 %v10312_v9  ;;  %v3579_v53 = vunpack.i.h.s16 %v10340_v31 }
 0xcc4   : > { %v4526_v5 = vsel %vm9766_vm10, %v4464_v33, %v4017_v36  ;;  %v3645_v21 = vunpack.i.h.s16 %v10344_v27  ;;  %v3711_v29 = vunpack.i.h.s16 %v10361_v8  ;;  %v3727_v41 = vpack.i.b16 %v3249_v62, %v3249_v62 }
 0xcc5   : > { %v4544_v6 = vsel %vm550_vm2, %v4526_v5, %v4113_v23  ;;  %v3823_v1 = vpack.i.b16 %v3315_v13, %v3315_v13  ;;  %v3919_v45 = vpack.i.b16 %v3381_v14, %v3381_v14  ;;  %v3999_v43 = vpack.i.b16 %v3447_v51, %v3447_v51 }
 0xcc6   : > { %v4606_v2 = vsel %vm9774_vm13, %v4544_v6, %v4193_v28  ;;  %v3749_v36 = vrot.slane %v3727_v41, %v10168_v37  ;;  %v4095_v33 = vpack.i.b16 %v3513_v34, %v3513_v34  ;;  %v4175_v3 = vpack.i.b16 %v3579_v53, %v3579_v53 }
 0xcc7   : > { %v4624_v62 = vsel %vm1720_vm11, %v4606_v2, %v4289_v60  ;;  %v3845_v23 = vrot.slane %v3823_v1, %v10168_v37  ;;  %v3941_v5 = vrot.slane %v3919_v45, %v10168_v37  ;;  %v4021_v42 = vrot.slane %v3999_v43, %v10168_v37 }
 0xcc8   : > { %v4689_v13 = vsel %vm10393_vm7, %v4624_v62, %v4369_v55  ;;  %v4117_v14 = vrot.slane %v4095_v33, %v10168_v37  ;;  %v4197_v51 = vrot.slane %v4175_v3, %v10168_v37  ;;  %v4271_v28 = vpack.i.b16 %v3645_v21, %v3645_v21  ;;  %v9080_v55 = vld [vmem:[%s11944_s10 + $0x50] sm:$0xff]  }
 0xcc9   : > { %8620 = vmatmul.mubr.msk.bf16.vlgmr.msra.gmra.mxu0 %vm5608_vm5, %v4689_v13  ;;  %v4351_v34 = vpack.i.b16 %v3711_v29, %v3711_v29  ;;  %v4447_v53 = vsel %vm9757_vm8, %v3749_v36, %v3845_v23  ;;  %v11969_v2 = vcombine.high %v10292_v32, %v10292_v32  ;;  %v10418_v43 = vrot.slane %v3544_v24, %v9605_v26  ;;  %v9082_v13 = vld [vmem:[%s11944_s10 + $0x48] sm:$0xff]  }
 0xcca   : > { %8636 = vmatpush3.bf16.msra.mxu0 %v10171_v47  ;;  %v4293_v3 = vrot.slane %v4271_v28, %v10168_v37  ;;  %v4468_v21 = vsel %vm1703_vm6, %v4447_v53, %v3941_v5  ;;  %v11970_v29 = vmov 0.0   ;;  %v3610_v32 = vcombine.high %v10323_v46, %v10323_v46 }
 0xccb   : > { %v10415_v60 = vrot.slane %v11969_v2, %v9605_v26  ;;  %8643 = vmatprep.mubr.msk.bf16.mxu0 %vm9211_vm0, %v11970_v29  ;;  %v3251_v41 = vunpack.i.h.s16 %v10245_v15  ;;  %v4373_v24 = vrot.slane %v4351_v34, %v10168_v37  ;;  %v4527_v47 = vsel %vm9766_vm10, %v4468_v21, %v4021_v42  ;;  %8637 = vmatprep.subr.bf16.mxu0 %v11970_v29 }
 0xccc   : > { %v3676_v6 = vcombine.high %v10347_v56, %v10347_v56  ;;  %v7825_v1 = vpack.i.b16 %v10245_v15, %v10245_v15  ;;  %v4548_v45 = vsel %vm550_vm2, %v4527_v47, %v4117_v14  ;;  %v10441_v36 = vrot.slane %v3610_v32, %v9605_v26  ;;  %v9081_v47 = vld [vmem:[%s11944_s10 + $0x70] sm:$0xff]  }
 0xccd   : > { %v7833_v46 = vpack.i.b16 %v10255_v57, %v10255_v57  ;;  %v7841_v33 = vpack.i.b16 %v10282_v16, %v10282_v16  ;;  %v4607_v42 = vsel %vm9774_vm13, %v4548_v45, %v4197_v51  ;;  %v7849_v23 = vpack.i.b16 %v10301_v40, %v10301_v40 }
 0xcce   : > { %v10450_v62 = vrot.slane %v3676_v6, %v9605_v26  ;;  %v3753_v56 = vrot.slane %v7825_v1, %v10168_v37  ;;  %v4628_v5 = vsel %vm1720_vm11, %v4607_v42, %v4293_v3  ;;  %8638 = vmatpush3.bf16.msra.mxu0 %v9080_v55  ;;  %v7857_v51 = vpack.i.b16 %v10415_v60, %v10415_v60 }
 0xccf   : > { %v3849_v14 = vrot.slane %v7833_v46, %v10168_v37  ;;  %v3945_v28 = vrot.slane %v7841_v33, %v10168_v37  ;;  %v4690_v34 = vsel %vm10393_vm7, %v4628_v5, %v4373_v24  ;;  %8639 = vmatprep.subr.bf16.mxu0 %v11970_v29  ;;  %v4025_v53 = vrot.slane %v7849_v23, %v10168_v37 }
 0xcd0   : > { %v7865_v2 = vpack.i.b16 %v10418_v43, %v10418_v43  ;;  %v7873_v3 = vpack.i.b16 %v10441_v36, %v10441_v36  ;;  %8632 = vmatmul.mubr.msk.bf16.vlgmr.msra.gmra.mxu1 %vm5608_vm5, %v4690_v34  ;;  %v4121_v21 = vrot.slane %v7857_v51, %v10168_v37  ;;  %v7881_v55 = vpack.i.b16 %v10450_v62, %v10450_v62 }
 0xcd1   : > { %v4448_v32 = vsel %vm9757_vm8, %v3753_v56, %v3849_v14  ;;  %v3317_v24 = vunpack.i.h.s16 %v10255_v57  ;;  %8648 = vmatpush3.bf16.msra.mxu1 %v10177_v48  ;;  %8655 = vmatprep.mubr.msk.bf16.mxu1 %vm9211_vm0, %v11970_v29  ;;  %v3383_v46 = vunpack.i.h.s16 %v10282_v16  ;;  %v9084_v48 = vld [vmem:[%s11944_s10 + $0x40] sm:$0xff]   ;;  %v3449_v56 = vunpack.i.h.s16 %v10301_v40 }
 0xcd2   : > { %v4201_v6 = vrot.slane %v7865_v2, %v10168_v37  ;;  %v4297_v1 = vrot.slane %v7873_v3, %v10168_v37  ;;  %v4472_v45 = vsel %vm1703_vm6, %v4448_v32, %v3945_v28  ;;  %8649 = vmatprep.subr.bf16.mxu1 %v11970_v29  ;;  %8640 = vmatpush3.bf16.msra.mxu0 %v9082_v13  ;;  %v3515_v23 = vunpack.i.h.s16 %v10415_v60  ;;  %v9083_v3 = vld [vmem:[%s11944_s10 + $0x68] sm:$0xff]  }
 0xcd3   : > { %v4377_v33 = vrot.slane %v7881_v55, %v10168_v37  ;;  %v4528_v42 = vsel %vm9766_vm10, %v4472_v45, %v4025_v53  ;;  %8641 = vmatprep.subr.bf16.mxu0 %v11970_v29  ;;  %v3581_v14 = vunpack.i.h.s16 %v10418_v43  ;;  %v3647_v13 = vunpack.i.h.s16 %v10441_v36 }
 0xcd4   : > { %v4552_v5 = vsel %vm550_vm2, %v4528_v42, %v4121_v21  ;;  %v3713_v28 = vunpack.i.h.s16 %v10450_v62  ;;  %v3729_v34 = vpack.i.b16 %v3251_v41, %v3251_v41  ;;  %v3825_v2 = vpack.i.b16 %v3317_v24, %v3317_v24 }
 0xcd5   : > { %v4608_v51 = vsel %vm9774_vm13, %v4552_v5, %v4201_v6  ;;  %v3921_v53 = vpack.i.b16 %v3383_v46, %v3383_v46  ;;  %8650 = vmatpush3.bf16.msra.mxu1 %v9081_v47  ;;  %v4001_v21 = vpack.i.b16 %v3449_v56, %v3449_v56  ;;  %v4097_v32 = vpack.i.b16 %v3515_v23, %v3515_v23 }
 0xcd6   : > { %v4632_v55 = vsel %vm1720_vm11, %v4608_v51, %v4297_v1  ;;  %v4177_v45 = vpack.i.b16 %v3581_v14, %v3581_v14  ;;  %8651 = vmatprep.subr.bf16.mxu1 %v11970_v29  ;;  %8642 = vmatpush3.bf16.msra.mxu0 %v9084_v48  ;;  %v3757_v41 = vrot.slane %v3729_v34, %v10168_v37  ;;  %v3253_v47 = vunpack.i.h.s16 %v10249_v54  ;;  %v9085_v14 = vld [vmem:[%s11944_s10 + $0x60] sm:$0xff]  }
 0xcd7   : > { %v4691_v42 = vsel %vm10393_vm7, %v4632_v55, %v4377_v33  ;;  %v3853_v24 = vrot.slane %v3825_v2, %v10168_v37  ;;  %8659 = vmatprep.subr.bf16.mxu0 %v11970_v29  ;;  %v3949_v6 = vrot.slane %v3921_v53, %v10168_v37  ;;  %v4029_v1 = vrot.slane %v4001_v21, %v10168_v37 }
 0xcd8   : > { %v4125_v46 = vrot.slane %v4097_v32, %v10168_v37  ;;  %v4205_v56 = vrot.slane %v4177_v45, %v10168_v37  ;;  %v4273_v48 = vpack.i.b16 %v3647_v13, %v3647_v13  ;;  %v4353_v23 = vpack.i.b16 %v3713_v28, %v3713_v28 }
 0xcd9   : > { %v4449_v33 = vsel %vm9757_vm8, %v3757_v41, %v3853_v24  ;;  %v10523_v5 = vcombine.high %v10269_v18, %v10269_v18  ;;  %8652 = vmatpush3.bf16.msra.mxu1 %v9083_v3  ;;  %8644 = vmatmul.mubr.msk.bf16.vlgmr.msra.gmra.mxu0 %vm5608_vm5, %v4691_v42  ;;  %v10532_v13 = vcombine.high %v10289_v17, %v10289_v17  ;;  %v3319_v18 = vunpack.i.h.s16 %v10259_v30  ;;  %v9088_v17 = vld [vmem:[%s11944_s10 + $0x90] sm:$0xff]  }
 0xcda   : > { %v4476_v51 = vsel %vm1703_vm6, %v4449_v33, %v3949_v6  ;;  %v10536_v28 = vcombine.high %v10312_v9, %v10312_v9  ;;  %8653 = vmatprep.subr.bf16.mxu1 %v11970_v29  ;;  %8660 = vmatpush3.bf16.msra.mxu0 %v10180_v50  ;;  %v4301_v34 = vrot.slane %v4273_v48, %v10168_v37 }
 0xcdb   : > { %v4381_v2 = vrot.slane %v4353_v23, %v10168_v37  ;;  %v4529_v53 = vsel %vm9766_vm10, %v4476_v51, %v4029_v1  ;;  %v3385_v9 = vunpack.i.h.s16 %v10523_v5  ;;  %8661 = vmatprep.subr.bf16.mxu0 %v11970_v29  ;;  %8667 = vmatprep.mubr.msk.bf16.mxu0 %vm9211_vm0, %v11970_v29  ;;  %v3574_v50 = vcombine.high %v10340_v31, %v10340_v31 }
 0xcdc   : > { %v4556_v3 = vsel %vm550_vm2, %v4529_v53, %v4125_v46  ;;  %v10557_v55 = vcombine.high %v10344_v27, %v10344_v27  ;;  %v3451_v21 = vunpack.i.h.s16 %v10532_v13  ;;  %v10564_v45 = vcombine.high %v10361_v8, %v10361_v8 }
 0xcdd   : > { %v4609_v32 = vsel %vm9774_vm13, %v4556_v3, %v4205_v56  ;;  %v7826_v42 = vpack.i.b16 %v10249_v54, %v10249_v54  ;;  %v7834_v41 = vpack.i.b16 %v10259_v30, %v10259_v30  ;;  %8654 = vmatpush3.bf16.msra.mxu1 %v9085_v14  ;;  %v7842_v27 = vpack.i.b16 %v10523_v5, %v10523_v5  ;;  %v9090_v30 = vld [vmem:[%s11944_s10 + $0x88] sm:$0xff]  }
 0xcde   : > { %v4636_v31 = vsel %vm1720_vm11, %v4609_v32, %v4301_v34  ;;  %v7850_v24 = vpack.i.b16 %v10532_v13, %v10532_v13  ;;  %v7858_v6 = vpack.i.b16 %v10536_v28, %v10536_v28  ;;  %8671 = vmatprep.subr.bf16.mxu1 %v11970_v29  ;;  %8662 = vmatpush3.bf16.msra.mxu0 %v9088_v17  ;;  %v3517_v56 = vunpack.i.h.s16 %v10536_v28  ;;  %v9089_v34 = vld [vmem:[%s11944_s10 + $0xb0] sm:$0xff]  }
 0xcdf   : > { %v4692_v8 = vsel %vm10393_vm7, %v4636_v31, %v4381_v2  ;;  %v3761_v1 = vrot.slane %v7826_v42, %v10168_v37  ;;  %v3857_v46 = vrot.slane %v7834_v41, %v10168_v37  ;;  %8663 = vmatprep.subr.bf16.mxu0 %v11970_v29  ;;  %v3953_v48 = vrot.slane %v7842_v27, %v10168_v37 }
 0xce0   : > { %v4033_v23 = vrot.slane %v7850_v24, %v10168_v37  ;;  %v4129_v33 = vrot.slane %v7858_v6, %v10168_v37  ;;  %v7866_v5 = vpack.i.b16 %v3574_v50, %v3574_v50  ;;  %8656 = vmatmul.mubr.msk.bf16.vlgmr.msra.gmra.mxu1 %vm5608_vm5, %v4692_v8  ;;  %v7874_v14 = vpack.i.b16 %v10557_v55, %v10557_v55 }
 0xce1   : > { %v7882_v51 = vpack.i.b16 %v10564_v45, %v10564_v45  ;;  %v4450_v13 = vsel %vm9757_vm8, %v3761_v1, %v3857_v46  ;;  %v3583_v28 = vunpack.i.h.s16 %v3574_v50  ;;  %8672 = vmatpush3.bf16.msra.mxu1 %v10183_v52  ;;  %8679 = vmatprep.mubr.msk.bf16.mxu1 %vm9211_vm0, %v11970_v29  ;;  %v3649_v17 = vunpack.i.h.s16 %v10557_v55  ;;  %v9092_v52 = vld [vmem:[%s11944_s10 + $0x80] sm:$0xff]   ;;  %v9091_v1 = vld [vmem:[%s11944_s10 + $0xa8] sm:$0xff]  }
 0xce2   : > { %v4209_v2 = vrot.slane %v7866_v5, %v10168_v37  ;;  %v4480_v53 = vsel %vm1703_vm6, %v4450_v13, %v3953_v48  ;;  %v3715_v3 = vunpack.i.h.s16 %v10564_v45  ;;  %8673 = vmatprep.subr.bf16.mxu1 %v11970_v29  ;;  %8664 = vmatpush3.bf16.msra.mxu0 %v9090_v30  ;;  %v4305_v50 = vrot.slane %v7874_v14, %v10168_v37 }
 0xce3   : > { %v4385_v32 = vrot.slane %v7882_v51, %v10168_v37  ;;  %v4530_v42 = vsel %vm9766_vm10, %v4480_v53, %v4033_v23  ;;  %v3257_v41 = vunpack.i.h.s16 %v10242_v11  ;;  %8665 = vmatprep.subr.bf16.mxu0 %v11970_v29  ;;  %v3731_v45 = vpack.i.b16 %v3253_v47, %v3253_v47 }
 0xce4   : > { %v4560_v55 = vsel %vm550_vm2, %v4530_v42, %v4129_v33  ;;  %v3827_v31 = vpack.i.b16 %v3319_v18, %v3319_v18  ;;  %v3923_v27 = vpack.i.b16 %v3385_v9, %v3385_v9  ;;  %v4003_v6 = vpack.i.b16 %v3451_v21, %v3451_v21 }
 0xce5   : > { %v4610_v24 = vsel %vm9774_vm13, %v4560_v55, %v4209_v2  ;;  %v4099_v8 = vpack.i.b16 %v3517_v56, %v3517_v56  ;;  %v4179_v30 = vpack.i.b16 %v3583_v28, %v3583_v28  ;;  %8674 = vmatpush3.bf16.msra.mxu1 %v9089_v34  ;;  %v3765_v48 = vrot.slane %v3731_v45, %v10168_v37  ;;  %v9093_v2 = vld [vmem:[%s11944_s10 + $0xa0] sm:$0xff]  }
 0xce6   : > { %v4640_v46 = vsel %vm1720_vm11, %v4610_v24, %v4305_v50  ;;  %v3861_v54 = vrot.slane %v3827_v31, %v10168_v37  ;;  %v3957_v47 = vrot.slane %v3923_v27, %v10168_v37  ;;  %8675 = vmatprep.subr.bf16.mxu1 %v11970_v29  ;;  %8666 = vmatpush3.bf16.msra.mxu0 %v9092_v52  ;;  %v3323_v56 = vunpack.i.h.s16 %v10252_v22 }
 0xce7   : > { %v4693_v18 = vsel %vm10393_vm7, %v4640_v46, %v4385_v32  ;;  %v4037_v9 = vrot.slane %v4003_v6, %v10168_v37  ;;  %v4133_v21 = vrot.slane %v4099_v8, %v10168_v37  ;;  %8683 = vmatprep.subr.bf16.mxu0 %v11970_v29  ;;  %v4213_v23 = vrot.slane %v4179_v30, %v10168_v37 }
 0xce8   : > { %v4275_v33 = vpack.i.b16 %v3649_v17, %v3649_v17  ;;  %v4355_v5 = vpack.i.b16 %v3715_v3, %v3715_v3  ;;  %v4451_v14 = vsel %vm9757_vm8, %v3765_v48, %v3861_v54  ;;  %v10643_v13 = vcombine.high %v10245_v15, %v10245_v15  ;;  %v9096_v3 = vld [vmem:[%s11944_s10 + $0xd0] sm:$0xff]  }
 0xce9   : > { %v4484_v51 = vsel %vm1703_vm6, %v4451_v14, %v3957_v47  ;;  %v10647_v28 = vcombine.high %v10255_v57, %v10255_v57  ;;  %v10651_v34 = vcombine.high %v10282_v16, %v10282_v16  ;;  %8676 = vmatpush3.bf16.msra.mxu1 %v9091_v1  ;;  %8668 = vmatmul.mubr.msk.bf16.vlgmr.msra.gmra.mxu0 %vm5608_vm5, %v4693_v18  ;;  %v3389_v57 = vunpack.i.h.s16 %v10279_v49 }
 0xcea   : > { %v4309_v53 = vrot.slane %v4275_v33, %v10168_v37  ;;  %v4389_v15 = vrot.slane %v4355_v5, %v10168_v37  ;;  %v4531_v17 = vsel %vm9766_vm10, %v4484_v51, %v4037_v9  ;;  %8677 = vmatprep.subr.bf16.mxu1 %v11970_v29  ;;  %8684 = vmatpush3.bf16.msra.mxu0 %v10186_v25  ;;  %v3255_v32 = vunpack.i.h.s16 %v10643_v13  ;;  %v9097_v5 = vld [vmem:[%s11944_s10 + $0xf0] sm:$0xff]  }
 0xceb   : > { %v4564_v16 = vsel %vm550_vm2, %v4531_v17, %v4133_v21  ;;  %v3444_v52 = vcombine.high %v10301_v40, %v10301_v40  ;;  %v3510_v50 = vcombine.high %v10415_v60, %v10415_v60  ;;  %8685 = vmatprep.subr.bf16.mxu0 %v11970_v29  ;;  %8691 = vmatprep.mubr.msk.bf16.mxu0 %vm9211_vm0, %v11970_v29  ;;  %v3321_v40 = vunpack.i.h.s16 %v10647_v28 }
 0xcec   : > { %v4611_v42 = vsel %vm9774_vm13, %v4564_v16, %v4213_v23  ;;  %v3576_v25 = vcombine.high %v10418_v43, %v10418_v43  ;;  %v10682_v55 = vcombine.high %v10441_v36, %v10441_v36  ;;  %v10688_v45 = vcombine.high %v10450_v62, %v10450_v62  ;;  %v9098_v62 = vld [vmem:[%s11944_s10 + $0xc8] sm:$0xff]  }
 0xced   : > { %v4644_v60 = vsel %vm1720_vm11, %v4611_v42, %v4309_v53  ;;  %v7827_v31 = vpack.i.b16 %v10643_v13, %v10643_v13  ;;  %v7835_v27 = vpack.i.b16 %v10647_v28, %v10647_v28  ;;  %8678 = vmatpush3.bf16.msra.mxu1 %v9093_v2  ;;  %v7843_v36 = vpack.i.b16 %v10651_v34, %v10651_v34 }
 0xcee   : > { %v4694_v43 = vsel %vm10393_vm7, %v4644_v60, %v4389_v15  ;;  %v7851_v24 = vpack.i.b16 %v3444_v52, %v3444_v52  ;;  %v7859_v6 = vpack.i.b16 %v3510_v50, %v3510_v50  ;;  %8695 = vmatprep.subr.bf16.mxu1 %v11970_v29  ;;  %8686 = vmatpush3.bf16.msra.mxu0 %v9096_v3  ;;  %v3387_v46 = vunpack.i.h.s16 %v10651_v34 }
 0xcef   : > { %v3769_v8 = vrot.slane %v7827_v31, %v10168_v37  ;;  %v3865_v30 = vrot.slane %v7835_v27, %v10168_v37  ;;  %v7867_v1 = vpack.i.b16 %v3576_v25, %v3576_v25  ;;  %8687 = vmatprep.subr.bf16.mxu0 %v11970_v29  ;;  %v3961_v48 = vrot.slane %v7843_v36, %v10168_v37 }
 0xcf0   : > { %v4041_v54 = vrot.slane %v7851_v24, %v10168_v37  ;;  %v4137_v47 = vrot.slane %v7859_v6, %v10168_v37  ;;  %v7875_v18 = vpack.i.b16 %v10682_v55, %v10682_v55  ;;  %8680 = vmatmul.mubr.msk.bf16.vlgmr.msra.gmra.mxu1 %vm5608_vm5, %v4694_v43  ;;  %v7883_v21 = vpack.i.b16 %v10688_v45, %v10688_v45 }
 0xcf1   : > { %v4217_v9 = vrot.slane %v7867_v1, %v10168_v37  ;;  %v4452_v23 = vsel %vm9757_vm8, %v3769_v8, %v3865_v30  ;;  %v3453_v33 = vunpack.i.h.s16 %v3444_v52  ;;  %8696 = vmatpush3.bf16.msra.mxu1 %v10190_v63  ;;  %8703 = vmatprep.mubr.msk.bf16.mxu1 %vm9211_vm0, %v11970_v29  ;;  %v3519_v13 = vunpack.i.h.s16 %v3510_v50  ;;  %v9100_v63 = vld [vmem:[%s11944_s10 + $0xc0] sm:$0xff]  }
 0xcf2   : > { %v4313_v14 = vrot.slane %v7875_v18, %v10168_v37  ;;  %v4488_v51 = vsel %vm1703_vm6, %v4452_v23, %v3961_v48  ;;  %v3585_v28 = vunpack.i.h.s16 %v3576_v25  ;;  %8697 = vmatprep.subr.bf16.mxu1 %v11970_v29  ;;  %8688 = vmatpush3.bf16.msra.mxu0 %v9098_v62  ;;  %v4393_v34 = vrot.slane %v7883_v21, %v10168_v37  ;;  %v9101_v18 = vld [vmem:[%s11944_s10 + $0xe0] sm:$0xff]  }
 0xcf3   : > { %v4532_v2 = vsel %vm9766_vm10, %v4488_v51, %v4041_v54  ;;  %v3651_v53 = vunpack.i.h.s16 %v10682_v55  ;;  %v3717_v15 = vunpack.i.h.s16 %v10688_v45  ;;  %8689 = vmatprep.subr.bf16.mxu0 %v11970_v29  ;;  %v3733_v16 = vpack.i.b16 %v3255_v32, %v3255_v32  ;;  %v9099_v55 = vld [vmem:[%s11944_s10 + $0xe8] sm:$0xff]  }
 0xcf4   : > { %v4568_v17 = vsel %vm550_vm2, %v4532_v2, %v4137_v47  ;;  %v3829_v3 = vpack.i.b16 %v3321_v40, %v3321_v40  ;;  %v3925_v52 = vpack.i.b16 %v3387_v46, %v3387_v46  ;;  %v4005_v42 = vpack.i.b16 %v3453_v33, %v3453_v33 }
 0xcf5   : > { %v4612_v50 = vsel %vm9774_vm13, %v4568_v17, %v4217_v9  ;;  %v4101_v25 = vpack.i.b16 %v3519_v13, %v3519_v13  ;;  %v4181_v60 = vpack.i.b16 %v3585_v28, %v3585_v28  ;;  %8698 = vmatpush3.bf16.msra.mxu1 %v9097_v5  ;;  %v3773_v31 = vrot.slane %v3733_v16, %v10168_v37  ;;  %v9104_v5 = vld [vmem:[%s11944_s10 + $0x110] sm:$0xff]  }
 0xcf6   : > { %v4648_v45 = vsel %vm1720_vm11, %v4612_v50, %v4313_v14  ;;  %v3869_v27 = vrot.slane %v3829_v3, %v10168_v37  ;;  %v3965_v32 = vrot.slane %v3925_v52, %v10168_v37  ;;  %8699 = vmatprep.subr.bf16.mxu1 %v11970_v29  ;;  %8690 = vmatpush3.bf16.msra.mxu0 %v9100_v63  ;;  %v3455_v24 = vunpack.i.h.s16 %v10298_v61 }
 0xcf7   : > { %v4695_v40 = vsel %vm10393_vm7, %v4648_v45, %v4393_v34  ;;  %v4045_v43 = vrot.slane %v4005_v42, %v10168_v37  ;;  %v4141_v36 = vrot.slane %v4101_v25, %v10168_v37  ;;  %8707 = vmatprep.subr.bf16.mxu0 %v11970_v29  ;;  %v4221_v6 = vrot.slane %v4181_v60, %v10168_v37  ;;  %v9111_v42 = vld [vmem:[%s11944_s10 + $0x178] sm:$0x1f]   ;;  %v9106_v25 = vld [vmem:[%s11944_s10 + $0x108] sm:$0xff]  }
 0xcf8   : > { %v4277_v62 = vpack.i.b16 %v3651_v53, %v3651_v53  ;;  %v4357_v8 = vpack.i.b16 %v3717_v15, %v3717_v15  ;;  %v4453_v30 = vsel %vm9757_vm8, %v3773_v31, %v3869_v27  ;;  %v10758_v46 = vrot.slane %v10315_v58, %v9605_v26 }
 0xcf9   : > { %v4492_v1 = vsel %vm1703_vm6, %v4453_v30, %v3965_v32  ;;  %v10762_v48 = vrot.slane %v10326_v38, %v9605_v26  ;;  %v11971_v54 = vpack.c.bf16 %v10223_v59, %v10223_v59  ;;  %8700 = vmatpush3.bf16.msra.mxu1 %v9099_v55  ;;  %8692 = vmatmul.mubr.msk.bf16.vlgmr.msra.gmra.mxu0 %vm5608_vm5, %v4695_v40  ;;  %v3521_v33 = vunpack.i.h.s16 %v10332_v7 }
 0xcfa   : > { %v4317_v9 = vrot.slane %v4277_v62, %v10168_v37  ;;  %v4397_v21 = vrot.slane %v4357_v8, %v10168_v37  ;;  %v4533_v23 = vsel %vm9766_vm10, %v4492_v1, %v4045_v43  ;;  %8701 = vmatprep.subr.bf16.mxu1 %v11970_v29  ;;  %8708 = vmatpush3.bf16.msra.mxu0 %v10193_v39  ;;  %v3587_v13 = vunpack.i.h.s16 %v10758_v46 }
 0xcfb   : > { %v10768_v47 = vrot.slane %v11971_v54, %v9605_v26  ;;  %v4572_v59 = vsel %vm550_vm2, %v4533_v23, %v4141_v36  ;;  %v7828_v51 = vpack.i.b16 %v10242_v11, %v10242_v11  ;;  %8709 = vmatprep.subr.bf16.mxu0 %v11970_v29  ;;  %8715 = vmatprep.mubr.msk.bf16.mxu0 %vm9211_vm0, %v11970_v29  ;;  %v3653_v34 = vunpack.i.h.s16 %v10762_v48  ;;  %v9105_v11 = vld [vmem:[%s11944_s10 + $0x130] sm:$0xff]  }
 0xcfc   : > { %v4613_v28 = vsel %vm9774_vm13, %v4572_v59, %v4221_v6  ;;  %v7836_v39 = vpack.i.b16 %v10252_v22, %v10252_v22  ;;  %v7844_v63 = vpack.i.b16 %v10279_v49, %v10279_v49  ;;  %v7852_v15 = vpack.i.b16 %v10298_v61, %v10298_v61 }
 0xcfd   : > { %v10787_v14 = vrot.slane %v10768_v47, %v9605_v26  ;;  %v4652_v2 = vsel %vm1720_vm11, %v4613_v28, %v4317_v9  ;;  %v3777_v53 = vrot.slane %v7828_v51, %v10168_v37  ;;  %v7860_v17 = vpack.i.b16 %v10332_v7, %v10332_v7  ;;  %8702 = vmatpush3.bf16.msra.mxu1 %v9101_v18 }
 0xcfe   : > { %v4696_v16 = vsel %vm10393_vm7, %v4652_v2, %v4397_v21  ;;  %v3873_v3 = vrot.slane %v7836_v39, %v10168_v37  ;;  %v3969_v52 = vrot.slane %v7844_v63, %v10168_v37  ;;  %v7868_v50 = vpack.i.b16 %v10758_v46, %v10758_v46  ;;  %8719 = vmatprep.subr.bf16.mxu1 %v11970_v29  ;;  %v9107_v63 = vld [vmem:[%s11944_s10 + $0x128] sm:$0xff]  }
 0xcff   : > { %8710 = vmatpush3.bf16.msra.mxu0 %v9104_v5  ;;  %v4049_v60 = vrot.slane %v7852_v15, %v10168_v37  ;;  %v4145_v55 = vrot.slane %v7860_v17, %v10168_v37  ;;  %v7876_v45 = vpack.i.b16 %v10762_v48, %v10762_v48  ;;  %v3719_v31 = vunpack.i.h.s16 %v10787_v14 }
 0xd00   : > { %8711 = vmatprep.subr.bf16.mxu0 %v11970_v29  ;;  %v4225_v27 = vrot.slane %v7868_v50, %v10168_v37  ;;  %v7884_v32 = vpack.i.b16 %v10787_v14, %v10787_v14  ;;  %v4454_v40 = vsel %vm9757_vm8, %v3777_v53, %v3873_v3  ;;  %v3735_v43 = vpack.i.b16 %v3257_v41, %v3257_v41 }
 0xd01   : > { %8704 = vmatmul.mubr.msk.bf16.vlgmr.msra.gmra.mxu1 %vm5608_vm5, %v4696_v16  ;;  %v4321_v36 = vrot.slane %v7876_v45, %v10168_v37  ;;  %v4496_v6 = vsel %vm1703_vm6, %v4454_v40, %v3969_v52  ;;  %v3831_v62 = vpack.i.b16 %v3323_v56, %v3323_v56  ;;  %v3927_v8 = vpack.i.b16 %v3389_v57, %v3389_v57  ;;  %v11975_v40 = vld [vmem:[#allocation3_spill] sm:$0xff] }
 0xd02   : > { %8720 = vmatpush3.bf16.msra.mxu1 %v10196_v0  ;;  %v4401_v41 = vrot.slane %v7884_v32, %v10168_v37  ;;  %v4534_v30 = vsel %vm9766_vm10, %v4496_v6, %v4049_v60  ;;  %8727 = vmatprep.mubr.msk.bf16.mxu1 %vm9211_vm0, %v11970_v29  ;;  %v3781_v22 = vrot.slane %v3735_v43, %v10168_v37  ;;  %v10855_v56 = vsel %vm5612_vm15, %v9111_v42, 0  ;;  %v9108_v0 = vld [vmem:[%s11944_s10 + $0x100] sm:$0xff]  }
 0xd03   : > { %8721 = vmatprep.subr.bf16.mxu1 %v11970_v29  ;;  %8712 = vmatpush3.bf16.msra.mxu0 %v9106_v25  ;;  %v4576_v57 = vsel %vm550_vm2, %v4534_v30, %v4145_v55  ;;  %v3877_v1 = vrot.slane %v3831_v62, %v10168_v37  ;;  %v3973_v54 = vrot.slane %v3927_v8, %v10168_v37  ;;  %v3259_v18 = vunpack.i.h.s16 %v10262_v4  ;;  %v11976_v8 = vld [vmem:[#allocation7_spill] sm:$0xff] }
 0xd04   : > { %8713 = vmatprep.subr.bf16.mxu0 %v11970_v29  ;;  %v4614_v9 = vsel %vm9774_vm13, %v4576_v57, %v4225_v27  ;;  %v4007_v21 = vpack.i.b16 %v3455_v24, %v3455_v24  ;;  %v4103_v23 = vpack.i.b16 %v3521_v33, %v3521_v33  ;;  %v4183_v59 = vpack.i.b16 %v3587_v13, %v3587_v13 }
 0xd05   : > { %v4656_v5 = vsel %vm1720_vm11, %v4614_v9, %v4321_v36  ;;  %v4279_v51 = vpack.i.b16 %v3653_v34, %v3653_v34  ;;  %v4359_v28 = vpack.i.b16 %v3719_v31, %v3719_v31  ;;  %v4455_v39 = vsel %vm9757_vm8, %v3781_v22, %v3877_v1  ;;  %v9112_v36 = vld [vmem:[%s11944_s10 + $0x150] sm:$0xff]  }
 0xd06   : > { %8722 = vmatpush3.bf16.msra.mxu1 %v9105_v11  ;;  %v4697_v2 = vsel %vm10393_vm7, %v4656_v5, %v4401_v41  ;;  %v4053_v53 = vrot.slane %v4007_v21, %v10168_v37  ;;  %v4149_v24 = vrot.slane %v4103_v23, %v10168_v37  ;;  %v4229_v33 = vrot.slane %v4183_v59, %v10168_v37  ;;  %v9118_v59 = vld [vmem:[%s11944_s10 + $0x198] sm:$0x1f]  }
 0xd07   : > { %8723 = vmatprep.subr.bf16.mxu1 %v11970_v29  ;;  %8714 = vmatpush3.bf16.msra.mxu0 %v9108_v0  ;;  %v4325_v13 = vrot.slane %v4279_v51, %v10168_v37  ;;  %v4405_v34 = vrot.slane %v4359_v28, %v10168_v37  ;;  %v4500_v15 = vsel %vm1703_vm6, %v4455_v39, %v3973_v54  ;;  %v3325_v17 = vunpack.i.h.s16 %v10272_v10  ;;  %v9114_v28 = vld [vmem:[%s11944_s10 + $0x148] sm:$0xff]  }
 0xd08   : > { %8731 = vmatprep.subr.bf16.mxu0 %v11970_v29  ;;  %v4535_v16 = vsel %vm9766_vm10, %v4500_v15, %v4053_v53  ;;  %v11972_v3 = vcombine.high %v10306_v20, %v10306_v20  ;;  %v11973_v50 = vcombine.high %v10315_v58, %v10315_v58  ;;  %v3611_v25 = vcombine.high %v10326_v38, %v10326_v38  ;;  %v9109_v58 = vld [vmem:[%s11944_s10 + $0x120] sm:$0xff]  }
 0xd09   : > { %v4580_v60 = vsel %vm550_vm2, %v4535_v16, %v4149_v24  ;;  %v3677_v55 = vcombine.high %v10768_v47, %v10768_v47  ;;  %v7829_v45 = vpack.i.b16 %v10262_v4, %v10262_v4  ;;  %v7837_v20 = vpack.i.b16 %v10272_v10, %v10272_v10  ;;  %v11974_v47 = vld [vmem:[#allocation6_spill] sm:$0xff] }
 0xd0a   : > { %v10894_v52 = vrot.slane %v11972_v3, %v9605_v26  ;;  %v10900_v42 = vrot.slane %v11973_v50, %v9605_v26  ;;  %8724 = vmatpush3.bf16.msra.mxu1 %v9107_v63  ;;  %8716 = vmatmul.mubr.msk.bf16.vlgmr.msra.gmra.mxu0 %vm5608_vm5, %v4697_v2  ;;  %v4615_v38 = vsel %vm9774_vm13, %v4580_v60, %v4229_v33  ;;  %v3391_v32 = vunpack.i.h.s16 %v11974_v47  ;;  %v9119_v24 = vld [vmem:[%s11944_s10 + $0x1b8] sm:$0x1f]   ;;  %v9113_v60 = vld [vmem:[%s11944_s10 + $0x170] sm:$0xff]  }
 0xd0b   : > { %v10918_v31 = vrot.slane %v3611_v25, %v9605_v26  ;;  %v7845_v27 = vpack.i.b16 %v11974_v47, %v11974_v47  ;;  %8725 = vmatprep.subr.bf16.mxu1 %v11970_v29  ;;  %8732 = vmatpush3.bf16.msra.mxu0 %v11975_v40  ;;  %v4660_v43 = vsel %vm1720_vm11, %v4615_v38, %v4325_v13  ;;  %v3457_v11 = vunpack.i.h.s16 %v11976_v8 }
 0xd0c   : > { %v10930_v6 = vrot.slane %v3677_v55, %v9605_v26  ;;  %v3785_v62 = vrot.slane %v7829_v45, %v10168_v37  ;;  %v4698_v41 = vsel %vm10393_vm7, %v4660_v43, %v4405_v34  ;;  %8733 = vmatprep.subr.bf16.mxu0 %v11970_v29  ;;  %8739 = vmatprep.mubr.msk.bf16.mxu0 %vm9211_vm0, %v11970_v29  ;;  %v3523_v0 = vunpack.i.h.s16 %v10894_v52 }
 0xd0d   : > { %v3881_v30 = vrot.slane %v7837_v20, %v10168_v37  ;;  %v3977_v22 = vrot.slane %v7845_v27, %v10168_v37  ;;  %v7853_v57 = vpack.i.b16 %v11976_v8, %v11976_v8  ;;  %v7861_v1 = vpack.i.b16 %v10894_v52, %v10894_v52 }
 0xd0e   : > { %v7869_v54 = vpack.i.b16 %v10900_v42, %v10900_v42  ;;  %v7877_v9 = vpack.i.b16 %v10918_v31, %v10918_v31  ;;  %8726 = vmatpush3.bf16.msra.mxu1 %v9109_v58  ;;  %v7885_v21 = vpack.i.b16 %v10930_v6, %v10930_v6  ;;  %v3589_v5 = vunpack.i.h.s16 %v10900_v42 }
 0xd0f   : > { %v4456_v23 = vsel %vm9757_vm8, %v3785_v62, %v3881_v30  ;;  %v3655_v51 = vunpack.i.h.s16 %v10918_v31  ;;  %8743 = vmatprep.subr.bf16.mxu1 %v11970_v29  ;;  %8734 = vmatpush3.bf16.msra.mxu0 %v9112_v36  ;;  %v4057_v39 = vrot.slane %v7853_v57, %v10168_v37  ;;  %v4153_v63 = vrot.slane %v7861_v1, %v10168_v37 }
 0xd10   : > { %v4233_v2 = vrot.slane %v7869_v54, %v10168_v37  ;;  %v3721_v53 = vunpack.i.h.s16 %v10930_v6  ;;  %8735 = vmatprep.subr.bf16.mxu0 %v11970_v29  ;;  %v4329_v33 = vrot.slane %v7877_v9, %v10168_v37  ;;  %v4409_v13 = vrot.slane %v7885_v21, %v10168_v37 }
 0xd11   : > { %v4504_v34 = vsel %vm1703_vm6, %v4456_v23, %v3977_v22  ;;  %v3737_v15 = vpack.i.b16 %v3259_v18, %v3259_v18  ;;  %8728 = vmatmul.mubr.msk.bf16.vlgmr.msra.gmra.mxu1 %vm5608_vm5, %v4698_v41  ;;  %v3833_v3 = vpack.i.b16 %v3325_v17, %v3325_v17  ;;  %v3929_v50 = vpack.i.b16 %v3391_v32, %v3391_v32  ;;  %v9115_v22 = vld [vmem:[%s11944_s10 + $0x168] sm:$0xff]  }
 0xd12   : > { %v4536_v16 = vsel %vm9766_vm10, %v4504_v34, %v4057_v39  ;;  %v4009_v25 = vpack.i.b16 %v3457_v11, %v3457_v11  ;;  %8744 = vmatpush3.bf16.msra.mxu1 %v10855_v56  ;;  %8751 = vmatprep.mubr.msk.bf16.mxu1 %vm9211_vm0, %v11970_v29  ;;  %v6442_v18 = vsel %vm5612_vm15, %v9118_v59, 0  ;;  %v4105_v20 = vpack.i.b16 %v3523_v0, %v3523_v0  ;;  %v9116_v56 = vld [vmem:[%s11944_s10 + $0x140] sm:$0xff]   ;;  %v11977_v59 = vld [vmem:[#allocation4_spill] sm:$0xff] }
 0xd13   : > { %v4584_v55 = vsel %vm550_vm2, %v4536_v16, %v4153_v63  ;;  %v3789_v45 = vrot.slane %v3737_v15, %v10168_v37  ;;  %8745 = vmatprep.subr.bf16.mxu1 %v11970_v29  ;;  %8736 = vmatpush3.bf16.msra.mxu0 %v9114_v28  ;;  %v3885_v58 = vrot.slane %v3833_v3, %v10168_v37  ;;  %v10998_v27 = vsel %vm5612_vm15, %v9119_v24, 0  ;;  %v9120_v34 = vld [vmem:[%s11944_s10 + $0x190] sm:$0xff]  }
 0xd14   : > { %v4616_v17 = vsel %vm9774_vm13, %v4584_v55, %v4233_v2  ;;  %v3981_v38 = vrot.slane %v3929_v50, %v10168_v37  ;;  %8737 = vmatprep.subr.bf16.mxu0 %v11970_v29  ;;  %v4061_v40 = vrot.slane %v4009_v25, %v10168_v37  ;;  %v4157_v43 = vrot.slane %v4105_v20, %v10168_v37 }
 0xd15   : > { %v4664_v32 = vsel %vm1720_vm11, %v4616_v17, %v4329_v33  ;;  %v4185_v36 = vpack.i.b16 %v3589_v5, %v3589_v5  ;;  %v4281_v11 = vpack.i.b16 %v3655_v51, %v3655_v51  ;;  %v4361_v41 = vpack.i.b16 %v3721_v53, %v3721_v53  ;;  %v11978_v53 = vld [vmem:[#allocation5_spill] sm:$0xff] }
 0xd16   : > { %v4699_v62 = vsel %vm10393_vm7, %v4664_v32, %v4409_v13  ;;  %v4457_v30 = vsel %vm9757_vm8, %v3789_v45, %v3885_v58  ;;  %8746 = vmatpush3.bf16.msra.mxu1 %v9113_v60  ;;  %v3377_v1 = vcombine.high %v10279_v49, %v10279_v49  ;;  %v3443_v54 = vcombine.high %v10298_v61, %v10298_v61 }
 0xd17   : > { %v4237_v0 = vrot.slane %v4185_v36, %v10168_v37  ;;  %v4508_v57 = vsel %vm1703_vm6, %v4457_v30, %v3981_v38  ;;  %8747 = vmatprep.subr.bf16.mxu1 %v11970_v29  ;;  %8738 = vmatpush3.bf16.msra.mxu0 %v9116_v56  ;;  %v4333_v9 = vrot.slane %v4281_v11, %v10168_v37  ;;  %v3261_v5 = vunpack.i.h.s16 %v11977_v59 }
 0xd18   : > { %v4413_v21 = vrot.slane %v4361_v41, %v10168_v37  ;;  %v4537_v23 = vsel %vm9766_vm10, %v4508_v57, %v4061_v40  ;;  %8755 = vmatprep.subr.bf16.mxu0 %v11970_v29  ;;  %v3509_v49 = vcombine.high %v10332_v7, %v10332_v7  ;;  %v11029_v61 = vcombine.high %v10758_v46, %v10758_v46  ;;  %v9117_v46 = vld [vmem:[%s11944_s10 + $0x160] sm:$0xff]   ;;  %v9122_v40 = vld [vmem:[%s11944_s10 + $0x188] sm:$0xff]  }
 0xd19   : > { %v4588_v51 = vsel %vm550_vm2, %v4537_v23, %v4157_v43  ;;  %v11033_v28 = vcombine.high %v10762_v48, %v10762_v48  ;;  %v11039_v63 = vcombine.high %v10787_v14, %v10787_v14  ;;  %v7830_v2 = vpack.i.b16 %v11977_v59, %v11977_v59 }
 0xd1a   : > { %v4617_v39 = vsel %vm9774_vm13, %v4588_v51, %v4237_v0  ;;  %v7838_v7 = vpack.i.b16 %v11978_v53, %v11978_v53  ;;  %8748 = vmatpush3.bf16.msra.mxu1 %v9115_v22  ;;  %8740 = vmatmul.mubr.msk.bf16.vlgmr.msra.gmra.mxu0 %vm5608_vm5, %v4699_v62  ;;  %v7846_v24 = vpack.i.b16 %v3377_v1, %v3377_v1  ;;  %v3327_v14 = vunpack.i.h.s16 %v11978_v53 }
 0xd1b   : > { %v4668_v48 = vsel %vm1720_vm11, %v4617_v39, %v4333_v9  ;;  %v7854_v33 = vpack.i.b16 %v3443_v54, %v3443_v54  ;;  %8749 = vmatprep.subr.bf16.mxu1 %v11970_v29  ;;  %8756 = vmatpush3.bf16.msra.mxu0 %v6442_v18  ;;  %v3793_v15 = vrot.slane %v7830_v2, %v10168_v37  ;;  %v3393_v3 = vunpack.i.h.s16 %v3377_v1 }
 0xd1c   : > { %v4700_v13 = vsel %vm10393_vm7, %v4668_v48, %v4413_v21  ;;  %v3889_v16 = vrot.slane %v7838_v7, %v10168_v37  ;;  %8757 = vmatprep.subr.bf16.mxu0 %v11970_v29  ;;  %8763 = vmatprep.mubr.msk.bf16.mxu0 %vm9211_vm0, %v11970_v29  ;;  %v3985_v50 = vrot.slane %v7846_v24, %v10168_v37  ;;  %v3459_v60 = vunpack.i.h.s16 %v3443_v54  ;;  %v9121_v21 = vld [vmem:[%s11944_s10 + $0x1b0] sm:$0xff]   ;;  %v9123_v24 = vld [vmem:[%s11944_s10 + $0x1a8] sm:$0xff]  }
 0xd1d   : > { %v7862_v25 = vpack.i.b16 %v3509_v49, %v3509_v49  ;;  %v3525_v55 = vunpack.i.h.s16 %v3509_v49  ;;  %v7870_v18 = vpack.i.b16 %v11029_v61, %v11029_v61  ;;  %v7878_v45 = vpack.i.b16 %v11033_v28, %v11033_v28  ;;  %v9126_v49 = vld [vmem:[%s11944_s10 + $0x1d8] sm:$0x1f]  }
 0xd1e   : > { %v7886_v20 = vpack.i.b16 %v11039_v63, %v11039_v63  ;;  %v4458_v56 = vsel %vm9757_vm8, %v3793_v15, %v3889_v16  ;;  %8750 = vmatpush3.bf16.msra.mxu1 %v9117_v46  ;;  %v4065_v17 = vrot.slane %v7854_v33, %v10168_v37  ;;  %v3591_v32 = vunpack.i.h.s16 %v11029_v61 }
 0xd1f   : > { %v4161_v58 = vrot.slane %v7862_v25, %v10168_v37  ;;  %v4512_v38 = vsel %vm1703_vm6, %v4458_v56, %v3985_v50  ;;  %8767 = vmatprep.subr.bf16.mxu1 %v11970_v29  ;;  %8758 = vmatpush3.bf16.msra.mxu0 %v9120_v34  ;;  %v4241_v43 = vrot.slane %v7870_v18, %v10168_v37  ;;  %v3657_v11 = vunpack.i.h.s16 %v11033_v28 }
 0xd20   : > { %v4337_v36 = vrot.slane %v7878_v45, %v10168_v37  ;;  %v4417_v62 = vrot.slane %v7886_v20, %v10168_v37  ;;  %8759 = vmatprep.subr.bf16.mxu0 %v11970_v29  ;;  %v4538_v41 = vsel %vm9766_vm10, %v4512_v38, %v4065_v17  ;;  %v3739_v30 = vpack.i.b16 %v3261_v5, %v3261_v5  ;;  %v9128_v38 = vld [vmem:[%s11944_s10 + $0x1d0] sm:$0xff]  }
 0xd21   : > { %v3835_v22 = vpack.i.b16 %v3327_v14, %v3327_v14  ;;  %v3931_v0 = vpack.i.b16 %v3393_v3, %v3393_v3  ;;  %8752 = vmatmul.mubr.msk.bf16.vlgmr.msra.gmra.mxu1 %vm5608_vm5, %v4700_v13  ;;  %v4592_v57 = vsel %vm550_vm2, %v4538_v41, %v4161_v58  ;;  %v3723_v1 = vunpack.i.h.s16 %v11039_v63  ;;  %v9127_v58 = vld [vmem:[%s11944_s10 + $0x1f8] sm:$0x1f]  }
 0xd22   : > { %v4011_v54 = vpack.i.b16 %v3459_v60, %v3459_v60  ;;  %v4107_v9 = vpack.i.b16 %v3525_v55, %v3525_v55  ;;  %8768 = vmatpush3.bf16.msra.mxu1 %v10998_v27  ;;  %v4618_v23 = vsel %vm9774_vm13, %v4592_v57, %v4241_v43  ;;  %8775 = vmatprep.mubr.msk.bf16.mxu1 %vm9211_vm0, %v11970_v29  ;;  %v9124_v27 = vld [vmem:[%s11944_s10 + $0x180] sm:$0xff]  }
 0xd23   : > { %v3797_v59 = vrot.slane %v3739_v30, %v10168_v37  ;;  %v3893_v5 = vrot.slane %v3835_v22, %v10168_v37  ;;  %8769 = vmatprep.subr.bf16.mxu1 %v11970_v29  ;;  %8760 = vmatpush3.bf16.msra.mxu0 %v9122_v40  ;;  %v4672_v51 = vsel %vm1720_vm11, %v4618_v23, %v4337_v36  ;;  %v6649_v30 = vsel %vm5612_vm15, %v9127_v58, 0  ;;  %v9130_v22 = vld [vmem:[%s11944_s10 + $0x1c8] sm:$0xff]  }
 0xd24   : > { %v3989_v61 = vrot.slane %v3931_v0, %v10168_v37  ;;  %v4187_v28 = vpack.i.b16 %v3591_v32, %v3591_v32  ;;  %8761 = vmatprep.subr.bf16.mxu0 %v11970_v29  ;;  %v4701_v39 = vsel %vm10393_vm7, %v4672_v51, %v4417_v62  ;;  %v4069_v63 = vrot.slane %v4011_v54, %v10168_v37  ;;  %v9129_v51 = vld [vmem:[%s11944_s10 + $0x1f0] sm:$0xff]  }
 0xd25   : > { %v4283_v2 = vpack.i.b16 %v3657_v11, %v3657_v11  ;;  %v4363_v53 = vpack.i.b16 %v3723_v1, %v3723_v1  ;;  %v4459_v7 = vsel %vm9757_vm8, %v3797_v59, %v3893_v5  ;;  %v11116_v46 = vcombine.high %v10262_v4, %v10262_v4 }
 0xd26   : > { %v11120_v48 = vcombine.high %v10272_v10, %v10272_v10  ;;  %8770 = vmatpush3.bf16.msra.mxu1 %v9121_v21  ;;  %v4165_v33 = vrot.slane %v4107_v9, %v10168_v37  ;;  %v4516_v14 = vsel %vm1703_vm6, %v4459_v7, %v3989_v61  ;;  %v11129_v13 = vcombine.high %v11974_v47, %v11974_v47 }
 0xd27   : > { %v11133_v4 = vcombine.high %v11976_v8, %v11976_v8  ;;  %8771 = vmatprep.subr.bf16.mxu1 %v11970_v29  ;;  %8762 = vmatpush3.bf16.msra.mxu0 %v9124_v27  ;;  %v6580_v10 = vsel %vm5612_vm15, %v9126_v49, 0  ;;  %v4245_v34 = vrot.slane %v4187_v28, %v10168_v37  ;;  %v4539_v15 = vsel %vm9766_vm10, %v4516_v14, %v4069_v63  ;;  %v11140_v16 = vpop.f32.mrf.mxu1  ;;  %v9131_v14 = vld [vmem:[%s11944_s10 + $0x1e8] sm:$0xff]  }
 0xd28   : > { %8779 = vmatprep.subr.bf16.mxu0 %v11970_v29  ;;  %v4341_v47 = vrot.slane %v4283_v2, %v10168_v37  ;;  %v4421_v3 = vrot.slane %v4363_v53, %v10168_v37  ;;  %v4596_v8 = vsel %vm550_vm2, %v4539_v15, %v4165_v33  ;;  %v11148_v50 = vcombine.high %v10894_v52, %v10894_v52  ;;  %v9125_v52 = vld [vmem:[%s11944_s10 + $0x1a0] sm:$0xff]   ;;  %v9134_v53 = vld [vmem:[%s11945_s11 + $0x38] ss:$0 sps:$4 sm:$0x77]  }
 0xd29   : > { %v4619_v25 = vsel %vm9774_vm13, %v4596_v8, %v4245_v34  ;;  %v8511_v60 = vpop.f32.mrf.mxu1  ;;  %v11154_v55 = vcombine.high %v10900_v42, %v10900_v42  ;;  %v7831_v18 = vpack.i.b16 %v11116_v46, %v11116_v46  ;;  %v7839_v45 = vpack.i.b16 %v11120_v48, %v11120_v48 }
 0xd2a   : > { %8772 = vmatpush3.bf16.msra.mxu1 %v9123_v24  ;;  %8764 = vmatmul.mubr.msk.bf16.vlgmr.msra.gmra.mxu0 %vm5608_vm5, %v4701_v39  ;;  %v4676_v20 = vsel %vm1720_vm11, %v4619_v25, %v4341_v47  ;;  %v7847_v56 = vpack.i.b16 %v11129_v13, %v11129_v13  ;;  %v7855_v42 = vpack.i.b16 %v11133_v4, %v11133_v4  ;;  %v3263_v23 = vunpack.i.h.s16 %v11116_v46 }
 0xd2b   : > { %8773 = vmatprep.subr.bf16.mxu1 %v11970_v29  ;;  %8780 = vmatpush3.bf16.msra.mxu0 %v6580_v10  ;;  %v4702_v17 = vsel %vm10393_vm7, %v4676_v20, %v4421_v3  ;;  %v1856_v32 = vpop.f32.mrf.mxu1  ;;  %v3801_v40 = vrot.slane %v7831_v18, %v10168_v37  ;;  %v3897_v43 = vrot.slane %v7839_v45, %v10168_v37  ;;  %v3329_v5 = vunpack.i.h.s16 %v11120_v48 }
 0xd2c   : > { %8781 = vmatprep.subr.bf16.mxu0 %v11970_v29  ;;  %8787 = vmatprep.mubr.msk.bf16.mxu0 %vm9211_vm0, %v11970_v29  ;;  %v3993_v36 = vrot.slane %v7847_v56, %v10168_v37  ;;  %v7863_v62 = vpack.i.b16 %v11148_v50, %v11148_v50  ;;  %v3643_v0 = vcombine.high %v10918_v31, %v10918_v31  ;;  %v3395_v46 = vunpack.i.h.s16 %v11129_v13 }
 0xd2d   : > { %v8512_v11 = vpop.f32.mrf.mxu1  ;;  %v4460_v41 = vsel %vm9757_vm8, %v3801_v40, %v3897_v43  ;;  %v4073_v57 = vrot.slane %v7855_v42, %v10168_v37  ;;  %v7871_v1 = vpack.i.b16 %v11154_v55, %v11154_v55  ;;  %v3709_v9 = vcombine.high %v10930_v6, %v10930_v6  ;;  %v9132_v6 = vld [vmem:[%s11944_s10 + $0x1c0] sm:$0xff]  }
 0xd2e   : > { %8774 = vmatpush3.bf16.msra.mxu1 %v9125_v52  ;;  %v4520_v21 = vsel %vm1703_vm6, %v4460_v41, %v3993_v36  ;;  %v4169_v31 = vrot.slane %v7863_v62, %v10168_v37  ;;  %v7879_v61 = vpack.i.b16 %v3643_v0, %v3643_v0  ;;  %v3741_v2 = vpack.i.b16 %v3263_v23, %v3263_v23  ;;  %v9133_v52 = vld [vmem:[%s11944_s10 + $0x1e0] sm:$0xff]   ;;  %v9136_v36 = vld [vmem:[%s11945_s11 + $0x30] sm:$0xff]  }
 0xd2f   : > { %8791 = vmatprep.subr.bf16.mxu1 %v11970_v29  ;;  %8782 = vmatpush3.bf16.msra.mxu0 %v9128_v38  ;;  %v11198_v54 = vpop.f32.mrf.mxu1  ;;  %v4540_v59 = vsel %vm9766_vm10, %v4520_v21, %v4073_v57  ;;  %v4249_v49 = vrot.slane %v7871_v1, %v10168_v37  ;;  %v7887_v63 = vpack.i.b16 %v3709_v9, %v3709_v9  ;;  %v3461_v48 = vunpack.i.h.s16 %v11133_v4 }
 0xd30   : > { %8783 = vmatprep.subr.bf16.mxu0 %v11970_v29  ;;  %v4600_v28 = vsel %vm550_vm2, %v4540_v59, %v4169_v31  ;;  %v3837_v24 = vpack.i.b16 %v3329_v5, %v3329_v5  ;;  %v3527_v10 = vunpack.i.h.s16 %v11148_v50  ;;  %v3593_v34 = vunpack.i.h.s16 %v11154_v55  ;;  %v9138_v31 = vld [vmem:[%s11945_s11 + $0x28] sm:$0xff]  }
 0xd31   : > { %8776 = vmatmul.mubr.msk.bf16.vlgmr.msra.gmra.mxu1 %vm5608_vm5, %v4702_v17  ;;  %v8525_v27 = vpop.f32.mrf.mxu1  ;;  %v4620_v7 = vsel %vm9774_vm13, %v4600_v28, %v4249_v49  ;;  %v4345_v15 = vrot.slane %v7879_v61, %v10168_v37  ;;  %v3659_v47 = vunpack.i.h.s16 %v3643_v0  ;;  %v4425_v4 = vrot.slane %v7887_v63, %v10168_v37  ;;  %v9137_v49 = vld [vmem:[%s11945_s11 + $0x6c] sm:$0xff]   ;;  %v9140_v61 = vld [vmem:[%s11945_s11 + $0x20] sm:$0xff]  }
 0xd32   : > { %8792 = vmatpush3.bf16.msra.mxu1 %v6649_v30  ;;  %8799 = vmatprep.mubr.msk.bf16.mxu1 %vm9211_vm0, %v11970_v29  ;;  %v3725_v3 = vunpack.i.h.s16 %v3709_v9  ;;  %v3805_v8 = vrot.slane %v3741_v2, %v10168_v37  ;;  %v6893_v25 = vsel %vm1720_vm11, %v9134_v53, 0  ;;  %v3901_v60 = vrot.slane %v3837_v24, %v10168_v37  ;;  %v9135_v30 = vld [vmem:[%s11945_s11 + $0x74] ss:$0 sps:$4 sm:$0x77]   ;;  %v9139_v63 = vld [vmem:[%s11945_s11 + $0x64] sm:$0xff]   ;;  %v9142_v53 = vld [vmem:[%s11945_s11 + $0x18] sm:$0xff]  }
 0xd33   : > { %8793 = vmatprep.subr.bf16.mxu1 %v11970_v29  ;;  %8784 = vmatpush3.bf16.msra.mxu0 %v9130_v22  ;;  %v2047_v39 = vpop.f32.mrf.mxu1  ;;  %v4680_v50 = vsel %vm1720_vm11, %v4620_v7, %v4345_v15  ;;  %v3933_v55 = vpack.i.b16 %v3395_v46, %v3395_v46  ;;  %v4013_v18 = vpack.i.b16 %v3461_v48, %v3461_v48  ;;  %v6984_v27 = vsel %vm1720_vm11, %v9135_v30, 0  ;;  %v9141_v46 = vld [vmem:[%s11945_s11 + $0x5c] sm:$0xff]   ;;  %v9144_v24 = vld [vmem:[%s11945_s11 + $0x10] sm:$0xff]  }
 0xd34   : > { %8785 = vmatprep.subr.bf16.mxu0 %v11970_v29  ;;  %v4703_v20 = vsel %vm10393_vm7, %v4680_v50, %v4425_v4  ;;  %v4109_v56 = vpack.i.b16 %v3527_v10, %v3527_v10  ;;  %v4189_v42 = vpack.i.b16 %v3593_v34, %v3593_v34  ;;  %v4285_v58 = vpack.i.b16 %v3659_v47, %v3659_v47  ;;  %v1810_v10 = vpop.permute.xlu0 %1809  ;;  %v9146_v47 = vld [vmem:[%s11945_s11 + $0x8] sm:$0xff]  }
 0xd35   : > { %v8526_v33 = vpop.f32.mrf.mxu1  ;;  %v3997_v17 = vrot.slane %v3933_v55, %v10168_v37  ;;  %v4077_v32 = vrot.slane %v4013_v18, %v10168_v37  ;;  %v4365_v40 = vpack.i.b16 %v3725_v3, %v3725_v3  ;;  %v4461_v43 = vsel %vm9757_vm8, %v3805_v8, %v3901_v60  ;;  %v9145_v8 = vld [vmem:[%s11945_s11 + $0x4c] sm:$0xff]   ;;  %v9148_v55 = vld [vmem:[%s11945_s11] sm:$0xff]  }
 0xd36   : > { %8794 = vmatpush3.bf16.msra.mxu1 %v9129_v51  ;;  %v4173_v62 = vrot.slane %v4109_v56, %v10168_v37  ;;  %v4253_v22 = vrot.slane %v4189_v42, %v10168_v37  ;;  %v4349_v57 = vrot.slane %v4285_v58, %v10168_v37  ;;  %v2045_v15 = vadd.f32 %v11198_v54, %v1810_v10 }
 0xd37   : > { %8795 = vmatprep.subr.bf16.mxu1 %v11970_v29  ;;  %8786 = vmatpush3.bf16.msra.mxu0 %v9132_v6  ;;  %v11236_v13 = vpop.f32.mrf.mxu1  ;;  %v4524_v11 = vsel %vm1703_vm6, %v4461_v43, %v3997_v17  ;;  %v4429_v21 = vrot.slane %v4365_v40, %v10168_v37  ;;  %v1854_v3 = vadd.f32 %v11140_v16, %v1810_v10  ;;  %v9149_v43 = vld [vmem:[%s11945_s11 + $0x3c] sm:$0xff]  }
 0xd38   : > { %8803 = vmatprep.subr.bf16.mxu0 %v11970_v29  ;;  %v4541_v0 = vsel %vm9766_vm10, %v4524_v11, %v4077_v32  ;;  %v2050_v54 = vmax.f32 %v2045_v15, 0.0 }
 0xd39   : > { %v8539_v45 = vpop.f32.mrf.mxu1  ;;  %v4604_v1 = vsel %vm550_vm2, %v4541_v0, %v4173_v62  ;;  %v1859_v16 = vmax.f32 %v1854_v3, 0.0 }
 0xd3a   : > { %8796 = vmatpush3.bf16.msra.mxu1 %v9131_v14  ;;  %8788 = vmatmul.mubr.msk.bf16.vlgmr.msra.gmra.mxu0 %vm5608_vm5, %v4703_v20  ;;  %v4621_v23 = vsel %vm9774_vm13, %v4604_v1, %v4253_v22  ;;  %v9143_v14 = vld [vmem:[%s11945_s11 + $0x54] sm:$0xff]   ;;  %v2051_v42 = vpack.c.bf16 %v2050_v54, %v2050_v54 }
 0xd3b   : > { %8797 = vmatprep.subr.bf16.mxu1 %v11970_v29  ;;  %v2238_v38 = vpop.f32.mrf.mxu1  ;;  %8804 = vmatpush3.bf16.msra.mxu0 %v6893_v25  ;;  %v4684_v59 = vsel %vm1720_vm11, %v4621_v23, %v4349_v57  ;;  %v2236_v25 = vadd.f32 %v11236_v13, %v1810_v10  ;;  %v9147_v13 = vld [vmem:[%s11945_s11 + $0x44] sm:$0xff]   ;;  %v1860_v32 = vpack.c.bf16 %v1859_v16, %v1859_v16 }
 0xd3c   : > { %8805 = vmatprep.subr.bf16.mxu0 %v11970_v29  ;;  %8819 = vmatprep.mubr.msk.bf16.mxu0 %vm9211_vm0, %v11970_v29  ;;  %v4704_v51 = vsel %vm10393_vm7, %v4684_v59, %v4429_v21  ;;  %v11339_v11 = vrot.slane %v2051_v42, %v9605_v26 }
 0xd3d   : > { %v8540_v41 = vpop.f32.mrf.mxu1  ;;  %v2241_v20 = vmax.f32 %v2236_v25, 0.0  ;;  %v11342_v57 = vrot.slane %v1860_v32, %v9605_v26 }
 0xd3e   : > { %8798 = vmatpush3.bf16.msra.mxu1 %v9133_v52  ;;  %v11350_v23 = vrot.slane %v11339_v11, %v9605_v26 }
 0xd3f   : > { %v2426_v9 = vpop.f32.mrf.mxu1  ;;  %8823 = vmatprep.subr.bf16.mxu1 %v11970_v29  ;;  %8806 = vmatpush3.bf16.msra.mxu0 %v9136_v36  ;;  %v2242_v36 = vpack.c.bf16 %v2241_v20, %v2241_v20 }
 0xd40   : > { %8807 = vmatprep.subr.bf16.mxu0 %v11970_v29  ;;  %v2427_v60 = vadd.f32 %v2426_v9, %v1810_v10 }
 0xd41   : > { %v8553_v5 = vpop.f32.mrf.mxu1  ;;  %8800 = vmatmul.mubr.msk.bf16.vlgmr.msra.gmra.mxu1 %vm5608_vm5, %v4704_v51  ;;  %v11345_v9 = vrot.slane %v2242_v36, %v9605_v26  ;;  %v11360_v51 = vrot.slane %v11342_v57, %v9605_v26 }
 0xd42   : > { %8824 = vmatpush3.bf16.msra.mxu1 %v6984_v27  ;;  %8839 = vmatprep.mubr.msk.bf16.mxu1 %vm9211_vm0, %v11970_v29  ;;  %v2432_v17 = vmax.f32 %v2427_v60, 0.0 }
 0xd43   : > { %v2429_v6 = vpop.f32.mrf.mxu1  ;;  %8808 = vmatpush3.bf16.msra.mxu0 %v9138_v31  ;;  %8825 = vmatprep.subr.bf16.mxu1 %v11970_v29  ;;  %v7888_v15 = vpack.i.b16 %v11360_v51, %v11360_v51 }
 0xd44   : > { %8809 = vmatprep.subr.bf16.mxu0 %v11970_v29  ;;  %v2433_v41 = vpack.c.bf16 %v2432_v17, %v2432_v17 }
 0xd45   : > { %v8554_v28 = vpop.f32.mrf.mxu1 }
 0xd46   : > { %8826 = vmatpush3.bf16.msra.mxu1 %v9137_v49  ;;  %v11353_v31 = vrot.slane %v2433_v41, %v9605_v26  ;;  %v11367_v49 = vrot.slane %v11345_v9, %v9605_v26 }
 0xd47   : > { %v2617_v39 = vpop.f32.mrf.mxu1  ;;  %8810 = vmatpush3.bf16.msra.mxu0 %v9140_v61  ;;  %8827 = vmatprep.subr.bf16.mxu1 %v11970_v29 }
 0xd48   : > { %8811 = vmatprep.subr.bf16.mxu0 %v11970_v29  ;;  %v2618_v18 = vadd.f32 %v2617_v39, %v1810_v10  ;;  %v4764_v39 = vunpack.i.h.s16 %v11350_v23 }
 0xd49   : > { %v8567_v2 = vpop.f32.mrf.mxu1 }
 0xd4a   : > { %8828 = vmatpush3.bf16.msra.mxu1 %v9139_v63  ;;  %v2623_v58 = vmax.f32 %v2618_v18, 0.0  ;;  %v11372_v63 = vrot.slane %v11353_v31, %v9605_v26 }
 0xd4b   : > { %v2620_v7 = vpop.f32.mrf.mxu1  ;;  %8829 = vmatprep.subr.bf16.mxu1 %v11970_v29  ;;  %8812 = vmatpush3.bf16.msra.mxu0 %v9142_v53 }
 0xd4c   : > { %8813 = vmatprep.subr.bf16.mxu0 %v11970_v29  ;;  %v2624_v30 = vpack.c.bf16 %v2623_v58, %v2623_v58  ;;  %v4731_v7 = vunpack.i.h.s16 %v11360_v51  ;;  %v4980_v58 = vrot.slane %v7888_v15, %v10168_v37 }
 0xd4d   : > { %v8568_v48 = vpop.f32.mrf.mxu1 }
 0xd4e   : > { %8830 = vmatpush3.bf16.msra.mxu1 %v9141_v46  ;;  %v11356_v59 = vrot.slane %v2624_v30, %v9605_v26  ;;  %v7892_v48 = vpack.i.b16 %v11350_v23, %v11350_v23  ;;  %v4970_v3 = vpack.i.b16 %v4731_v7, %v4731_v7 }
 0xd4f   : > { %v2808_v33 = vpop.f32.mrf.mxu1  ;;  %8831 = vmatprep.subr.bf16.mxu1 %v11970_v29  ;;  %8814 = vmatpush3.bf16.msra.mxu0 %v9144_v24  ;;  %v4797_v24 = vunpack.i.h.s16 %v11367_v49 }
 0xd50   : > { %8815 = vmatprep.subr.bf16.mxu0 %v11970_v29  ;;  %v2809_v52 = vadd.f32 %v2808_v33, %v1810_v10  ;;  %v11376_v2 = vrot.slane %v11356_v59, %v9605_v26  ;;  %v5028_v54 = vrot.slane %v7892_v48, %v10168_v37 }
 0xd51   : > { %v8581_v34 = vpop.f32.mrf.mxu1  ;;  %v5066_v60 = vpack.i.b16 %v4797_v24, %v4797_v24 }
 0xd52   : > { %8832 = vmatpush3.bf16.msra.mxu1 %v9143_v14  ;;  %v2814_v40 = vmax.f32 %v2809_v52, 0.0  ;;  %v4830_v34 = vunpack.i.h.s16 %v11372_v63  ;;  %v5329_v41 = vsel %vm9757_vm8, %v4980_v58, %v5028_v54  ;;  %v9155_v58 = vld [vmem:[%s11945_s11 + $0xdc] sm:$0xff]  }
 0xd53   : > { %v2811_v4 = vpop.f32.mrf.mxu1  ;;  %8833 = vmatprep.subr.bf16.mxu1 %v11970_v29  ;;  %8816 = vmatpush3.bf16.msra.mxu0 %v9146_v47  ;;  %v7896_v47 = vpack.i.b16 %v11367_v49, %v11367_v49 }
 0xd54   : > { %8817 = vmatprep.subr.bf16.mxu0 %v11970_v29  ;;  %v2815_v1 = vpack.c.bf16 %v2814_v40, %v2814_v40  ;;  %v4863_v4 = vunpack.i.h.s16 %v11376_v2  ;;  %v5106_v16 = vpack.i.b16 %v4830_v34, %v4830_v34  ;;  %v4984_v40 = vrot.slane %v4970_v3, %v10168_v37 }
 0xd55   : > { %v8582_v50 = vpop.f32.mrf.mxu1  ;;  %v5076_v20 = vrot.slane %v7896_v47, %v10168_v37 }
 0xd56   : > { %8834 = vmatpush3.bf16.msra.mxu1 %v9145_v8  ;;  %v11363_v6 = vrot.slane %v2815_v1, %v9605_v26  ;;  %v7900_v8 = vpack.i.b16 %v11372_v63, %v11372_v63  ;;  %v5120_v30 = vrot.slane %v5106_v16, %v10168_v37 }
 0xd57   : > { %v2999_v45 = vpop.f32.mrf.mxu1  ;;  %8835 = vmatprep.subr.bf16.mxu1 %v11970_v29  ;;  %8818 = vmatpush3.bf16.msra.mxu0 %v9148_v55  ;;  %v7904_v55 = vpack.i.b16 %v11376_v2, %v11376_v2 }
 0xd58   : > { %8843 = vmatprep.subr.bf16.mxu0 %v11970_v29  ;;  %v3000_v22 = vadd.f32 %v2999_v45, %v1810_v10  ;;  %v11381_v46 = vrot.slane %v11363_v6, %v9605_v26 }
 0xd59   : > { %v8595_v56 = vpop.f32.mrf.mxu1  ;;  %v5164_v36 = vrot.slane %v7904_v55, %v10168_v37 }
 0xd5a   : > { %8836 = vmatpush3.bf16.msra.mxu1 %v9147_v13  ;;  %v3005_v5 = vmax.f32 %v3000_v22, 0.0  ;;  %v4896_v25 = vunpack.i.h.s16 %v11381_v46  ;;  %v7908_v52 = vpack.i.b16 %v11381_v46, %v11381_v46  ;;  %v5154_v56 = vpack.i.b16 %v4863_v4, %v4863_v4 }
 0xd5b   : > { %v3002_v38 = vpop.f32.mrf.mxu1  ;;  %8837 = vmatprep.subr.bf16.mxu1 %v11970_v29 }
 0xd5c   : > { %v3006_v53 = vpack.c.bf16 %v3005_v5, %v3005_v5  ;;  %v5116_v38 = vrot.slane %v7900_v8, %v10168_v37  ;;  %v5194_v32 = vpack.i.b16 %v4896_v25, %v4896_v25  ;;  %v5204_v22 = vrot.slane %v7908_v52, %v10168_v37  ;;  %v9152_v52 = vld [vmem:[%s11945_s11 + $0xa8] sm:$0xff]  }
 0xd5d   : > { %v8596_v62 = vpop.f32.mrf.mxu1  ;;  %v5168_v5 = vrot.slane %v5154_v56, %v10168_v37  ;;  %v9154_v56 = vld [vmem:[%s11945_s11 + $0xa0] sm:$0xff]  }
 0xd5e   : > { %8838 = vmatpush3.bf16.msra.mxu1 %v9149_v43  ;;  %v11387_v33 = vrot.slane %v3006_v53, %v9605_v26  ;;  %v5080_v43 = vrot.slane %v5066_v60, %v10168_v37 }
 0xd5f   : > { %v3190_v0 = vpop.f32.mrf.mxu1  ;;  %8863 = vmatprep.subr.bf16.mxu1 %v11970_v29 }
 0xd60   : > { %v3191_v61 = vadd.f32 %v3190_v0, %v1810_v10  ;;  %v5018_v10 = vpack.i.b16 %v4764_v39, %v4764_v39  ;;  %v11400_v50 = vrot.slane %v11387_v33, %v9605_v26 }
 0xd61   : > { %v8609_v21 = vpop.f32.mrf.mxu1 }
 0xd62   : > { %v3196_v14 = vmax.f32 %v3191_v61, 0.0  ;;  %v5032_v45 = vrot.slane %v5018_v10, %v10168_v37  ;;  %v4929_v13 = vunpack.i.h.s16 %v11400_v50  ;;  %v7912_v42 = vpack.i.b16 %v11400_v50, %v11400_v50  ;;  %v9150_v61 = vld [vmem:[%s11945_s11 + $0xb0] ss:$0 sps:$4 sm:$0x77]  }
 0xd63   : > { %v3193_v27 = vpop.f32.mrf.mxu1  ;;  %v5339_v21 = vsel %vm1703_vm6, %v5329_v41, %v5076_v20  ;;  %v9151_v10 = vld [vmem:[%s11945_s11 + $0xec] ss:$0 sps:$4 sm:$0x77]   ;;  %v7075_v8 = vsel %vm1720_vm11, %v9150_v61, 0  ;;  %v4713_v20 = vcombine.high %v11342_v57, %v11342_v57  ;;  %v4812_v57 = vcombine.high %v11353_v31, %v11353_v31  ;;  %v9157_v31 = vld [vmem:[%s11945_s11 + $0xd4] sm:$0xff]  }
 0xd64   : > { %v3197_v18 = vpack.c.bf16 %v3196_v14, %v3196_v14  ;;  %v5242_v62 = vpack.i.b16 %v4929_v13, %v4929_v13  ;;  %v5330_v1 = vsel %vm9757_vm8, %v4984_v40, %v5032_v45  ;;  %v5252_v27 = vrot.slane %v7912_v42, %v10168_v37  ;;  %v9153_v13 = vld [vmem:[%s11945_s11 + $0xe4] sm:$0xff]  }
 0xd65   : > { %v8610_v28 = vpop.f32.mrf.mxu1  ;;  %v5369_v7 = vsel %vm9766_vm10, %v5339_v21, %v5116_v38  ;;  %v5343_v14 = vsel %vm1703_vm6, %v5330_v1, %v5080_v43  ;;  %v7166_v45 = vsel %vm1720_vm11, %v9151_v10, 0  ;;  %v4746_v42 = vcombine.high %v11339_v11, %v11339_v11  ;;  %v9156_v11 = vld [vmem:[%s11945_s11 + $0x98] sm:$0xff]  }
 0xd66   : > { %v11413_v17 = vrot.slane %v3197_v18, %v9605_v26  ;;  %v5208_v28 = vrot.slane %v5194_v32, %v10168_v37  ;;  %v5379_v48 = vsel %vm550_vm2, %v5369_v7, %v5164_v36  ;;  %v5256_v24 = vrot.slane %v5242_v62, %v10168_v37 }
 0xd67   : > { %v5409_v47 = vsel %vm9774_vm13, %v5379_v48, %v5204_v22  ;;  %v5370_v4 = vsel %vm9766_vm10, %v5343_v14, %v5120_v30  ;;  %v4779_v38 = vcombine.high %v11345_v9, %v11345_v9  ;;  %v11496_v32 = vrot.slane %v4713_v20, %v9605_v26  ;;  %v9158_v30 = vld [vmem:[%s11945_s11 + $0x90] sm:$0xff]   ;;  %v9160_v48 = vld [vmem:[%s11945_s11 + $0x88] sm:$0xff]  }
 0xd68   : > { %v11426_v0 = vrot.slane %v11413_v17, %v9605_v26  ;;  %v5419_v3 = vsel %vm1720_vm11, %v5409_v47, %v5252_v27  ;;  %v5383_v25 = vsel %vm550_vm2, %v5370_v4, %v5168_v5  ;;  %v11502_v40 = vrot.slane %v4746_v42, %v9605_v26  ;;  %v9159_v5 = vld [vmem:[%s11945_s11 + $0xcc] sm:$0xff]  }
 0xd69   : > { %v5410_v55 = vsel %vm9774_vm13, %v5383_v25, %v5208_v28  ;;  %v4845_v43 = vcombine.high %v11356_v59, %v11356_v59  ;;  %v4878_v9 = vcombine.high %v11363_v6, %v11363_v6  ;;  %v11513_v36 = vrot.slane %v4779_v38, %v9605_v26 }
 0xd6a   : > { %v4962_v39 = vunpack.i.h.s16 %v11426_v0  ;;  %v7916_v53 = vpack.i.b16 %v11426_v0, %v11426_v0  ;;  %v5423_v18 = vsel %vm1720_vm11, %v5410_v55, %v5256_v24  ;;  %v11516_v62 = vrot.slane %v4812_v57, %v9605_v26 }
 0xd6b   : > { %v4911_v41 = vcombine.high %v11387_v33, %v11387_v33  ;;  %v4733_v59 = vunpack.i.h.s16 %v11496_v32  ;;  %v4944_v6 = vcombine.high %v11413_v17, %v11413_v17  ;;  %v4766_v22 = vunpack.i.h.s16 %v11502_v40 }
 0xd6c   : > { %v5282_v34 = vpack.i.b16 %v4962_v39, %v4962_v39  ;;  %v5292_v15 = vrot.slane %v7916_v53, %v10168_v37  ;;  %v11529_v1 = vrot.slane %v4845_v43, %v9605_v26  ;;  %v7889_v33 = vpack.i.b16 %v11496_v32, %v11496_v32 }
 0xd6d   : > { %v7893_v21 = vpack.i.b16 %v11502_v40, %v11502_v40  ;;  %v11537_v17 = vrot.slane %v4878_v9, %v9605_v26  ;;  %v4799_v27 = vunpack.i.h.s16 %v11513_v36  ;;  %v4832_v61 = vunpack.i.h.s16 %v11516_v62  ;;  %v9163_v9 = vld [vmem:[%s11945_s11 + $0xbc] sm:$0xff]  }
 0xd6e   : > { %v5449_v54 = vsel %vm10393_vm7, %v5419_v3, %v5292_v15  ;;  %v5296_v60 = vrot.slane %v5282_v34, %v10168_v37  ;;  %v11545_v28 = vrot.slane %v4911_v41, %v9605_v26  ;;  %v4972_v39 = vpack.i.b16 %v4733_v59, %v4733_v59  ;;  %v9161_v3 = vld [vmem:[%s11945_s11 + $0xc4] sm:$0xff]  }
 0xd6f   : > { %8820 = vmatmul.mubr.msk.bf16.vlgmr.msra.gmra.mxu0 %vm6888_vm3, %v5449_v54  ;;  %v11549_v53 = vrot.slane %v4944_v6, %v9605_v26  ;;  %v5020_v24 = vpack.i.b16 %v4766_v22, %v4766_v22  ;;  %v7897_v14 = vpack.i.b16 %v11513_v36, %v11513_v36  ;;  %v4865_v10 = vunpack.i.h.s16 %v11529_v1 }
 0xd70   : > { %8844 = vmatpush3.bf16.msra.mxu0 %v7075_v8  ;;  %v5450_v16 = vsel %vm10393_vm7, %v5423_v18, %v5296_v60  ;;  %8859 = vmatprep.mubr.msk.bf16.mxu0 %vm9211_vm0, %v11970_v29  ;;  %v4988_v34 = vrot.slane %v7889_v33, %v10168_v37  ;;  %v5036_v15 = vrot.slane %v7893_v21, %v10168_v37  ;;  %v4898_v47 = vunpack.i.h.s16 %v11537_v17 }
 0xd71   : > { %8840 = vmatmul.mubr.msk.bf16.vlgmr.msra.gmra.mxu1 %vm6888_vm3, %v5450_v16  ;;  %8845 = vmatprep.subr.bf16.mxu0 %v11970_v29  ;;  %v7901_v26 = vpack.i.b16 %v11516_v62, %v11516_v62  ;;  %v5068_v8 = vpack.i.b16 %v4799_v27, %v4799_v27  ;;  %v5108_v25 = vpack.i.b16 %v4832_v61, %v4832_v61  ;;  %v4931_v60 = vunpack.i.h.s16 %v11545_v28 }
 0xd72   : > { %8864 = vmatpush3.bf16.msra.mxu1 %v7166_v45  ;;  %8879 = vmatprep.mubr.msk.bf16.mxu1 %vm9211_vm0, %v11970_v29  ;;  %v7905_v54 = vpack.i.b16 %v11529_v1, %v11529_v1  ;;  %v4992_v55 = vrot.slane %v4972_v39, %v10168_v37  ;;  %v7909_v18 = vpack.i.b16 %v11537_v17, %v11537_v17  ;;  %v4964_v45 = vunpack.i.h.s16 %v11549_v53 }
 0xd73   : > { %8865 = vmatprep.subr.bf16.mxu1 %v11970_v29  ;;  %v5084_v20 = vrot.slane %v7897_v14, %v10168_v37  ;;  %v7913_v42 = vpack.i.b16 %v11545_v28, %v11545_v28  ;;  %v5124_v38 = vrot.slane %v7901_v26, %v10168_v37  ;;  %v5196_v57 = vpack.i.b16 %v4898_v47, %v4898_v47 }
 0xd74   : > { %8846 = vmatpush3.bf16.msra.mxu0 %v9152_v52  ;;  %v9162_v52 = vld [vmem:[%s11945_s11 + $0x80] sm:$0xff]   ;;  %v5128_v41 = vrot.slane %v5108_v25, %v10168_v37  ;;  %v5172_v59 = vrot.slane %v7905_v54, %v10168_v37  ;;  %v5244_v6 = vpack.i.b16 %v4931_v60, %v4931_v60  ;;  %v5212_v22 = vrot.slane %v7909_v18, %v10168_v37 }
 0xd75   : > { %8847 = vmatprep.subr.bf16.mxu0 %v11970_v29  ;;  %v5284_v27 = vpack.i.b16 %v4964_v45, %v4964_v45  ;;  %v9167_v54 = vld [vmem:[%s11945_s11 + $0x164] ss:$0 sps:$4 sm:$0x77]  }
 0xd76   : > { %8866 = vmatpush3.bf16.msra.mxu1 %v9153_v13  ;;  %v5040_v13 = vrot.slane %v5020_v24, %v10168_v37  ;;  %v5260_v24 = vrot.slane %v7913_v42, %v10168_v37 }
 0xd77   : > { %8867 = vmatprep.subr.bf16.mxu1 %v11970_v29 }
 0xd78   : > { %8848 = vmatpush3.bf16.msra.mxu0 %v9154_v56  ;;  %v5156_v56 = vpack.i.b16 %v4865_v10, %v4865_v10  ;;  %v5332_v10 = vsel %vm9757_vm8, %v4992_v55, %v5040_v13  ;;  %v5304_v55 = vrot.slane %v5284_v27, %v10168_v37  ;;  %v4728_v27 = vcombine.high %v11360_v51, %v11360_v51 }
 0xd79   : > { %8849 = vmatprep.subr.bf16.mxu0 %v11970_v29  ;;  %v4827_v51 = vcombine.high %v11372_v63, %v11372_v63  ;;  %v9175_v63 = vld [vmem:[%s11945_s11 + $0x144] sm:$0xff]  }
 0xd7a   : > { %8868 = vmatpush3.bf16.msra.mxu1 %v9155_v58  ;;  %v5331_v58 = vsel %vm9757_vm8, %v4988_v34, %v5036_v15  ;;  %v5176_v61 = vrot.slane %v5156_v56, %v10168_v37  ;;  %v5216_v34 = vrot.slane %v5196_v57, %v10168_v37  ;;  %v9165_v15 = vld [vmem:[%s11945_s11 + $0xb4] sm:$0xff]  }
 0xd7b   : > { %8869 = vmatprep.subr.bf16.mxu1 %v11970_v29  ;;  %v5347_v14 = vsel %vm1703_vm6, %v5331_v58, %v5084_v20  ;;  %v7348_v58 = vsel %vm1720_vm11, %v9167_v54, 0 }
 0xd7c   : > { %8850 = vmatpush3.bf16.msra.mxu0 %v9156_v11  ;;  %v7917_v11 = vpack.i.b16 %v11549_v53, %v11549_v53  ;;  %v5371_v47 = vsel %vm9766_vm10, %v5347_v14, %v5124_v38  ;;  %v4794_v14 = vcombine.high %v11367_v49, %v11367_v49  ;;  %v4893_v49 = vcombine.high %v11381_v46, %v11381_v46  ;;  %v9176_v46 = vld [vmem:[%s11945_s11 + $0x100] sm:$0xff]  }
 0xd7d   : > { %8851 = vmatprep.subr.bf16.mxu0 %v11970_v29 }
 0xd7e   : > { %8870 = vmatpush3.bf16.msra.mxu1 %v9157_v31  ;;  %v5088_v31 = vrot.slane %v5068_v8, %v10168_v37  ;;  %v5300_v26 = vrot.slane %v7917_v11, %v10168_v37  ;;  %v5264_v8 = vrot.slane %v5244_v6, %v10168_v37  ;;  %v9168_v11 = vld [vmem:[%s11945_s11 + $0x120] sm:$0xff]   ;;  %v9170_v6 = vld [vmem:[%s11945_s11 + $0x118] sm:$0xff]  }
 0xd7f   : > { %8871 = vmatprep.subr.bf16.mxu1 %v11970_v29 }
 0xd80   : > { %8852 = vmatpush3.bf16.msra.mxu0 %v9158_v30  ;;  %v5351_v25 = vsel %vm1703_vm6, %v5332_v10, %v5088_v31  ;;  %v9174_v10 = vld [vmem:[%s11945_s11 + $0x108] sm:$0xff]  }
 0xd81   : > { %8853 = vmatprep.subr.bf16.mxu0 %v11970_v29  ;;  %v5372_v18 = vsel %vm9766_vm10, %v5351_v25, %v5128_v41  ;;  %v9169_v41 = vld [vmem:[%s11945_s11 + $0x15c] sm:$0xff]   ;;  %v11697_v25 = vcombine.high %v11426_v0, %v11426_v0 }
 0xd82   : > { %8872 = vmatpush3.bf16.msra.mxu1 %v9159_v5  ;;  %v9164_v5 = vld [vmem:[%s11945_s11 + $0x78] sm:$0xff]   ;;  %v5391_v13 = vsel %vm550_vm2, %v5372_v18, %v5176_v61 }
 0xd83   : > { %8873 = vmatprep.subr.bf16.mxu1 %v11970_v29  ;;  %v5412_v56 = vsel %vm9774_vm13, %v5391_v13, %v5216_v34  ;;  %v4860_v34 = vcombine.high %v11376_v2, %v11376_v2  ;;  %v7890_v2 = vpack.i.b16 %v4728_v27, %v4728_v27  ;;  %v9177_v0 = vld [vmem:[%s11945_s11 + $0x13c] sm:$0xff]  }
 0xd84   : > { %8854 = vmatpush3.bf16.msra.mxu0 %v9160_v48  ;;  %v5431_v42 = vsel %vm1720_vm11, %v5412_v56, %v5264_v8  ;;  %v4834_v8 = vunpack.i.h.s16 %v4827_v51 }
 0xd85   : > { %8855 = vmatprep.subr.bf16.mxu0 %v11970_v29  ;;  %v5452_v57 = vsel %vm10393_vm7, %v5431_v42, %v5304_v55  ;;  %v7898_v55 = vpack.i.b16 %v4794_v14, %v4794_v14  ;;  %v4867_v18 = vunpack.i.h.s16 %v4860_v34 }
 0xd86   : > { %8874 = vmatpush3.bf16.msra.mxu1 %v9161_v3  ;;  %v5387_v3 = vsel %vm550_vm2, %v5371_v47, %v5172_v59 }
 0xd87   : > { %8875 = vmatprep.subr.bf16.mxu1 %v11970_v29  ;;  %v5411_v60 = vsel %vm9774_vm13, %v5387_v3, %v5212_v22  ;;  %v9171_v22 = vld [vmem:[%s11945_s11 + $0x154] sm:$0xff]   ;;  %v4926_v3 = vcombine.high %v11400_v50, %v11400_v50 }
 0xd88   : > { %8856 = vmatpush3.bf16.msra.mxu0 %v9162_v52 }
 0xd89   : > { %v5650_v7 = vpop.f32.mrf.mxu0  ;;  %8857 = vmatprep.subr.bf16.mxu0 %v11970_v29 }
 0xd8a   : > { %v6692_v33 = vsel %vm6691_vm9, %v5650_v7, 0.0  ;;  %v9166_v7 = vld [vmem:[%s11945_s11 + $0x128] ss:$0 sps:$4 sm:$0x77]   ;;  %8876 = vmatpush3.bf16.msra.mxu1 %v9163_v9 }
 0xd8b   : > { %v8621_v4 = vpop.f32.mrf.mxu0  ;;  %8877 = vmatprep.subr.bf16.mxu1 %v11970_v29  ;;  %v7257_v52 = vsel %vm1720_vm11, %v9166_v7, 0 }
 0xd8c   : > { %8858 = vmatpush3.bf16.msra.mxu0 %v9164_v5  ;;  %v9172_v5 = vld [vmem:[%s11945_s11 + $0x110] sm:$0xff]  }
 0xd8d   : > { %v5653_v16 = vpop.f32.mrf.mxu0  ;;  %8883 = vmatprep.subr.bf16.mxu0 %v11970_v29 }
 0xd8e   : > { %v5427_v16 = vsel %vm1720_vm11, %v5411_v60, %v5260_v24  ;;  %8878 = vmatpush3.bf16.msra.mxu1 %v9165_v15  ;;  %v9173_v24 = vld [vmem:[%s11945_s11 + $0x14c] sm:$0xff]  }
 0xd8f   : > { %v8622_v43 = vpop.f32.mrf.mxu0  ;;  %v5451_v20 = vsel %vm10393_vm7, %v5427_v16, %v5300_v26  ;;  %8903 = vmatprep.subr.bf16.mxu1 %v11970_v29  ;;  %v7902_v16 = vpack.i.b16 %v4827_v51, %v4827_v51 }
 0xd90   : > { %v5719_v30 = vpop.f32.mrf.mxu1  ;;  %8860 = vmatmul.mubr.msk.bf16.vlgmr.msra.gmra.mxu0 %vm6888_vm3, %v5451_v20 }
 0xd91   : > { %v6693_v21 = vsel %vm6691_vm9, %v5719_v30, 0.0  ;;  %8884 = vmatpush3.bf16.msra.mxu0 %v7257_v52  ;;  %8899 = vmatprep.mubr.msk.bf16.mxu0 %vm9211_vm0, %v11970_v29  ;;  %v4900_v52 = vunpack.i.h.s16 %v4893_v49 }
 0xd92   : > { %v6694_v39 = vadd.f32 %v6693_v21, %v6692_v33  ;;  %v8633_v48 = vpop.f32.mrf.mxu1  ;;  %8880 = vmatmul.mubr.msk.bf16.vlgmr.msra.gmra.mxu1 %vm6888_vm3, %v5452_v57  ;;  %8885 = vmatprep.subr.bf16.mxu0 %v11970_v29  ;;  %v4996_v57 = vrot.slane %v7890_v2, %v10168_v37  ;;  %v9182_v2 = vld [vmem:[%s11945_s11 + $0x1a0] ss:$0 sps:$4 sm:$0x77]  }
 0xd93   : > { %8904 = vmatpush3.bf16.msra.mxu1 %v7348_v58  ;;  %8919 = vmatprep.mubr.msk.bf16.mxu1 %vm9211_vm0, %v11970_v29  ;;  %v4761_v48 = vcombine.high %v11350_v23, %v11350_v23  ;;  %v4735_v23 = vunpack.i.h.s16 %v4728_v27  ;;  %v7906_v58 = vpack.i.b16 %v4860_v34, %v4860_v34  ;;  %v7918_v27 = vpack.i.b16 %v11697_v25, %v11697_v25 }
 0xd94   : > { %v5722_v4 = vpop.f32.mrf.mxu1  ;;  %8905 = vmatprep.subr.bf16.mxu1 %v11970_v29 }
 0xd95   : > { %8886 = vmatpush3.bf16.msra.mxu0 %v9168_v11  ;;  %v4768_v26 = vunpack.i.h.s16 %v4761_v48  ;;  %v7894_v47 = vpack.i.b16 %v4761_v48, %v4761_v48  ;;  %v4801_v4 = vunpack.i.h.s16 %v4794_v14  ;;  %v4974_v60 = vpack.i.b16 %v4735_v23, %v4735_v23 }
 0xd96   : > { %v8634_v45 = vpop.f32.mrf.mxu1  ;;  %8887 = vmatprep.subr.bf16.mxu0 %v11970_v29  ;;  %v5110_v11 = vpack.i.b16 %v4834_v8, %v4834_v8  ;;  %v5180_v14 = vrot.slane %v7906_v58, %v10168_v37 }
 0xd97   : > { %8906 = vmatpush3.bf16.msra.mxu1 %v9169_v41  ;;  %v5022_v50 = vpack.i.b16 %v4768_v26, %v4768_v26  ;;  %v5044_v56 = vrot.slane %v7894_v47, %v10168_v37  ;;  %v5070_v42 = vpack.i.b16 %v4801_v4, %v4801_v4  ;;  %v9178_v41 = vld [vmem:[%s11945_s11 + $0xf8] sm:$0xff]  }
 0xd98   : > { %8907 = vmatprep.subr.bf16.mxu1 %v11970_v29 }
 0xd99   : > { %v5788_v38 = vpop.f32.mrf.mxu0  ;;  %8888 = vmatpush3.bf16.msra.mxu0 %v9170_v6  ;;  %v5092_v6 = vrot.slane %v7898_v55, %v10168_v37  ;;  %v5333_v48 = vsel %vm9757_vm8, %v4996_v57, %v5044_v56 }
 0xd9a   : > { %v6695_v43 = vsel %vm6691_vm9, %v5788_v38, 0.0  ;;  %8889 = vmatprep.subr.bf16.mxu0 %v11970_v29  ;;  %v4933_v38 = vunpack.i.h.s16 %v4926_v3 }
 0xd9b   : > { %v6696_v9 = vadd.f32 %v6695_v43, %v6694_v39  ;;  %v8645_v31 = vpop.f32.mrf.mxu0  ;;  %8908 = vmatpush3.bf16.msra.mxu1 %v9171_v22  ;;  %v7910_v43 = vpack.i.b16 %v4893_v49, %v4893_v49  ;;  %v7914_v22 = vpack.i.b16 %v4926_v3, %v4926_v3  ;;  %v5355_v3 = vsel %vm1703_vm6, %v5333_v48, %v5092_v6  ;;  %v9188_v48 = vld [vmem:[%s11945_s11 + $0x188] sm:$0xff]  }
 0xd9c   : > { %8909 = vmatprep.subr.bf16.mxu1 %v11970_v29 }
 0xd9d   : > { %v5791_v59 = vpop.f32.mrf.mxu0  ;;  %8890 = vmatpush3.bf16.msra.mxu0 %v9172_v5  ;;  %v5198_v5 = vpack.i.b16 %v4900_v52, %v4900_v52  ;;  %v5220_v23 = vrot.slane %v7910_v43, %v10168_v37  ;;  %v5268_v4 = vrot.slane %v7914_v22, %v10168_v37  ;;  %v9185_v22 = vld [vmem:[%s11945_s11 + $0x1d4] sm:$0xff]  }
 0xd9e   : > { %8891 = vmatprep.subr.bf16.mxu0 %v11970_v29  ;;  %v5000_v59 = vrot.slane %v4974_v60, %v10168_v37 }
 0xd9f   : > { %v8646_v30 = vpop.f32.mrf.mxu0  ;;  %8910 = vmatpush3.bf16.msra.mxu1 %v9173_v24  ;;  %v5096_v24 = vrot.slane %v5070_v42, %v10168_v37  ;;  %v7439_v42 = vsel %vm1720_vm11, %v9182_v2, 0 }
 0xda0   : > { %v5857_v33 = vpop.f32.mrf.mxu1  ;;  %8911 = vmatprep.subr.bf16.mxu1 %v11970_v29  ;;  %v5158_v30 = vpack.i.b16 %v4867_v18, %v4867_v18 }
 0xda1   : > { %v6697_v21 = vsel %vm6691_vm9, %v5857_v33, 0.0  ;;  %8892 = vmatpush3.bf16.msra.mxu0 %v9174_v10  ;;  %v5048_v33 = vrot.slane %v5022_v50, %v10168_v37  ;;  %v5136_v10 = vrot.slane %v5110_v11, %v10168_v37 }
 0xda2   : > { %v6698_v61 = vadd.f32 %v6697_v21, %v6696_v9  ;;  %v8657_v39 = vpop.f32.mrf.mxu1  ;;  %8893 = vmatprep.subr.bf16.mxu0 %v11970_v29  ;;  %v4966_v9 = vunpack.i.h.s16 %v11697_v25  ;;  %v5132_v21 = vrot.slane %v7902_v16, %v10168_v37  ;;  %v5184_v49 = vrot.slane %v5158_v30, %v10168_v37  ;;  %v9183_v16 = vld [vmem:[%s11945_s11 + $0x1dc] ss:$0 sps:$4 sm:$0x77]  }
 0xda3   : > { %8912 = vmatpush3.bf16.msra.mxu1 %v9175_v63  ;;  %v9179_v39 = vld [vmem:[%s11945_s11 + $0x134] sm:$0xff]   ;;  %v5334_v8 = vsel %vm9757_vm8, %v5000_v59, %v5048_v33  ;;  %v5224_v25 = vrot.slane %v5198_v5, %v10168_v37  ;;  %v7530_v43 = vsel %vm1720_vm11, %v9183_v16, 0 }
 0xda4   : > { %v5860_v7 = vpop.f32.mrf.mxu1  ;;  %8913 = vmatprep.subr.bf16.mxu1 %v11970_v29  ;;  %v5286_v26 = vpack.i.b16 %v4966_v9, %v4966_v9  ;;  %v5373_v60 = vsel %vm9766_vm10, %v5355_v3, %v5132_v21  ;;  %v5359_v50 = vsel %vm1703_vm6, %v5334_v8, %v5096_v24  ;;  %v9186_v21 = vld [vmem:[%s11945_s11 + $0x190] sm:$0xff]   ;;  %v4729_v24 = vcombine.high %v11496_v32, %v11496_v32  ;;  %v9190_v32 = vld [vmem:[%s11945_s11 + $0x180] sm:$0xff]  }
 0xda5   : > { %8894 = vmatpush3.bf16.msra.mxu0 %v9176_v46  ;;  %v5246_v7 = vpack.i.b16 %v4933_v38, %v4933_v38  ;;  %v5308_v46 = vrot.slane %v7918_v27, %v10168_v37  ;;  %v5395_v18 = vsel %vm550_vm2, %v5373_v60, %v5180_v14  ;;  %v9187_v27 = vld [vmem:[%s11945_s11 + $0x1cc] sm:$0xff]   ;;  %v4927_v3 = vcombine.high %v11545_v28, %v11545_v28 }
 0xda6   : > { %v8658_v15 = vpop.f32.mrf.mxu1  ;;  %8895 = vmatprep.subr.bf16.mxu0 %v11970_v29  ;;  %v5413_v52 = vsel %vm9774_vm13, %v5395_v18, %v5220_v23  ;;  %v4795_v23 = vcombine.high %v11513_v36, %v11513_v36  ;;  %v4894_v36 = vcombine.high %v11537_v17, %v11537_v17  ;;  %v4960_v8 = vcombine.high %v11549_v53, %v11549_v53  ;;  %v9192_v17 = vld [vmem:[%s11945_s11 + $0x178] sm:$0xff]  }
 0xda7   : > { %8914 = vmatpush3.bf16.msra.mxu1 %v9177_v0  ;;  %v9180_v15 = vld [vmem:[%s11945_s11 + $0xf0] sm:$0xff]   ;;  %v5435_v56 = vsel %vm1720_vm11, %v5413_v52, %v5268_v4 }
 0xda8   : > { %8915 = vmatprep.subr.bf16.mxu1 %v11970_v29  ;;  %v5453_v38 = vsel %vm10393_vm7, %v5435_v56, %v5308_v46  ;;  %v7899_v46 = vpack.i.b16 %v4795_v23, %v4795_v23  ;;  %v9193_v53 = vld [vmem:[%s11945_s11 + $0x1b4] sm:$0xff]  }
 0xda9   : > { %v5926_v54 = vpop.f32.mrf.mxu0  ;;  %8896 = vmatpush3.bf16.msra.mxu0 %v9178_v41  ;;  %v9184_v41 = vld [vmem:[%s11945_s11 + $0x198] sm:$0xff]  }
 0xdaa   : > { %v6699_v45 = vsel %vm6691_vm9, %v5926_v54, 0.0  ;;  %8897 = vmatprep.subr.bf16.mxu0 %v11970_v29  ;;  %v9181_v54 = vld [vmem:[%s11945_s11 + $0x12c] sm:$0xff]  }
 0xdab   : > { %v6700_v13 = vadd.f32 %v6699_v45, %v6698_v61  ;;  %v8669_v20 = vpop.f32.mrf.mxu0  ;;  %8916 = vmatpush3.bf16.msra.mxu1 %v9179_v39  ;;  %v5272_v45 = vrot.slane %v5246_v7, %v10168_v37 }
 0xdac   : > { %8917 = vmatprep.subr.bf16.mxu1 %v11970_v29  ;;  %v5374_v20 = vsel %vm9766_vm10, %v5359_v50, %v5136_v10  ;;  %v9189_v10 = vld [vmem:[%s11945_s11 + $0x1c4] sm:$0xff]  }
 0xdad   : > { %v5929_v31 = vpop.f32.mrf.mxu0  ;;  %8898 = vmatpush3.bf16.msra.mxu0 %v9180_v15  ;;  %v5399_v58 = vsel %vm550_vm2, %v5374_v20, %v5184_v49 }
 0xdae   : > { %8923 = vmatprep.subr.bf16.mxu0 %v11970_v29  ;;  %v5414_v57 = vsel %vm9774_vm13, %v5399_v58, %v5224_v25  ;;  %v7911_v58 = vpack.i.b16 %v4894_v36, %v4894_v36 }
 0xdaf   : > { %v8670_v61 = vpop.f32.mrf.mxu0  ;;  %8918 = vmatpush3.bf16.msra.mxu1 %v9181_v54  ;;  %v5439_v11 = vsel %vm1720_vm11, %v5414_v57, %v5272_v45  ;;  %v4902_v45 = vunpack.i.h.s16 %v4894_v36  ;;  %v9194_v57 = vld [vmem:[%s11945_s11 + $0x170] sm:$0xff]  }
 0xdb0   : > { %v5995_v51 = vpop.f32.mrf.mxu1  ;;  %8900 = vmatmul.mubr.msk.bf16.vlgmr.msra.gmra.mxu0 %vm6888_vm3, %v5453_v38  ;;  %8943 = vmatprep.subr.bf16.mxu1 %v11970_v29 }
 0xdb1   : > { %v6701_v34 = vsel %vm6691_vm9, %v5995_v51, 0.0  ;;  %8924 = vmatpush3.bf16.msra.mxu0 %v7439_v42  ;;  %8939 = vmatprep.mubr.msk.bf16.mxu0 %vm9211_vm0, %v11970_v29  ;;  %v4762_v51 = vcombine.high %v11502_v40, %v11502_v40  ;;  %v4737_v40 = vunpack.i.h.s16 %v4729_v24 }
 0xdb2   : > { %v6702_v63 = vadd.f32 %v6701_v34, %v6700_v13  ;;  %v8681_v47 = vpop.f32.mrf.mxu1  ;;  %v5312_v13 = vrot.slane %v5286_v26, %v10168_v37  ;;  %8925 = vmatprep.subr.bf16.mxu0 %v11970_v29  ;;  %v4828_v34 = vcombine.high %v11516_v62, %v11516_v62  ;;  %v4861_v26 = vcombine.high %v11529_v1, %v11529_v1  ;;  %v9191_v62 = vld [vmem:[%s11945_s11 + $0x1bc] sm:$0xff]  }
 0xdb3   : > { %v4803_v47 = vunpack.i.h.s16 %v4795_v23  ;;  %v7891_v1 = vpack.i.b16 %v4729_v24, %v4729_v24  ;;  %v7895_v2 = vpack.i.b16 %v4762_v51, %v4762_v51  ;;  %v4976_v54 = vpack.i.b16 %v4737_v40, %v4737_v40 }
 0xdb4   : > { %v5998_v55 = vpop.f32.mrf.mxu1  ;;  %v5454_v31 = vsel %vm10393_vm7, %v5439_v11, %v5312_v13  ;;  %v4836_v4 = vunpack.i.h.s16 %v4828_v34  ;;  %v4869_v60 = vunpack.i.h.s16 %v4861_v26  ;;  %v7903_v18 = vpack.i.b16 %v4828_v34, %v4828_v34 }
 0xdb5   : > { %8920 = vmatmul.mubr.msk.bf16.vlgmr.msra.gmra.mxu1 %vm6888_vm3, %v5454_v31  ;;  %8926 = vmatpush3.bf16.msra.mxu0 %v9184_v41  ;;  %v5072_v52 = vpack.i.b16 %v4803_v47, %v4803_v47  ;;  %v7907_v20 = vpack.i.b16 %v4861_v26, %v4861_v26  ;;  %v5004_v56 = vrot.slane %v7891_v1, %v10168_v37  ;;  %v4968_v11 = vunpack.i.h.s16 %v4960_v8  ;;  %v9197_v26 = vld [vmem:[%s11945_s11 + $0x1a4] sm:$0xff]  }
 0xdb6   : > { %v8682_v0 = vpop.f32.mrf.mxu1  ;;  %8944 = vmatpush3.bf16.msra.mxu1 %v7530_v43  ;;  %8959 = vmatprep.mubr.msk.bf16.mxu1 %vm9211_vm0, %v11970_v29  ;;  %v5112_v13 = vpack.i.b16 %v4836_v4, %v4836_v4  ;;  %v5052_v42 = vrot.slane %v7895_v2, %v10168_v37  ;;  %v5008_v43 = vrot.slane %v4976_v54, %v10168_v37 }
 0xdb7   : > { %8945 = vmatprep.subr.bf16.mxu1 %v11970_v29  ;;  %8927 = vmatprep.subr.bf16.mxu0 %v11970_v29  ;;  %v4935_v0 = vunpack.i.h.s16 %v4927_v3  ;;  %v5160_v31 = vpack.i.b16 %v4869_v60, %v4869_v60  ;;  %v7915_v41 = vpack.i.b16 %v4927_v3, %v4927_v3 }
 0xdb9   : > { %v6064_v9 = vpop.f32.mrf.mxu0  ;;  %8928 = vmatpush3.bf16.msra.mxu0 %v9186_v21  ;;  %v7919_v21 = vpack.i.b16 %v4960_v8, %v4960_v8  ;;  %v5192_v23 = vrot.slane %v5160_v31, %v10168_v37 }
 0xdba   : > { %v6703_v59 = vsel %vm6691_vm9, %v6064_v9, 0.0  ;;  %8946 = vmatpush3.bf16.msra.mxu1 %v9185_v22  ;;  %8929 = vmatprep.subr.bf16.mxu0 %v11970_v29  ;;  %v5100_v9 = vrot.slane %v7899_v46, %v10168_v37 }
 0xdbb   : > { %v6704_v6 = vadd.f32 %v6703_v59, %v6702_v63  ;;  %v8693_v30 = vpop.f32.mrf.mxu0  ;;  %8947 = vmatprep.subr.bf16.mxu1 %v11970_v29  ;;  %v4770_v63 = vunpack.i.h.s16 %v4762_v51  ;;  %v5335_v51 = vsel %vm9757_vm8, %v5004_v56, %v5052_v42 }
 0xdbc   : > { %v5200_v30 = vpack.i.b16 %v4902_v45, %v4902_v45  ;;  %v5363_v40 = vsel %vm1703_vm6, %v5335_v51, %v5100_v9  ;;  %v9199_v51 = vld [vmem:[%s11947_s13] sm:$0xff]  }
 0xdbd   : > { %v6067_v33 = vpop.f32.mrf.mxu0  ;;  %8930 = vmatpush3.bf16.msra.mxu0 %v9188_v48  ;;  %v5024_v28 = vpack.i.b16 %v4770_v63, %v4770_v63  ;;  %v5248_v48 = vpack.i.b16 %v4935_v0, %v4935_v0 }
 0xdbe   : > { %8948 = vmatpush3.bf16.msra.mxu1 %v9187_v27  ;;  %8931 = vmatprep.subr.bf16.mxu0 %v11970_v29  ;;  %v9195_v33 = vld [vmem:[%s11945_s11 + $0x1ac] sm:$0xff]   ;;  %v5144_v27 = vrot.slane %v5112_v13, %v10168_v37  ;;  %v5232_v36 = vrot.slane %v5200_v30, %v10168_v37 }
 0xdbf   : > { %v8694_v5 = vpop.f32.mrf.mxu0  ;;  %8949 = vmatprep.subr.bf16.mxu1 %v11970_v29  ;;  %v5056_v59 = vrot.slane %v5024_v28, %v10168_v37  ;;  %v5280_v3 = vrot.slane %v5248_v48, %v10168_v37 }
 0xdc0   : > { %v5104_v5 = vrot.slane %v5072_v52, %v10168_v37 }
 0xdc1   : > { %v6133_v61 = vpop.f32.mrf.mxu1  ;;  %8932 = vmatpush3.bf16.msra.mxu0 %v9190_v32  ;;  %v5276_v32 = vrot.slane %v7915_v41, %v10168_v37 }
 0xdc2   : > { %v6705_v39 = vsel %vm6691_vm9, %v6133_v61, 0.0  ;;  %8950 = vmatpush3.bf16.msra.mxu1 %v9189_v10  ;;  %8933 = vmatprep.subr.bf16.mxu0 %v11970_v29  ;;  %v5188_v61 = vrot.slane %v7907_v20, %v10168_v37  ;;  %v5288_v10 = vpack.i.b16 %v4968_v11, %v4968_v11 }
 0xdc3   : > { %v6706_v14 = vadd.f32 %v6705_v39, %v6704_v6  ;;  %v8705_v7 = vpop.f32.mrf.mxu1  ;;  %8951 = vmatprep.subr.bf16.mxu1 %v11970_v29  ;;  %v5140_v6 = vrot.slane %v7903_v18, %v10168_v37 }
 0xdc4   : > { %v5228_v7 = vrot.slane %v7911_v58, %v10168_v37  ;;  %v5320_v8 = vrot.slane %v5288_v10, %v10168_v37 }
 0xdc5   : > { %v6136_v15 = vpop.f32.mrf.mxu1  ;;  %8934 = vmatpush3.bf16.msra.mxu0 %v9192_v17  ;;  %v5375_v63 = vsel %vm9766_vm10, %v5363_v40, %v5140_v6 }
 0xdc6   : > { %8952 = vmatpush3.bf16.msra.mxu1 %v9191_v62  ;;  %8935 = vmatprep.subr.bf16.mxu0 %v11970_v29  ;;  %v5336_v62 = vsel %vm9757_vm8, %v5008_v43, %v5056_v59  ;;  %v5403_v4 = vsel %vm550_vm2, %v5375_v63, %v5188_v61 }
 0xdc7   : > { %v8706_v49 = vpop.f32.mrf.mxu1  ;;  %8953 = vmatprep.subr.bf16.mxu1 %v11970_v29  ;;  %v5367_v1 = vsel %vm1703_vm6, %v5336_v62, %v5104_v5  ;;  %v5415_v2 = vsel %vm9774_vm13, %v5403_v4, %v5228_v7  ;;  %v9198_v7 = vld [vmem:[%s11947_s13 + $0x8] sm:$0xff]  }
 0xdc8   : > { %v5316_v49 = vrot.slane %v7919_v21, %v10168_v37  ;;  %v5443_v17 = vsel %vm1720_vm11, %v5415_v2, %v5276_v32 }
 0xdc9   : > { %8936 = vmatpush3.bf16.msra.mxu0 %v9194_v57 }
 0xdca   : > { %v6202_v25 = vpop.f32.mrf.mxu0  ;;  %8954 = vmatpush3.bf16.msra.mxu1 %v9193_v53  ;;  %8937 = vmatprep.subr.bf16.mxu0 %v11970_v29  ;;  %v5455_v46 = vsel %vm10393_vm7, %v5443_v17, %v5316_v49 }
 0xdcb   : > { %v6707_v55 = vsel %vm6691_vm9, %v6202_v25, 0.0  ;;  %8955 = vmatprep.subr.bf16.mxu1 %v11970_v29  ;;  %v5376_v25 = vsel %vm9766_vm10, %v5367_v1, %v5144_v27 }
 0xdcc   : > { %v6708_v50 = vadd.f32 %v6707_v55, %v6706_v14  ;;  %v8717_v16 = vpop.f32.mrf.mxu0  ;;  %v9196_v14 = vld [vmem:[%s11945_s11 + $0x168] sm:$0xff]   ;;  %v5407_v54 = vsel %vm550_vm2, %v5376_v25, %v5192_v23 }
 0xdcd   : > { %8938 = vmatpush3.bf16.msra.mxu0 %v9196_v14  ;;  %v5416_v60 = vsel %vm9774_vm13, %v5407_v54, %v5232_v36 }
 0xdce   : > { %v6205_v38 = vpop.f32.mrf.mxu0  ;;  %8956 = vmatpush3.bf16.msra.mxu1 %v9195_v33  ;;  %8963 = vmatprep.subr.bf16.mxu0 %v11970_v29  ;;  %v5447_v37 = vsel %vm1720_vm11, %v5416_v60, %v5280_v3 }
 0xdcf   : > { %8957 = vmatprep.subr.bf16.mxu1 %v11970_v29  ;;  %v5456_v55 = vsel %vm10393_vm7, %v5447_v37, %v5320_v8 }
 0xdd0   : > { %v8718_v22 = vpop.f32.mrf.mxu0  ;;  %8940 = vmatmul.mubr.msk.bf16.vlgmr.msra.gmra.mxu0 %vm6888_vm3, %v5455_v46 }
 0xdd1   : > { %v6271_v39 = vpop.f32.mrf.mxu1  ;;  %8967 = vmatprep.mubr.msk.bf16.mxu0 %vm9211_vm0, %v11970_v29  ;;  %8964 = vmatpush3.bf16.msra.mxu0 %v9198_v7  ;;  %vm7664_vm0 = vcmask 7168  }
 0xdd2   : > { %v6709_v24 = vsel %vm6691_vm9, %v6271_v39, 0.0  ;;  %8958 = vmatpush3.bf16.msra.mxu1 %v9197_v26  ;;  %8965 = vmatprep.subr.bf16.mxu0 %v11970_v29 }
 0xdd3   : > { %v6710_v34 = vadd.f32 %v6709_v24, %v6708_v50  ;;  %v8729_v15 = vpop.f32.mrf.mxu1 }
 0xdd5   : > { %v6274_v47 = vpop.f32.mrf.mxu1  ;;  %8960 = vmatmul.mubr.msk.bf16.vlgmr.msra.gmra.mxu1 %vm6888_vm3, %v5456_v55  ;;  %8966 = vmatpush3.bf16.msra.mxu0 %v9199_v51 }
 0xdd7   : > { %v8730_v19 = vpop.f32.mrf.mxu1 }
 0xdda   : > { %v6340_v35 = vpop.f32.mrf.mxu0 }
 0xddb   : > { %v6711_v28 = vsel %vm6691_vm9, %v6340_v35, 0.0 }
 0xddc   : > { %v6712_v18 = vadd.f32 %v6711_v28, %v6710_v34  ;;  %v8741_v45 = vpop.f32.mrf.mxu0 }
 0xdde   : > { %v6343_v50 = vpop.f32.mrf.mxu0 }
 0xde0   : > { %v8742_v44 = vpop.f32.mrf.mxu0 }
 0xde1   : > { %v6409_v16 = vpop.f32.mrf.mxu1 }
 0xde2   : > { %v6713_v53 = vsel %vm6691_vm9, %v6409_v16, 0.0 }
 0xde3   : > { %v6714_v52 = vadd.f32 %v6713_v53, %v6712_v18  ;;  %v8753_v13 = vpop.f32.mrf.mxu1 }
 0xde5   : > { %v6412_v20 = vpop.f32.mrf.mxu1 }
 0xde7   : > { %v8754_v0 = vpop.f32.mrf.mxu1 }
 0xdea   : > { %v6478_v12 = vpop.f32.mrf.mxu0 }
 0xdeb   : > { %v6715_v56 = vsel %vm6691_vm9, %v6478_v12, 0.0 }
 0xdec   : > { %v6716_v42 = vadd.f32 %v6715_v56, %v6714_v52  ;;  %v8765_v58 = vpop.f32.mrf.mxu0 }
 0xdee   : > { %v6481_v38 = vpop.f32.mrf.mxu0 }
 0xdf0   : > { %v8766_v57 = vpop.f32.mrf.mxu0 }
 0xdf1   : > { %v6547_v11 = vpop.f32.mrf.mxu1 }
 0xdf2   : > { %v6717_v43 = vsel %vm6691_vm9, %v6547_v11, 0.0  ;;  %v8072_v11 = vld [vmem:[%s11946_s12] ss:$0 sm:$0xff] }
 0xdf3   : > { %v6718_v9 = vadd.f32 %v6717_v43, %v6716_v42  ;;  %v8777_v31 = vpop.f32.mrf.mxu1 }
 0xdf5   : > { %v6550_v41 = vpop.f32.mrf.mxu1 }
 0xdf7   : > { %v8778_v59 = vpop.f32.mrf.mxu1 }
 0xdfa   : > { %v6616_v6 = vpop.f32.mrf.mxu0 }
 0xdfb   : > { %v6719_v30 = vsel %vm6691_vm9, %v6616_v6, 0.0 }
 0xdfc   : > { %v6720_v22 = vadd.f32 %v6719_v30, %v6718_v9  ;;  %v8789_v33 = vpop.f32.mrf.mxu0 }
 0xdfe   : > { %v6619_v21 = vpop.f32.mrf.mxu0 }
 0xe00   : > { %v8790_v5 = vpop.f32.mrf.mxu0 }
 0xe01   : > { %v6685_v27 = vpop.f32.mrf.mxu1 }
 0xe02   : > { %v6721_v61 = vsel %vm6691_vm9, %v6685_v27, 0.0 }
 0xe03   : > { %v6722_v39 = vadd.f32 %v6721_v61, %v6720_v22  ;;  %v8801_v48 = vpop.f32.mrf.mxu1  ;;  %v8073_v22 = vld [vmem:[#allocation2] ss:$0 sm:$0xff] }
 0xe05   : > { %v6688_v24 = vpop.f32.mrf.mxu1 }
 0xe07   : > { %v8802_v14 = vpop.f32.mrf.mxu1 }
 0xe2f   : > { %v6929_v10 = vpop.f32.mrf.mxu0 }
 0xe30   : > { %v7572_v15 = vsel %vm6691_vm9, %v6929_v10, 0.0 }
 0xe31   : > { %v8821_v23 = vpop.f32.mrf.mxu0  ;;  %v7020_v34 = vpop.f32.mrf.mxu1 }
 0xe32   : > { %v7573_v32 = vsel %vm6691_vm9, %v7020_v34, 0.0 }
 0xe33   : > { %v7574_v40 = vadd.f32 %v7573_v32, %v7572_v15  ;;  %v6932_v26 = vpop.f32.mrf.mxu0  ;;  %v8841_v49 = vpop.f32.mrf.mxu1 }
 0xe35   : > { %v8822_v63 = vpop.f32.mrf.mxu0  ;;  %v7023_v36 = vpop.f32.mrf.mxu1 }
 0xe37   : > { %v8842_v62 = vpop.f32.mrf.mxu1 }
 0xe50   : > { %v7111_v47 = vpop.f32.mrf.mxu0 }
 0xe51   : > { %v7575_v28 = vsel %vm6691_vm9, %v7111_v47, 0.0 }
 0xe52   : > { %v8861_v4 = vpop.f32.mrf.mxu0  ;;  %v7202_v3 = vpop.f32.mrf.mxu1  ;;  %v7576_v18 = vadd.f32 %v7575_v28, %v7574_v40 }
 0xe53   : > { %v7577_v45 = vsel %vm6691_vm9, %v7202_v3, 0.0 }
 0xe54   : > { %v7114_v1 = vpop.f32.mrf.mxu0  ;;  %v8881_v2 = vpop.f32.mrf.mxu1  ;;  %v7578_v44 = vadd.f32 %v7577_v45, %v7576_v18 }
 0xe56   : > { %v8862_v29 = vpop.f32.mrf.mxu0  ;;  %v7205_v8 = vpop.f32.mrf.mxu1 }
 0xe58   : > { %v8882_v25 = vpop.f32.mrf.mxu1 }
 0xe70   : > { %v7293_v19 = vpop.f32.mrf.mxu0 }
 0xe71   : > { %v7579_v50 = vsel %vm6691_vm9, %v7293_v19, 0.0 }
 0xe72   : > { %v8901_v17 = vpop.f32.mrf.mxu0  ;;  %v7580_v16 = vadd.f32 %v7579_v50, %v7578_v44 }
 0xe74   : > { %v7296_v46 = vpop.f32.mrf.mxu0 }
 0xe75   : > { %v7384_v54 = vpop.f32.mrf.mxu1 }
 0xe76   : > { %v8902_v37 = vpop.f32.mrf.mxu0  ;;  %v7581_v53 = vsel %vm6691_vm9, %v7384_v54, 0.0 }
 0xe77   : > { %v8921_v60 = vpop.f32.mrf.mxu1  ;;  %v7582_v52 = vadd.f32 %v7581_v53, %v7580_v16 }
 0xe79   : > { %v7387_v35 = vpop.f32.mrf.mxu1 }
 0xe7b   : > { %v8922_v55 = vpop.f32.mrf.mxu1 }
 0xe90   : > { %v7475_v13 = vpop.f32.mrf.mxu0 }
 0xe91   : > { %v7583_v20 = vsel %vm6691_vm9, %v7475_v13, 0.0 }
 0xe92   : > { %v7584_v0 = vadd.f32 %v7583_v20, %v7582_v52  ;;  %v8941_v12 = vpop.f32.mrf.mxu0 }
 0xe94   : > { %v7478_v38 = vpop.f32.mrf.mxu0 }
 0xe95   : > { %v7566_v56 = vpop.f32.mrf.mxu1 }
 0xe96   : > { %v7585_v42 = vsel %vm6691_vm9, %v7566_v56, 0.0  ;;  %v8942_v9 = vpop.f32.mrf.mxu0 }
 0xe97   : > { %v7586_v58 = vadd.f32 %v7585_v42, %v7584_v0  ;;  %v8961_v57 = vpop.f32.mrf.mxu1 }
 0xe99   : > { %v7587_v43 = vadd.f32 %v7586_v58, %v6722_v39  ;;  %v7569_v31 = vpop.f32.mrf.mxu1 }
 0xe9b   : > { %v7595_v41 = vadd.f32 %v8072_v11, %v7587_v43  ;;  %v8962_v59 = vpop.f32.mrf.mxu1 }
 0xe9d   : > { %v7596_v6 = vmax.f32 %v7595_v41, 0.0 }
 0xe9f   : > { %v7597_v30 = vpack.c.bf16 %v7596_v6, %v7596_v6 }
 0xea1   : > { %8968 = vmatmul.mubr.msk.bf16.vlgmr.msra.gmra.mxu0 %vm6691_vm9, %v7597_v30 }
 0xf61   : > { %v7658_v33 = vpop.f32.mrf.mxu0 }
 0xf62   : > { %v7659_v21 = vadd.f32 %v8073_v22, %v7658_v33 }
 0xf63   : > { %v8969_v5 = vpop.f32.mrf.mxu0 }
 0xf64   : > { %7665 = vst.msk [vmem:[%s518_s16] sm:$0xff] %vm7664_vm0, %v7659_v21 }
 0xf65   : > { %v7661_v27 = vpop.f32.mrf.mxu0 }
 0xf67   : > { %v8970_v61 = vpop.f32.mrf.mxu0 }
 0xf68 PF: > { %s27_s20 = sadd.s32 1, %s9207_s20  }
 0xf69   : > { %p24_p5 = scmp.ge.s32.totalorder %s27_s20, 4  }
 0xf6b   :  { %26 = sbr.rel (!%p24_p5) target bundleno = 3 (0x3), region = 127 }

</bundles_post_ra>
